<compile_context>
chip_gen: v5e
topology: v5e:2x2
jax: 0.10.0
libtpu: 0.0.40
codegen_flags: <defaults>
</compile_context>

<pallas_src>
import functools
from typing import NamedTuple

import numpy as np
import jax
import jax.numpy as jnp
from jax.experimental import pallas as pl
from jax.experimental.pallas import tpu as pltpu


# ----------------------------------------------------------------------------
# Math helpers (kernel-side only)
# ----------------------------------------------------------------------------

def _erf(x):
    # Abramowitz & Stegun 7.1.26 erf approximation; the divide is routed to the
    # EUP via an approximate reciprocal (error ~1e-4, inside this kernel's bf16
    # matmul error budget).
    p = np.float32(0.3275911)
    a1 = np.float32(0.254829592)
    a2 = np.float32(-0.284496736)
    a3 = np.float32(1.421413741)
    a4 = np.float32(-1.453152027)
    a5 = np.float32(1.061405429)
    z = jnp.abs(x)
    t = pl.reciprocal(np.float32(1.0) + p * z, approx=True)
    poly = ((((a5 * t + a4) * t + a3) * t + a2) * t + a1) * t
    y = np.float32(1.0) - poly * jnp.exp(-z * z)
    return jnp.where(x >= 0, y, -y)


def _gelu_exact(x):
    # PyTorch nn.GELU() default = exact (erf) GELU.
    return np.float32(0.5) * x * (np.float32(1.0) + _erf(x * np.float32(0.7071067811865476)))


# ----------------------------------------------------------------------------
# Kernel
# ----------------------------------------------------------------------------

def convnext_block_kernel(x_ref, slab_ref, b1_ref, w1_ref, w2_ref, o_ref,
                          *, kernel_size, eps, seg_len, m_tile):
    # One grid step processes a (C, M) slab, M = bn * seg_len (bn batch elements
    # packed along the lane axis by the wrapper).
    #
    # x_ref:    (1, C, M)  f32
    # slab_ref: (C, K+5)   f32   [conv taps 0..K-1 | conv_b | ln_w | ln_b | fc2_b | gamma]
    # b1_ref:   (H, 1)     f32   fc1 bias
    # w1_ref:   (H, C)     bf16  fc1 weight (PyTorch (out, in) layout)
    # w2_ref:   (C, H)     bf16  fc2 weight
    # o_ref:    (1, C, M)
    K = kernel_size
    L = seg_len
    C, M = x_ref.shape[1], x_ref.shape[2]
    H = w1_ref.shape[0]
    pad_l = (K - 1) // 2

    slab = slab_ref[...]
    cw = slab[:, 0:K]                       # (C, K) depthwise taps
    convb = slab[:, K:K + 1]                # (C, 1)
    lnw = slab[:, K + 1:K + 2]
    lnb = slab[:, K + 2:K + 3]
    b2 = slab[:, K + 3:K + 4]
    gamma = slab[:, K + 4:K + 5]

    x = x_ref[0].astype(jnp.float32)        # (C, M)

    # ---- depthwise Conv1d(dim, dim, K, padding='same', groups=dim) ----------
    # XLU lane rotates + per-tap boundary masks; no padded copy, no unaligned
    # slices.  `pos` is the lane position inside each packed batch segment, so
    # the implicit zero padding never bleeds across batch boundaries.
    lane = jax.lax.broadcasted_iota(jnp.int32, (1, M), 1)
    pos = lane if M == L else lane % L
    acc = jnp.zeros((C, M), jnp.float32)
    for k in range(K):                      # static unroll over taps
        s = k - pad_l
        if s == 0:
            shifted = x
        else:
            shifted = pltpu.roll(x, shift=(-s) % M, axis=1)  # shifted[p] = x[p+s]
        tap = shifted * cw[:, k:k + 1]
        if s > 0:
            tap = jnp.where(pos < (L - s), tap, np.float32(0.0))
        elif s < 0:
            tap = jnp.where(pos >= (-s), tap, np.float32(0.0))
        acc = acc + tap
    h = acc + convb

    # ---- LayerNorm over channels (sublane axis), biased variance ------------
    mu = jnp.mean(h, axis=0, keepdims=True)                 # (1, M)
    d = h - mu
    var = jnp.mean(d * d, axis=0, keepdims=True)
    h = d * jax.lax.rsqrt(var + np.float32(eps)) * lnw + lnb

    # ---- MLP: fc1 -> GELU -> fc2 -> layer-scale -> + residual ---------------
    # bf16 MXU operands with f32 accumulation.  Chunked along M so the
    # (H, m_tile) GELU intermediates bound live VMEM.  Broadcasts are hoisted
    # out of the loop (m_tile divides M), and each chunk is stored straight
    # into o_ref; the residual is re-read from x_ref per chunk.
    w1 = w1_ref[...]                                        # (H, C) bf16
    w2 = w2_ref[...]                                        # (C, H) bf16
    b1_bc = jnp.broadcast_to(b1_ref[...], (H, m_tile))
    g_bc = jnp.broadcast_to(gamma, (C, m_tile))
    b2g_bc = jnp.broadcast_to(b2 * gamma, (C, m_tile))      # gamma*(h2+b2) = gamma*h2 + gamma*b2
    n_chunks = M // m_tile
    for ci in range(n_chunks):                              # static unroll
        m0 = ci * m_tile
        hc = h[:, m0:m0 + m_tile].astype(jnp.bfloat16)      # (C, m_tile)
        h1 = jnp.dot(w1, hc, preferred_element_type=jnp.float32) + b1_bc
        h1 = _gelu_exact(h1)                                # (H, m_tile) f32
        h2 = jnp.dot(w2, h1.astype(jnp.bfloat16),
                     preferred_element_type=jnp.float32)    # (C, m_tile)
        res = x_ref[0, :, m0:m0 + m_tile].astype(jnp.float32)
        o_ref[0, :, m0:m0 + m_tile] = (h2 * g_bc + b2g_bc + res).astype(o_ref.dtype)


# ----------------------------------------------------------------------------
# Generation-aware configuration & tiling
# ----------------------------------------------------------------------------

class _Cfg(NamedTuple):
    vmem_limit: int
    m_target: int
    mxu_align: int
    min_grid_steps: int
    block_bytes_cap: int


def _tpu_config():
    kind = ""
    try:
        kind = jax.devices()[0].device_kind.lower()
    except Exception:
        pass
    is_v5e = ("v5 lite" in kind) or ("v5e" in kind) or ("v5litepod" in kind)
    is_v6e = "v6" in kind
    vmem_cap = None
    try:
        vmem_cap = int(pltpu.get_tpu_info().vmem_capacity_bytes)
    except Exception:
        pass
    if vmem_cap is None:
        # Conservative fallback: assume the small (64 MiB) VMEM unless we
        # positively recognise a 128 MiB part.
        big = is_v5e or is_v6e or ("v5" in kind) or ("v4" in kind)
        vmem_cap = (128 << 20) if big else (64 << 20)
    small_vmem = vmem_cap < (100 << 20)
    return _Cfg(
        vmem_limit=(40 << 20) if small_vmem else (96 << 20),
        m_target=256 if small_vmem else 512,
        mxu_align=128 if is_v5e else 256,
        # keep >= 2 grid steps on multi-TensorCore parts (v7x / megacore) so
        # dimension_semantics=("parallel",) can shard across cores; v5e/v6e
        # have a single TC so a 1-step grid costs nothing there.
        min_grid_steps=1 if (is_v5e or is_v6e) else 2,
        block_bytes_cap=(2 << 20) if small_vmem else (4 << 20),
    )


def _pick_bn(N, C, L, cfg):
    """Batch-packing factor: bn | N, bn*L near the MXU free-dim target."""
    if N == 1 or L >= cfg.m_target:
        return 1
    cands = []
    for d in range(1, N + 1):
        if N % d:
            continue
        if N >= cfg.min_grid_steps and (N // d) < cfg.min_grid_steps:
            continue
        if d * L > cfg.m_target:
            continue
        if d * C * L * 4 > cfg.block_bytes_cap:
            continue
        cands.append(d)
    if not cands:
        return 1
    aligned = [d for d in cands if (d * L) % 128 == 0]
    return max(aligned) if aligned else max(cands)


def _pick_m_tile(M, H, cfg):
    """Largest divisor of M within the GELU-intermediate VMEM budget."""
    if M <= 128:
        return M
    budget = max(cfg.vmem_limit // 3, 4 << 20)      # ~6 live (H, m_tile) f32 temps
    cap = max(128, budget // (6 * 4 * max(H, 1)))
    cap = min(cap, cfg.m_target)
    if M <= cap:
        return M
    cands = [d for d in range(1, M + 1) if M % d == 0 and d <= cap]
    aligned = [d for d in cands if d % cfg.mxu_align == 0]
    return max(aligned) if aligned else max(cands)


# ----------------------------------------------------------------------------
# Wrapper
# ----------------------------------------------------------------------------

def convnext_block(x_ncl, params, *, kernel_size=7, eps=1e-6):
    """ConvNeXt-1D Block forward on a channels-first (N, C, L) input."""
    N, C, L = x_ncl.shape
    slab, b1, w1, w2 = params
    H = w1.shape[0]
    assert slab.shape == (C, kernel_size + 5)
    assert b1.shape == (H, 1) and w1.shape == (H, C) and w2.shape == (C, H)

    cfg = _tpu_config()
    bn = _pick_bn(N, C, L, cfg)
    G = N // bn
    M = bn * L
    m_tile = _pick_m_tile(M, H, cfg)

    # Lane-dense packing: one-time HBM relayout (N,C,L) -> (G, C, bn*L) so the
    # kernel's last dimension is wide (full 128-lane DMAs / stores) and the MXU
    # free dimension is bn*L rather than L.
    if bn > 1:
        xg = x_ncl.reshape(G, bn, C, L).transpose(0, 2, 1, 3).reshape(G, C, M)
    else:
        xg = x_ncl

    kernel = functools.partial(convnext_block_kernel, kernel_size=kernel_size,
                               eps=eps, seg_len=L, m_tile=m_tile)

    def call(single_buffer_consts):
        def const_spec(shape):
            idx = lambda g, _n=len(shape): (0,) * _n
            if single_buffer_consts:
                # Grid-invariant inputs: single-buffer them (saves VMEM).
                return pl.BlockSpec(shape, idx, pipeline_mode=pl.Buffered(1))
            return pl.BlockSpec(shape, idx)

        return pl.pallas_call(
            kernel,
            out_shape=jax.ShapeDtypeStruct((G, C, M), x_ncl.dtype),
            grid=(G,),
            in_specs=[
                pl.BlockSpec((1, C, M), lambda g: (g, 0, 0)),   # x (packed, channels-first)
                const_spec((C, kernel_size + 5)),               # per-channel slab
                const_spec((H, 1)),                             # fc1 bias
                const_spec((H, C)),                             # fc1 weight (bf16)
                const_spec((C, H)),                             # fc2 weight (bf16)
            ],
            out_specs=pl.BlockSpec((1, C, M), lambda g: (g, 0, 0)),
            compiler_params=pltpu.CompilerParams(
                dimension_semantics=("parallel",),
                vmem_limit_bytes=cfg.vmem_limit,
            ),
        )(xg, slab, b1, w1, w2)

    try:
        out = call(single_buffer_consts=True)
    except Exception:
        # Fallback if this JAX build rejects pl.Buffered(1) on pallas_call specs.
        out = call(single_buffer_consts=False)

    if bn > 1:
        out = out.reshape(G, C, bn, L).transpose(0, 2, 1, 3).reshape(N, C, L)
    return out


# ----------------------------------------------------------------------------
# Params / reference / test
# ----------------------------------------------------------------------------

def init_params(key, dim, kernel_size=7, layer_scale_init_value=1e-6):
    """Returns (kernel_params, reference_params) in PyTorch-equivalent layouts."""
    C, K, H = dim, kernel_size, 4 * dim
    k = jax.random.split(key, 5)
    convw = jax.random.normal(k[0], (C, K), jnp.float32) * 0.2     # Conv1d (C,1,K) squeezed
    convb = jax.random.normal(k[1], (C,), jnp.float32) * 0.1
    lnw = jnp.ones((C,), jnp.float32)
    lnb = jnp.zeros((C,), jnp.float32)
    w1 = jax.random.normal(k[2], (H, C), jnp.float32) * (1.0 / np.sqrt(C))   # Linear (out, in)
    b1 = jax.random.normal(k[3], (H,), jnp.float32) * 0.1
    w2 = jax.random.normal(k[4], (C, H), jnp.float32) * (1.0 / np.sqrt(H))
    b2 = jnp.zeros((C,), jnp.float32)
    gamma = jnp.full((C,), layer_scale_init_value, jnp.float32)

    # Kernel-side packing: one (C, K+5) f32 slab for all per-channel vectors,
    # bf16 MXU weights (halves weight HBM/VMEM traffic).
    slab = jnp.concatenate([convw, convb[:, None], lnw[:, None], lnb[:, None],
                            b2[:, None], gamma[:, None]], axis=1)
    w1_bf16 = w1.astype(jnp.bfloat16)
    w2_bf16 = w2.astype(jnp.bfloat16)
    kparams = (slab, b1[:, None], w1_bf16, w2_bf16)
    # Reference uses the same (bf16-rounded) weight values in f32 so the
    # comparison isolates kernel error, not weight quantization.
    rparams = (convw, convb, lnw, lnb, w1_bf16.astype(jnp.float32), b1,
               w2_bf16.astype(jnp.float32), b2, gamma)
    return kparams, rparams


def reference(x_ncl, rparams, kernel_size=7, eps=1e-6):
    # Plain-JAX mirror of the PyTorch forward (channels-last math, f32).
    convw, convb, lnw, lnb, w1, b1, w2, b2, gamma = rparams
    N, C, L = x_ncl.shape
    x = jnp.transpose(x_ncl, (0, 2, 1))                     # (N, L, C)
    pad_l = (kernel_size - 1) // 2
    pad_r = kernel_size - 1 - pad_l
    xpad = jnp.pad(x, ((0, 0), (pad_l, pad_r), (0, 0)))
    h = sum(xpad[:, k:k + L, :] * convw[:, k][None, None, :]
            for k in range(kernel_size)) + convb
    mu = jnp.mean(h, -1, keepdims=True)
    var = jnp.mean((h - mu) ** 2, -1, keepdims=True)
    h = (h - mu) / jnp.sqrt(var + eps) * lnw + lnb
    h = jax.nn.gelu(h @ w1.T + b1, approximate=False) @ w2.T + b2
    out = h * gamma + x
    return jnp.transpose(out, (0, 2, 1))


if __name__ == "__main__":
    N, C, L, K = 2, 32, 16, 7
    key = jax.random.PRNGKey(0)
    kx, kp = jax.random.split(key)
    x = jax.random.normal(kx, (N, C, L), jnp.float32)
    # layer_scale_init_value chosen O(1) so the MLP branch actually contributes
    # to the checked output (the module default 1e-6 makes the block ~identity).
    kparams, rparams = init_params(kp, C, K, layer_scale_init_value=0.2)

    out = convnext_block(x, kparams, kernel_size=K)
    out = jax.block_until_ready(out)

    ref = reference(x, rparams, kernel_size=K)
    assert out.shape == x.shape
    np.testing.assert_allclose(np.asarray(out), np.asarray(ref), rtol=2e-2, atol=2e-2)
    print("KERNEL_OK")
</pallas_src>

<mosaic_0001>
module attributes {stable_mosaic.version = 11 : i64} {
  func.func @convnext_block_kernel(%arg0: i32, %arg1: memref<1x32x16xf32, #tpu.memory_space<vmem>>, %arg2: memref<32x12xf32, #tpu.memory_space<vmem>>, %arg3: memref<128x1xf32, #tpu.memory_space<vmem>>, %arg4: memref<128x32xbf16, #tpu.memory_space<vmem>>, %arg5: memref<32x128xbf16, #tpu.memory_space<vmem>>, %arg6: memref<1x32x16xf32, #tpu.memory_space<vmem>>) attributes {dimension_semantics = [#tpu.dimension_semantics<parallel>], iteration_bounds = array<i64: 2>, scalar_prefetch = 0 : i64, scratch_operands = 0 : i64, tpu.core_type = #tpu.core_type<tc>, window_params = [{transform_indices = @transform_0, window_bounds = array<i64: 1, 32, 16>}, {pipeline_mode = #tpu.pipeline_mode<synchronous>, transform_indices = @transform_1, window_bounds = array<i64: 32, 12>}, {pipeline_mode = #tpu.pipeline_mode<synchronous>, transform_indices = @transform_2, window_bounds = array<i64: 128, 1>}, {pipeline_mode = #tpu.pipeline_mode<synchronous>, transform_indices = @transform_3, window_bounds = array<i64: 128, 32>}, {pipeline_mode = #tpu.pipeline_mode<synchronous>, transform_indices = @transform_4, window_bounds = array<i64: 32, 128>}, {transform_indices = @transform_5, window_bounds = array<i64: 1, 32, 16>}]} {
    %c0 = arith.constant 0 : index
    %c0_0 = arith.constant 0 : index
    %0 = vector.load %arg2[%c0, %c0_0] : memref<32x12xf32, #tpu.memory_space<vmem>>, vector<32x12xf32>
    %1 = vector.extract_strided_slice %0 {offsets = [0, 0], sizes = [32, 7], strides = [1, 1]} : vector<32x12xf32> to vector<32x7xf32>
    %2 = vector.extract_strided_slice %0 {offsets = [0, 7], sizes = [32, 1], strides = [1, 1]} : vector<32x12xf32> to vector<32x1xf32>
    %3 = vector.extract_strided_slice %0 {offsets = [0, 8], sizes = [32, 1], strides = [1, 1]} : vector<32x12xf32> to vector<32x1xf32>
    %4 = vector.extract_strided_slice %0 {offsets = [0, 9], sizes = [32, 1], strides = [1, 1]} : vector<32x12xf32> to vector<32x1xf32>
    %5 = vector.extract_strided_slice %0 {offsets = [0, 10], sizes = [32, 1], strides = [1, 1]} : vector<32x12xf32> to vector<32x1xf32>
    %6 = vector.extract_strided_slice %0 {offsets = [0, 11], sizes = [32, 1], strides = [1, 1]} : vector<32x12xf32> to vector<32x1xf32>
    %c0_1 = arith.constant 0 : index
    %c0_2 = arith.constant 0 : index
    %c0_3 = arith.constant 0 : index
    %7 = vector.load %arg1[%c0_1, %c0_2, %c0_3] : memref<1x32x16xf32, #tpu.memory_space<vmem>>, vector<1x32x16xf32>
    %8 = vector.shape_cast %7 : vector<1x32x16xf32> to vector<32x16xf32>
    %9 = tpu.iota {dimensions = array<i32: 1>} : vector<1x16xi32>
    %cst = arith.constant 0.000000e+00 : f32
    %10 = vector.broadcast %cst : f32 to vector<32x16xf32>
    %c3_i32 = arith.constant 3 : i32
    %11 = tpu.dynamic_rotate %8 by %c3_i32 dim 1 : vector<32x16xf32>, i32 -> vector<32x16xf32>
    %12 = vector.extract_strided_slice %1 {offsets = [0, 0], sizes = [32, 1], strides = [1, 1]} : vector<32x7xf32> to vector<32x1xf32>
    %13 = vector.broadcast %12 : vector<32x1xf32> to vector<32x16xf32>
    %14 = arith.mulf %11, %13 : vector<32x16xf32>
    %c3_i32_4 = arith.constant 3 : i32
    %15 = vector.broadcast %c3_i32_4 : i32 to vector<1x16xi32>
    %16 = arith.cmpi sge, %9, %15 : vector<1x16xi32>
    %cst_5 = arith.constant 0.000000e+00 : f32
    %17 = vector.shape_cast %16 : vector<1x16xi1> to vector<1x16xi1>
    %18 = vector.broadcast %17 : vector<1x16xi1> to vector<32x16xi1>
    %19 = vector.broadcast %cst_5 : f32 to vector<32x16xf32>
    %20 = arith.select %18, %14, %19 : vector<32x16xi1>, vector<32x16xf32>
    %21 = arith.addf %10, %20 : vector<32x16xf32>
    %c2_i32 = arith.constant 2 : i32
    %22 = tpu.dynamic_rotate %8 by %c2_i32 dim 1 : vector<32x16xf32>, i32 -> vector<32x16xf32>
    %23 = vector.extract_strided_slice %1 {offsets = [0, 1], sizes = [32, 1], strides = [1, 1]} : vector<32x7xf32> to vector<32x1xf32>
    %24 = vector.broadcast %23 : vector<32x1xf32> to vector<32x16xf32>
    %25 = arith.mulf %22, %24 : vector<32x16xf32>
    %c2_i32_6 = arith.constant 2 : i32
    %26 = vector.broadcast %c2_i32_6 : i32 to vector<1x16xi32>
    %27 = arith.cmpi sge, %9, %26 : vector<1x16xi32>
    %cst_7 = arith.constant 0.000000e+00 : f32
    %28 = vector.shape_cast %27 : vector<1x16xi1> to vector<1x16xi1>
    %29 = vector.broadcast %28 : vector<1x16xi1> to vector<32x16xi1>
    %30 = vector.broadcast %cst_7 : f32 to vector<32x16xf32>
    %31 = arith.select %29, %25, %30 : vector<32x16xi1>, vector<32x16xf32>
    %32 = arith.addf %21, %31 : vector<32x16xf32>
    %c1_i32 = arith.constant 1 : i32
    %33 = tpu.dynamic_rotate %8 by %c1_i32 dim 1 : vector<32x16xf32>, i32 -> vector<32x16xf32>
    %34 = vector.extract_strided_slice %1 {offsets = [0, 2], sizes = [32, 1], strides = [1, 1]} : vector<32x7xf32> to vector<32x1xf32>
    %35 = vector.broadcast %34 : vector<32x1xf32> to vector<32x16xf32>
    %36 = arith.mulf %33, %35 : vector<32x16xf32>
    %c1_i32_8 = arith.constant 1 : i32
    %37 = vector.broadcast %c1_i32_8 : i32 to vector<1x16xi32>
    %38 = arith.cmpi sge, %9, %37 : vector<1x16xi32>
    %cst_9 = arith.constant 0.000000e+00 : f32
    %39 = vector.shape_cast %38 : vector<1x16xi1> to vector<1x16xi1>
    %40 = vector.broadcast %39 : vector<1x16xi1> to vector<32x16xi1>
    %41 = vector.broadcast %cst_9 : f32 to vector<32x16xf32>
    %42 = arith.select %40, %36, %41 : vector<32x16xi1>, vector<32x16xf32>
    %43 = arith.addf %32, %42 : vector<32x16xf32>
    %44 = vector.extract_strided_slice %1 {offsets = [0, 3], sizes = [32, 1], strides = [1, 1]} : vector<32x7xf32> to vector<32x1xf32>
    %45 = vector.broadcast %44 : vector<32x1xf32> to vector<32x16xf32>
    %46 = arith.mulf %8, %45 : vector<32x16xf32>
    %47 = arith.addf %43, %46 : vector<32x16xf32>
    %c15_i32 = arith.constant 15 : i32
    %48 = tpu.dynamic_rotate %8 by %c15_i32 dim 1 : vector<32x16xf32>, i32 -> vector<32x16xf32>
    %49 = vector.extract_strided_slice %1 {offsets = [0, 4], sizes = [32, 1], strides = [1, 1]} : vector<32x7xf32> to vector<32x1xf32>
    %50 = vector.broadcast %49 : vector<32x1xf32> to vector<32x16xf32>
    %51 = arith.mulf %48, %50 : vector<32x16xf32>
    %c15_i32_10 = arith.constant 15 : i32
    %52 = vector.broadcast %c15_i32_10 : i32 to vector<1x16xi32>
    %53 = arith.cmpi slt, %9, %52 : vector<1x16xi32>
    %cst_11 = arith.constant 0.000000e+00 : f32
    %54 = vector.shape_cast %53 : vector<1x16xi1> to vector<1x16xi1>
    %55 = vector.broadcast %54 : vector<1x16xi1> to vector<32x16xi1>
    %56 = vector.broadcast %cst_11 : f32 to vector<32x16xf32>
    %57 = arith.select %55, %51, %56 : vector<32x16xi1>, vector<32x16xf32>
    %58 = arith.addf %47, %57 : vector<32x16xf32>
    %c14_i32 = arith.constant 14 : i32
    %59 = tpu.dynamic_rotate %8 by %c14_i32 dim 1 : vector<32x16xf32>, i32 -> vector<32x16xf32>
    %60 = vector.extract_strided_slice %1 {offsets = [0, 5], sizes = [32, 1], strides = [1, 1]} : vector<32x7xf32> to vector<32x1xf32>
    %61 = vector.broadcast %60 : vector<32x1xf32> to vector<32x16xf32>
    %62 = arith.mulf %59, %61 : vector<32x16xf32>
    %c14_i32_12 = arith.constant 14 : i32
    %63 = vector.broadcast %c14_i32_12 : i32 to vector<1x16xi32>
    %64 = arith.cmpi slt, %9, %63 : vector<1x16xi32>
    %cst_13 = arith.constant 0.000000e+00 : f32
    %65 = vector.shape_cast %64 : vector<1x16xi1> to vector<1x16xi1>
    %66 = vector.broadcast %65 : vector<1x16xi1> to vector<32x16xi1>
    %67 = vector.broadcast %cst_13 : f32 to vector<32x16xf32>
    %68 = arith.select %66, %62, %67 : vector<32x16xi1>, vector<32x16xf32>
    %69 = arith.addf %58, %68 : vector<32x16xf32>
    %c13_i32 = arith.constant 13 : i32
    %70 = tpu.dynamic_rotate %8 by %c13_i32 dim 1 : vector<32x16xf32>, i32 -> vector<32x16xf32>
    %71 = vector.extract_strided_slice %1 {offsets = [0, 6], sizes = [32, 1], strides = [1, 1]} : vector<32x7xf32> to vector<32x1xf32>
    %72 = vector.broadcast %71 : vector<32x1xf32> to vector<32x16xf32>
    %73 = arith.mulf %70, %72 : vector<32x16xf32>
    %c13_i32_14 = arith.constant 13 : i32
    %74 = vector.broadcast %c13_i32_14 : i32 to vector<1x16xi32>
    %75 = arith.cmpi slt, %9, %74 : vector<1x16xi32>
    %cst_15 = arith.constant 0.000000e+00 : f32
    %76 = vector.shape_cast %75 : vector<1x16xi1> to vector<1x16xi1>
    %77 = vector.broadcast %76 : vector<1x16xi1> to vector<32x16xi1>
    %78 = vector.broadcast %cst_15 : f32 to vector<32x16xf32>
    %79 = arith.select %77, %73, %78 : vector<32x16xi1>, vector<32x16xf32>
    %80 = arith.addf %69, %79 : vector<32x16xf32>
    %81 = vector.broadcast %2 : vector<32x1xf32> to vector<32x16xf32>
    %82 = arith.addf %80, %81 : vector<32x16xf32>
    %cst_16 = arith.constant dense<0.000000e+00> : vector<16xf32>
    %83 = vector.multi_reduction <add>, %82, %cst_16 [0] : vector<32x16xf32> to vector<16xf32>
    %84 = vector.shape_cast %83 : vector<16xf32> to vector<1x16xf32>
    %cst_17 = arith.constant 3.200000e+01 : f32
    %85 = vector.broadcast %cst_17 : f32 to vector<1x16xf32>
    %86 = arith.divf %84, %85 : vector<1x16xf32>
    %87 = vector.broadcast %86 : vector<1x16xf32> to vector<32x16xf32>
    %88 = arith.subf %82, %87 : vector<32x16xf32>
    %89 = arith.mulf %88, %88 : vector<32x16xf32>
    %cst_18 = arith.constant dense<0.000000e+00> : vector<16xf32>
    %90 = vector.multi_reduction <add>, %89, %cst_18 [0] : vector<32x16xf32> to vector<16xf32>
    %91 = vector.shape_cast %90 : vector<16xf32> to vector<1x16xf32>
    %cst_19 = arith.constant 3.200000e+01 : f32
    %92 = vector.broadcast %cst_19 : f32 to vector<1x16xf32>
    %93 = arith.divf %91, %92 : vector<1x16xf32>
    %cst_20 = arith.constant 9.99999997E-7 : f32
    %94 = vector.broadcast %cst_20 : f32 to vector<1x16xf32>
    %95 = arith.addf %93, %94 : vector<1x16xf32>
    %96 = math.rsqrt %95 : vector<1x16xf32>
    %97 = vector.broadcast %96 : vector<1x16xf32> to vector<32x16xf32>
    %98 = arith.mulf %88, %97 : vector<32x16xf32>
    %99 = vector.broadcast %3 : vector<32x1xf32> to vector<32x16xf32>
    %100 = arith.mulf %98, %99 : vector<32x16xf32>
    %101 = vector.broadcast %4 : vector<32x1xf32> to vector<32x16xf32>
    %102 = arith.addf %100, %101 : vector<32x16xf32>
    %c0_21 = arith.constant 0 : index
    %c0_22 = arith.constant 0 : index
    %103 = vector.load %arg4[%c0_21, %c0_22] : memref<128x32xbf16, #tpu.memory_space<vmem>>, vector<128x32xbf16>
    %c0_23 = arith.constant 0 : index
    %c0_24 = arith.constant 0 : index
    %104 = vector.load %arg5[%c0_23, %c0_24] : memref<32x128xbf16, #tpu.memory_space<vmem>>, vector<32x128xbf16>
    %c0_25 = arith.constant 0 : index
    %c0_26 = arith.constant 0 : index
    %105 = vector.load %arg3[%c0_25, %c0_26] : memref<128x1xf32, #tpu.memory_space<vmem>>, vector<128x1xf32>
    %106 = vector.shape_cast %105 : vector<128x1xf32> to vector<128x1xf32>
    %107 = vector.broadcast %106 : vector<128x1xf32> to vector<128x16xf32>
    %108 = vector.shape_cast %6 : vector<32x1xf32> to vector<32x1xf32>
    %109 = vector.broadcast %108 : vector<32x1xf32> to vector<32x16xf32>
    %110 = arith.mulf %5, %6 : vector<32x1xf32>
    %111 = vector.shape_cast %110 : vector<32x1xf32> to vector<32x1xf32>
    %112 = vector.broadcast %111 : vector<32x1xf32> to vector<32x16xf32>
    %113 = arith.truncf %102 : vector<32x16xf32> to vector<32x16xbf16>
    %cst_27 = arith.constant dense<0.000000e+00> : vector<128x16xf32>
    %114 = tpu.matmul %103, %113, %cst_27 {dimension_numbers = #tpu.dot_dimension_numbers<[1], [0], [0], [1], [0, 0, 1, 1], [], []>} : vector<128x32xbf16>, vector<32x16xbf16>, vector<128x16xf32> -> vector<128x16xf32>
    %115 = arith.addf %114, %107 : vector<128x16xf32>
    %cst_28 = arith.constant 5.000000e-01 : f32
    %116 = vector.broadcast %cst_28 : f32 to vector<128x16xf32>
    %117 = arith.mulf %116, %115 : vector<128x16xf32>
    %cst_29 = arith.constant 0.707106769 : f32
    %118 = vector.broadcast %cst_29 : f32 to vector<128x16xf32>
    %119 = arith.mulf %115, %118 : vector<128x16xf32>
    %120 = math.absf %119 : vector<128x16xf32>
    %cst_30 = arith.constant 0.327591091 : f32
    %121 = vector.broadcast %cst_30 : f32 to vector<128x16xf32>
    %122 = arith.mulf %121, %120 : vector<128x16xf32>
    %cst_31 = arith.constant 1.000000e+00 : f32
    %123 = vector.broadcast %cst_31 : f32 to vector<128x16xf32>
    %124 = arith.addf %123, %122 : vector<128x16xf32>
    %125 = tpu.reciprocal %124 {approx = true} : vector<128x16xf32> -> vector<128x16xf32>
    %cst_32 = arith.constant 1.06140542 : f32
    %126 = vector.broadcast %cst_32 : f32 to vector<128x16xf32>
    %127 = arith.mulf %126, %125 : vector<128x16xf32>
    %cst_33 = arith.constant -1.45315206 : f32
    %128 = vector.broadcast %cst_33 : f32 to vector<128x16xf32>
    %129 = arith.addf %127, %128 : vector<128x16xf32>
    %130 = arith.mulf %129, %125 : vector<128x16xf32>
    %cst_34 = arith.constant 1.42141378 : f32
    %131 = vector.broadcast %cst_34 : f32 to vector<128x16xf32>
    %132 = arith.addf %130, %131 : vector<128x16xf32>
    %133 = arith.mulf %132, %125 : vector<128x16xf32>
    %cst_35 = arith.constant -0.284496725 : f32
    %134 = vector.broadcast %cst_35 : f32 to vector<128x16xf32>
    %135 = arith.addf %133, %134 : vector<128x16xf32>
    %136 = arith.mulf %135, %125 : vector<128x16xf32>
    %cst_36 = arith.constant 0.254829586 : f32
    %137 = vector.broadcast %cst_36 : f32 to vector<128x16xf32>
    %138 = arith.addf %136, %137 : vector<128x16xf32>
    %139 = arith.mulf %138, %125 : vector<128x16xf32>
    %cst_37 = arith.constant 0.000000e+00 : f32
    %140 = vector.broadcast %cst_37 : f32 to vector<128x16xf32>
    %141 = arith.subf %140, %120 : vector<128x16xf32>
    %142 = arith.mulf %141, %120 : vector<128x16xf32>
    %143 = math.exp %142 : vector<128x16xf32>
    %144 = arith.mulf %139, %143 : vector<128x16xf32>
    %cst_38 = arith.constant 1.000000e+00 : f32
    %145 = vector.broadcast %cst_38 : f32 to vector<128x16xf32>
    %146 = arith.subf %145, %144 : vector<128x16xf32>
    %cst_39 = arith.constant 0.000000e+00 : f32
    %147 = vector.broadcast %cst_39 : f32 to vector<128x16xf32>
    %148 = arith.cmpf oge, %119, %147 : vector<128x16xf32>
    %cst_40 = arith.constant 0.000000e+00 : f32
    %149 = vector.broadcast %cst_40 : f32 to vector<128x16xf32>
    %150 = arith.subf %149, %146 : vector<128x16xf32>
    %151 = arith.select %148, %146, %150 : vector<128x16xi1>, vector<128x16xf32>
    %cst_41 = arith.constant 1.000000e+00 : f32
    %152 = vector.broadcast %cst_41 : f32 to vector<128x16xf32>
    %153 = arith.addf %152, %151 : vector<128x16xf32>
    %154 = arith.mulf %117, %153 : vector<128x16xf32>
    %155 = arith.truncf %154 : vector<128x16xf32> to vector<128x16xbf16>
    %cst_42 = arith.constant dense<0.000000e+00> : vector<32x16xf32>
    %156 = tpu.matmul %104, %155, %cst_42 {dimension_numbers = #tpu.dot_dimension_numbers<[1], [0], [0], [1], [0, 0, 1, 1], [], []>} : vector<32x128xbf16>, vector<128x16xbf16>, vector<32x16xf32> -> vector<32x16xf32>
    %c0_43 = arith.constant 0 : index
    %c0_44 = arith.constant 0 : index
    %c0_45 = arith.constant 0 : index
    %157 = vector.load %arg1[%c0_43, %c0_44, %c0_45] : memref<1x32x16xf32, #tpu.memory_space<vmem>>, vector<1x32x16xf32>
    %158 = vector.shape_cast %157 : vector<1x32x16xf32> to vector<32x16xf32>
    %159 = arith.mulf %156, %109 : vector<32x16xf32>
    %160 = arith.addf %159, %112 : vector<32x16xf32>
    %161 = arith.addf %160, %158 : vector<32x16xf32>
    %c0_46 = arith.constant 0 : index
    %c0_47 = arith.constant 0 : index
    %c0_48 = arith.constant 0 : index
    %162 = vector.load %arg6[%c0_46, %c0_47, %c0_48] : memref<1x32x16xf32, #tpu.memory_space<vmem>>, vector<1x32x16xf32>
    %163 = vector.shape_cast %162 : vector<1x32x16xf32> to vector<32x16xf32>
    %164 = vector.shape_cast %161 : vector<32x16xf32> to vector<1x32x16xf32>
    tpu.vector_store %arg6[%c0_46, %c0_47, %c0_48], %164 {strides = array<i32>} : memref<1x32x16xf32, #tpu.memory_space<vmem>>, vector<1x32x16xf32>,
    return
  }
  func.func @transform_0(%arg0: i32) -> (i32, i32, i32) {
    %c0_i32 = arith.constant 0 : i32
    %c0_i32_0 = arith.constant 0 : i32
    %c0_i32_1 = arith.constant 0 : i32
    return %arg0, %c0_i32, %c0_i32_0 : i32, i32, i32
  }
  func.func @transform_1(%arg0: i32) -> (i32, i32) {
    %c0_i32 = arith.constant 0 : i32
    %c0_i32_0 = arith.constant 0 : i32
    %c0_i32_1 = arith.constant 0 : i32
    return %c0_i32, %c0_i32_0 : i32, i32
  }
  func.func @transform_2(%arg0: i32) -> (i32, i32) {
    %c0_i32 = arith.constant 0 : i32
    %c0_i32_0 = arith.constant 0 : i32
    %c0_i32_1 = arith.constant 0 : i32
    return %c0_i32, %c0_i32_0 : i32, i32
  }
  func.func @transform_3(%arg0: i32) -> (i32, i32) {
    %c0_i32 = arith.constant 0 : i32
    %c0_i32_0 = arith.constant 0 : i32
    %c0_i32_1 = arith.constant 0 : i32
    return %c0_i32, %c0_i32_0 : i32, i32
  }
  func.func @transform_4(%arg0: i32) -> (i32, i32) {
    %c0_i32 = arith.constant 0 : i32
    %c0_i32_0 = arith.constant 0 : i32
    %c0_i32_1 = arith.constant 0 : i32
    return %c0_i32, %c0_i32_0 : i32, i32
  }
  func.func @transform_5(%arg0: i32) -> (i32, i32, i32) {
    %c0_i32 = arith.constant 0 : i32
    %c0_i32_0 = arith.constant 0 : i32
    %c0_i32_1 = arith.constant 0 : i32
    return %arg0, %c0_i32, %c0_i32_0 : i32, i32, i32
  }
}

module attributes {stable_mosaic.version = 11 : i64} {
  func.func @convnext_block_kernel(%arg0: i32, %arg1: memref<1x32x16xf32, #tpu.memory_space<vmem>>, %arg2: memref<32x12xf32, #tpu.memory_space<vmem>>, %arg3: memref<128x1xf32, #tpu.memory_space<vmem>>, %arg4: memref<128x32xbf16, #tpu.memory_space<vmem>>, %arg5: memref<32x128xbf16, #tpu.memory_space<vmem>>, %arg6: memref<1x32x16xf32, #tpu.memory_space<vmem>>) attributes {dimension_semantics = [#tpu.dimension_semantics<parallel>], iteration_bounds = array<i64: 2>, scalar_prefetch = 0 : i64, scratch_operands = 0 : i64, tpu.core_type = #tpu.core_type<tc>, window_params = [{transform_indices = @transform_0, window_bounds = array<i64: 1, 32, 16>}, {pipeline_mode = #tpu.pipeline_mode<synchronous>, transform_indices = @transform_1, window_bounds = array<i64: 32, 12>}, {pipeline_mode = #tpu.pipeline_mode<synchronous>, transform_indices = @transform_2, window_bounds = array<i64: 128, 1>}, {pipeline_mode = #tpu.pipeline_mode<synchronous>, transform_indices = @transform_3, window_bounds = array<i64: 128, 32>}, {pipeline_mode = #tpu.pipeline_mode<synchronous>, transform_indices = @transform_4, window_bounds = array<i64: 32, 128>}, {transform_indices = @transform_5, window_bounds = array<i64: 1, 32, 16>}]} {
    %c0 = arith.constant 0 : index
    %c0_0 = arith.constant 0 : index
    %0 = vector.load %arg2[%c0, %c0_0] : memref<32x12xf32, #tpu.memory_space<vmem>>, vector<32x12xf32>
    %1 = vector.extract_strided_slice %0 {offsets = [0, 0], sizes = [32, 7], strides = [1, 1]} : vector<32x12xf32> to vector<32x7xf32>
    %2 = vector.extract_strided_slice %0 {offsets = [0, 7], sizes = [32, 1], strides = [1, 1]} : vector<32x12xf32> to vector<32x1xf32>
    %3 = vector.extract_strided_slice %0 {offsets = [0, 8], sizes = [32, 1], strides = [1, 1]} : vector<32x12xf32> to vector<32x1xf32>
    %4 = vector.extract_strided_slice %0 {offsets = [0, 9], sizes = [32, 1], strides = [1, 1]} : vector<32x12xf32> to vector<32x1xf32>
    %5 = vector.extract_strided_slice %0 {offsets = [0, 10], sizes = [32, 1], strides = [1, 1]} : vector<32x12xf32> to vector<32x1xf32>
    %6 = vector.extract_strided_slice %0 {offsets = [0, 11], sizes = [32, 1], strides = [1, 1]} : vector<32x12xf32> to vector<32x1xf32>
    %c0_1 = arith.constant 0 : index
    %c0_2 = arith.constant 0 : index
    %c0_3 = arith.constant 0 : index
    %7 = vector.load %arg1[%c0_1, %c0_2, %c0_3] : memref<1x32x16xf32, #tpu.memory_space<vmem>>, vector<1x32x16xf32>
    %8 = vector.shape_cast %7 : vector<1x32x16xf32> to vector<32x16xf32>
    %9 = tpu.iota {dimensions = array<i32: 1>} : vector<1x16xi32>
    %cst = arith.constant 0.000000e+00 : f32
    %10 = vector.broadcast %cst : f32 to vector<32x16xf32>
    %c3_i32 = arith.constant 3 : i32
    %11 = tpu.dynamic_rotate %8 by %c3_i32 dim 1 : vector<32x16xf32>, i32 -> vector<32x16xf32>
    %12 = vector.extract_strided_slice %1 {offsets = [0, 0], sizes = [32, 1], strides = [1, 1]} : vector<32x7xf32> to vector<32x1xf32>
    %13 = vector.broadcast %12 : vector<32x1xf32> to vector<32x16xf32>
    %14 = arith.mulf %11, %13 : vector<32x16xf32>
    %c3_i32_4 = arith.constant 3 : i32
    %15 = vector.broadcast %c3_i32_4 : i32 to vector<1x16xi32>
    %16 = arith.cmpi sge, %9, %15 : vector<1x16xi32>
    %cst_5 = arith.constant 0.000000e+00 : f32
    %17 = vector.shape_cast %16 : vector<1x16xi1> to vector<1x16xi1>
    %18 = vector.broadcast %17 : vector<1x16xi1> to vector<32x16xi1>
    %19 = vector.broadcast %cst_5 : f32 to vector<32x16xf32>
    %20 = arith.select %18, %14, %19 : vector<32x16xi1>, vector<32x16xf32>
    %21 = arith.addf %10, %20 : vector<32x16xf32>
    %c2_i32 = arith.constant 2 : i32
    %22 = tpu.dynamic_rotate %8 by %c2_i32 dim 1 : vector<32x16xf32>, i32 -> vector<32x16xf32>
    %23 = vector.extract_strided_slice %1 {offsets = [0, 1], sizes = [32, 1], strides = [1, 1]} : vector<32x7xf32> to vector<32x1xf32>
    %24 = vector.broadcast %23 : vector<32x1xf32> to vector<32x16xf32>
    %25 = arith.mulf %22, %24 : vector<32x16xf32>
    %c2_i32_6 = arith.constant 2 : i32
    %26 = vector.broadcast %c2_i32_6 : i32 to vector<1x16xi32>
    %27 = arith.cmpi sge, %9, %26 : vector<1x16xi32>
    %cst_7 = arith.constant 0.000000e+00 : f32
    %28 = vector.shape_cast %27 : vector<1x16xi1> to vector<1x16xi1>
    %29 = vector.broadcast %28 : vector<1x16xi1> to vector<32x16xi1>
    %30 = vector.broadcast %cst_7 : f32 to vector<32x16xf32>
    %31 = arith.select %29, %25, %30 : vector<32x16xi1>, vector<32x16xf32>
    %32 = arith.addf %21, %31 : vector<32x16xf32>
    %c1_i32 = arith.constant 1 : i32
    %33 = tpu.dynamic_rotate %8 by %c1_i32 dim 1 : vector<32x16xf32>, i32 -> vector<32x16xf32>
    %34 = vector.extract_strided_slice %1 {offsets = [0, 2], sizes = [32, 1], strides = [1, 1]} : vector<32x7xf32> to vector<32x1xf32>
    %35 = vector.broadcast %34 : vector<32x1xf32> to vector<32x16xf32>
    %36 = arith.mulf %33, %35 : vector<32x16xf32>
    %c1_i32_8 = arith.constant 1 : i32
    %37 = vector.broadcast %c1_i32_8 : i32 to vector<1x16xi32>
    %38 = arith.cmpi sge, %9, %37 : vector<1x16xi32>
    %cst_9 = arith.constant 0.000000e+00 : f32
    %39 = vector.shape_cast %38 : vector<1x16xi1> to vector<1x16xi1>
    %40 = vector.broadcast %39 : vector<1x16xi1> to vector<32x16xi1>
    %41 = vector.broadcast %cst_9 : f32 to vector<32x16xf32>
    %42 = arith.select %40, %36, %41 : vector<32x16xi1>, vector<32x16xf32>
    %43 = arith.addf %32, %42 : vector<32x16xf32>
    %44 = vector.extract_strided_slice %1 {offsets = [0, 3], sizes = [32, 1], strides = [1, 1]} : vector<32x7xf32> to vector<32x1xf32>
    %45 = vector.broadcast %44 : vector<32x1xf32> to vector<32x16xf32>
    %46 = arith.mulf %8, %45 : vector<32x16xf32>
    %47 = arith.addf %43, %46 : vector<32x16xf32>
    %c15_i32 = arith.constant 15 : i32
    %48 = tpu.dynamic_rotate %8 by %c15_i32 dim 1 : vector<32x16xf32>, i32 -> vector<32x16xf32>
    %49 = vector.extract_strided_slice %1 {offsets = [0, 4], sizes = [32, 1], strides = [1, 1]} : vector<32x7xf32> to vector<32x1xf32>
    %50 = vector.broadcast %49 : vector<32x1xf32> to vector<32x16xf32>
    %51 = arith.mulf %48, %50 : vector<32x16xf32>
    %c15_i32_10 = arith.constant 15 : i32
    %52 = vector.broadcast %c15_i32_10 : i32 to vector<1x16xi32>
    %53 = arith.cmpi slt, %9, %52 : vector<1x16xi32>
    %cst_11 = arith.constant 0.000000e+00 : f32
    %54 = vector.shape_cast %53 : vector<1x16xi1> to vector<1x16xi1>
    %55 = vector.broadcast %54 : vector<1x16xi1> to vector<32x16xi1>
    %56 = vector.broadcast %cst_11 : f32 to vector<32x16xf32>
    %57 = arith.select %55, %51, %56 : vector<32x16xi1>, vector<32x16xf32>
    %58 = arith.addf %47, %57 : vector<32x16xf32>
    %c14_i32 = arith.constant 14 : i32
    %59 = tpu.dynamic_rotate %8 by %c14_i32 dim 1 : vector<32x16xf32>, i32 -> vector<32x16xf32>
    %60 = vector.extract_strided_slice %1 {offsets = [0, 5], sizes = [32, 1], strides = [1, 1]} : vector<32x7xf32> to vector<32x1xf32>
    %61 = vector.broadcast %60 : vector<32x1xf32> to vector<32x16xf32>
    %62 = arith.mulf %59, %61 : vector<32x16xf32>
    %c14_i32_12 = arith.constant 14 : i32
    %63 = vector.broadcast %c14_i32_12 : i32 to vector<1x16xi32>
    %64 = arith.cmpi slt, %9, %63 : vector<1x16xi32>
    %cst_13 = arith.constant 0.000000e+00 : f32
    %65 = vector.shape_cast %64 : vector<1x16xi1> to vector<1x16xi1>
    %66 = vector.broadcast %65 : vector<1x16xi1> to vector<32x16xi1>
    %67 = vector.broadcast %cst_13 : f32 to vector<32x16xf32>
    %68 = arith.select %66, %62, %67 : vector<32x16xi1>, vector<32x16xf32>
    %69 = arith.addf %58, %68 : vector<32x16xf32>
    %c13_i32 = arith.constant 13 : i32
    %70 = tpu.dynamic_rotate %8 by %c13_i32 dim 1 : vector<32x16xf32>, i32 -> vector<32x16xf32>
    %71 = vector.extract_strided_slice %1 {offsets = [0, 6], sizes = [32, 1], strides = [1, 1]} : vector<32x7xf32> to vector<32x1xf32>
    %72 = vector.broadcast %71 : vector<32x1xf32> to vector<32x16xf32>
    %73 = arith.mulf %70, %72 : vector<32x16xf32>
    %c13_i32_14 = arith.constant 13 : i32
    %74 = vector.broadcast %c13_i32_14 : i32 to vector<1x16xi32>
    %75 = arith.cmpi slt, %9, %74 : vector<1x16xi32>
    %cst_15 = arith.constant 0.000000e+00 : f32
    %76 = vector.shape_cast %75 : vector<1x16xi1> to vector<1x16xi1>
    %77 = vector.broadcast %76 : vector<1x16xi1> to vector<32x16xi1>
    %78 = vector.broadcast %cst_15 : f32 to vector<32x16xf32>
    %79 = arith.select %77, %73, %78 : vector<32x16xi1>, vector<32x16xf32>
    %80 = arith.addf %69, %79 : vector<32x16xf32>
    %81 = vector.broadcast %2 : vector<32x1xf32> to vector<32x16xf32>
    %82 = arith.addf %80, %81 : vector<32x16xf32>
    %cst_16 = arith.constant dense<0.000000e+00> : vector<16xf32>
    %83 = vector.multi_reduction <add>, %82, %cst_16 [0] : vector<32x16xf32> to vector<16xf32>
    %84 = vector.shape_cast %83 : vector<16xf32> to vector<1x16xf32>
    %cst_17 = arith.constant 3.200000e+01 : f32
    %85 = vector.broadcast %cst_17 : f32 to vector<1x16xf32>
    %86 = arith.divf %84, %85 : vector<1x16xf32>
    %87 = vector.broadcast %86 : vector<1x16xf32> to vector<32x16xf32>
    %88 = arith.subf %82, %87 : vector<32x16xf32>
    %89 = arith.mulf %88, %88 : vector<32x16xf32>
    %cst_18 = arith.constant dense<0.000000e+00> : vector<16xf32>
    %90 = vector.multi_reduction <add>, %89, %cst_18 [0] : vector<32x16xf32> to vector<16xf32>
    %91 = vector.shape_cast %90 : vector<16xf32> to vector<1x16xf32>
    %cst_19 = arith.constant 3.200000e+01 : f32
    %92 = vector.broadcast %cst_19 : f32 to vector<1x16xf32>
    %93 = arith.divf %91, %92 : vector<1x16xf32>
    %cst_20 = arith.constant 9.99999997E-7 : f32
    %94 = vector.broadcast %cst_20 : f32 to vector<1x16xf32>
    %95 = arith.addf %93, %94 : vector<1x16xf32>
    %96 = math.rsqrt %95 : vector<1x16xf32>
    %97 = vector.broadcast %96 : vector<1x16xf32> to vector<32x16xf32>
    %98 = arith.mulf %88, %97 : vector<32x16xf32>
    %99 = vector.broadcast %3 : vector<32x1xf32> to vector<32x16xf32>
    %100 = arith.mulf %98, %99 : vector<32x16xf32>
    %101 = vector.broadcast %4 : vector<32x1xf32> to vector<32x16xf32>
    %102 = arith.addf %100, %101 : vector<32x16xf32>
    %c0_21 = arith.constant 0 : index
    %c0_22 = arith.constant 0 : index
    %103 = vector.load %arg4[%c0_21, %c0_22] : memref<128x32xbf16, #tpu.memory_space<vmem>>, vector<128x32xbf16>
    %c0_23 = arith.constant 0 : index
    %c0_24 = arith.constant 0 : index
    %104 = vector.load %arg5[%c0_23, %c0_24] : memref<32x128xbf16, #tpu.memory_space<vmem>>, vector<32x128xbf16>
    %c0_25 = arith.constant 0 : index
    %c0_26 = arith.constant 0 : index
    %105 = vector.load %arg3[%c0_25, %c0_26] : memref<128x1xf32, #tpu.memory_space<vmem>>, vector<128x1xf32>
    %106 = vector.shape_cast %105 : vector<128x1xf32> to vector<128x1xf32>
    %107 = vector.broadcast %106 : vector<128x1xf32> to vector<128x16xf32>
    %108 = vector.shape_cast %6 : vector<32x1xf32> to vector<32x1xf32>
    %109 = vector.broadcast %108 : vector<32x1xf32> to vector<32x16xf32>
    %110 = arith.mulf %5, %6 : vector<32x1xf32>
    %111 = vector.shape_cast %110 : vector<32x1xf32> to vector<32x1xf32>
    %112 = vector.broadcast %111 : vector<32x1xf32> to vector<32x16xf32>
    %113 = arith.truncf %102 : vector<32x16xf32> to vector<32x16xbf16>
    %cst_27 = arith.constant dense<0.000000e+00> : vector<128x16xf32>
    %114 = tpu.matmul %103, %113, %cst_27 {dimension_numbers = #tpu.dot_dimension_numbers<[1], [0], [0], [1], [0, 0, 1, 1], [], []>} : vector<128x32xbf16>, vector<32x16xbf16>, vector<128x16xf32> -> vector<128x16xf32>
    %115 = arith.addf %114, %107 : vector<128x16xf32>
    %cst_28 = arith.constant 5.000000e-01 : f32
    %116 = vector.broadcast %cst_28 : f32 to vector<128x16xf32>
    %117 = arith.mulf %116, %115 : vector<128x16xf32>
    %cst_29 = arith.constant 0.707106769 : f32
    %118 = vector.broadcast %cst_29 : f32 to vector<128x16xf32>
    %119 = arith.mulf %115, %118 : vector<128x16xf32>
    %120 = math.absf %119 : vector<128x16xf32>
    %cst_30 = arith.constant 0.327591091 : f32
    %121 = vector.broadcast %cst_30 : f32 to vector<128x16xf32>
    %122 = arith.mulf %121, %120 : vector<128x16xf32>
    %cst_31 = arith.constant 1.000000e+00 : f32
    %123 = vector.broadcast %cst_31 : f32 to vector<128x16xf32>
    %124 = arith.addf %123, %122 : vector<128x16xf32>
    %125 = tpu.reciprocal %124 {approx = true} : vector<128x16xf32> -> vector<128x16xf32>
    %cst_32 = arith.constant 1.06140542 : f32
    %126 = vector.broadcast %cst_32 : f32 to vector<128x16xf32>
    %127 = arith.mulf %126, %125 : vector<128x16xf32>
    %cst_33 = arith.constant -1.45315206 : f32
    %128 = vector.broadcast %cst_33 : f32 to vector<128x16xf32>
    %129 = arith.addf %127, %128 : vector<128x16xf32>
    %130 = arith.mulf %129, %125 : vector<128x16xf32>
    %cst_34 = arith.constant 1.42141378 : f32
    %131 = vector.broadcast %cst_34 : f32 to vector<128x16xf32>
    %132 = arith.addf %130, %131 : vector<128x16xf32>
    %133 = arith.mulf %132, %125 : vector<128x16xf32>
    %cst_35 = arith.constant -0.284496725 : f32
    %134 = vector.broadcast %cst_35 : f32 to vector<128x16xf32>
    %135 = arith.addf %133, %134 : vector<128x16xf32>
    %136 = arith.mulf %135, %125 : vector<128x16xf32>
    %cst_36 = arith.constant 0.254829586 : f32
    %137 = vector.broadcast %cst_36 : f32 to vector<128x16xf32>
    %138 = arith.addf %136, %137 : vector<128x16xf32>
    %139 = arith.mulf %138, %125 : vector<128x16xf32>
    %cst_37 = arith.constant 0.000000e+00 : f32
    %140 = vector.broadcast %cst_37 : f32 to vector<128x16xf32>
    %141 = arith.subf %140, %120 : vector<128x16xf32>
    %142 = arith.mulf %141, %120 : vector<128x16xf32>
    %143 = math.exp %142 : vector<128x16xf32>
    %144 = arith.mulf %139, %143 : vector<128x16xf32>
    %cst_38 = arith.constant 1.000000e+00 : f32
    %145 = vector.broadcast %cst_38 : f32 to vector<128x16xf32>
    %146 = arith.subf %145, %144 : vector<128x16xf32>
    %cst_39 = arith.constant 0.000000e+00 : f32
    %147 = vector.broadcast %cst_39 : f32 to vector<128x16xf32>
    %148 = arith.cmpf oge, %119, %147 : vector<128x16xf32>
    %cst_40 = arith.constant 0.000000e+00 : f32
    %149 = vector.broadcast %cst_40 : f32 to vector<128x16xf32>
    %150 = arith.subf %149, %146 : vector<128x16xf32>
    %151 = arith.select %148, %146, %150 : vector<128x16xi1>, vector<128x16xf32>
    %cst_41 = arith.constant 1.000000e+00 : f32
    %152 = vector.broadcast %cst_41 : f32 to vector<128x16xf32>
    %153 = arith.addf %152, %151 : vector<128x16xf32>
    %154 = arith.mulf %117, %153 : vector<128x16xf32>
    %155 = arith.truncf %154 : vector<128x16xf32> to vector<128x16xbf16>
    %cst_42 = arith.constant dense<0.000000e+00> : vector<32x16xf32>
    %156 = tpu.matmul %104, %155, %cst_42 {dimension_numbers = #tpu.dot_dimension_numbers<[1], [0], [0], [1], [0, 0, 1, 1], [], []>} : vector<32x128xbf16>, vector<128x16xbf16>, vector<32x16xf32> -> vector<32x16xf32>
    %c0_43 = arith.constant 0 : index
    %c0_44 = arith.constant 0 : index
    %c0_45 = arith.constant 0 : index
    %157 = vector.load %arg1[%c0_43, %c0_44, %c0_45] : memref<1x32x16xf32, #tpu.memory_space<vmem>>, vector<1x32x16xf32>
    %158 = vector.shape_cast %157 : vector<1x32x16xf32> to vector<32x16xf32>
    %159 = arith.mulf %156, %109 : vector<32x16xf32>
    %160 = arith.addf %159, %112 : vector<32x16xf32>
    %161 = arith.addf %160, %158 : vector<32x16xf32>
    %c0_46 = arith.constant 0 : index
    %c0_47 = arith.constant 0 : index
    %c0_48 = arith.constant 0 : index
    %162 = vector.load %arg6[%c0_46, %c0_47, %c0_48] : memref<1x32x16xf32, #tpu.memory_space<vmem>>, vector<1x32x16xf32>
    %163 = vector.shape_cast %162 : vector<1x32x16xf32> to vector<32x16xf32>
    %164 = vector.shape_cast %161 : vector<32x16xf32> to vector<1x32x16xf32>
    tpu.vector_store %arg6[%c0_46, %c0_47, %c0_48], %164 {strides = array<i32>} : memref<1x32x16xf32, #tpu.memory_space<vmem>>, vector<1x32x16xf32>,
    return
  }
  func.func @transform_0(%arg0: i32) -> (i32, i32, i32) {
    %c0_i32 = arith.constant 0 : i32
    %c0_i32_0 = arith.constant 0 : i32
    %c0_i32_1 = arith.constant 0 : i32
    return %arg0, %c0_i32, %c0_i32_0 : i32, i32, i32
  }
  func.func @transform_1(%arg0: i32) -> (i32, i32) {
    %c0_i32 = arith.constant 0 : i32
    %c0_i32_0 = arith.constant 0 : i32
    %c0_i32_1 = arith.constant 0 : i32
    return %c0_i32, %c0_i32_0 : i32, i32
  }
  func.func @transform_2(%arg0: i32) -> (i32, i32) {
    %c0_i32 = arith.constant 0 : i32
    %c0_i32_0 = arith.constant 0 : i32
    %c0_i32_1 = arith.constant 0 : i32
    return %c0_i32, %c0_i32_0 : i32, i32
  }
  func.func @transform_3(%arg0: i32) -> (i32, i32) {
    %c0_i32 = arith.constant 0 : i32
    %c0_i32_0 = arith.constant 0 : i32
    %c0_i32_1 = arith.constant 0 : i32
    return %c0_i32, %c0_i32_0 : i32, i32
  }
  func.func @transform_4(%arg0: i32) -> (i32, i32) {
    %c0_i32 = arith.constant 0 : i32
    %c0_i32_0 = arith.constant 0 : i32
    %c0_i32_1 = arith.constant 0 : i32
    return %c0_i32, %c0_i32_0 : i32, i32
  }
  func.func @transform_5(%arg0: i32) -> (i32, i32, i32) {
    %c0_i32 = arith.constant 0 : i32
    %c0_i32_0 = arith.constant 0 : i32
    %c0_i32_1 = arith.constant 0 : i32
    return %arg0, %c0_i32, %c0_i32_0 : i32, i32, i32
  }
}

</mosaic_0001>

<bundles_post_ra>
// kernel: tpu_custom_call.1
= control target key start
LH: loop header
LB: loop body
LE: loop exit
PB: predicated region body
PF: predicated region fallthrough
CT: control target
= control target key end

     0   :  { %s1781_s18 = smov 0   ;;  %s2470_s0 = inlined_call_operand.vmem [shape: f32[2,32,16], index: 0, kind: input, shape index: {}]   ;;  %s2471_s1 = inlined_call_operand.vmem [shape: f32[32,12], index: 1, kind: input, shape index: {}]   ;;  %s2472_s2 = inlined_call_operand.vmem [shape: f32[128,1], index: 2, kind: input, shape index: {}]   ;;  %s2473_s3 = inlined_call_operand.vmem [shape: bf16[128,32], index: 3, kind: input, shape index: {}]   ;;  %s2474_s4 = inlined_call_operand.vmem [shape: bf16[32,128], index: 4, kind: input, shape index: {}]   ;;  %s2475_s5 = inlined_call_operand.vmem [shape: f32[2,32,16], index: 5, kind: output, shape index: {}]  }
   0x1 LB: > { %s1500_s19 = sadd.s32 4294967295, %s1729_s18   ;;  %p1504_p0 = scmp.ge.s32.totalorder %s1729_s18, 1  ;;  %s1729_s18 = sphi %s1781_s18, %s15_s18  }
   0x2   : > { %p187_p1 = scmp.lt.s32.totalorder %s1729_s18, 3 }
   0x4   : > { %p188_p2 = pnand %p1504_p0, %p187_p1 }
   0x6   : > { %191 = sbr.rel (%p188_p2) target bundleno = 906 (0x38a), region = 40 }
   0xb   : > { %v1792_v0 = vld [vmem:[%s2471_s1] sm:$0xff]  ;;  %p215_p3 = scmp.lt.s32.totalorder %s1500_s19, 1  ;;  %v1731_v1 = vmov 1   ;;  %v1732_v2 = vmov 0   ;;  %s1733_s26 = smov 16   ;;  %v1734_v5 = vmov 2  }
   0xc   : > { %1613 = vset.pattern.permute.xlu2 %v1731_v1  ;;  %1612 = vset.pattern.permute.xlu1 %v1732_v2  ;;  %v1831_v8 = vld [vmem:[%s2471_s1 + $0x18] sm:$0xff]  ;;  %v1838_v9 = vld [vmem:[%s2471_s1 + $0x8] sm:$0xff]  ;;  %v1845_v10 = vld [vmem:[%s2471_s1 + $0x10] sm:$0xff]  ;;  %v1735_v11 = vmov 4   ;;  %v1736_v12 = vmov 5   ;;  %v1737_v13 = vmov 6  }
   0xd   : > { %313 = vperm.xlu2 %1613, %v1792_v0   ;;  %s2537_s19 = smov (!%p215_p3, %s1500_s19), 1  ;;  %1611 = vset.pattern.permute.xlu0 %v1732_v2  ;;  %v1738_v14 = vmov 3   ;;  %v1739_v16 = vmov 7   ;;  %vm236_vm0 = vcmask 1047680   ;;  %s1740_s8 = smov 114   ;;  %vm591_vm7 = vcmask 130048  }
   0xe   : > { %s1559_s22 = sshll.u32 %s2537_s19, 5  ;;  %s1741_s9 = smov 115   ;;  %vm900_vm12 = vcmask 261120  }
   0xf   : > { %s1805_s25 = scalar_lea.vmem %s2470_s0, %s1559_s22  ;;  %s1742_s10 = smov 113  }
  0x10   : > { %v1808_v3 = vld [vmem:[%s1805_s25 + $0x10] sm:$0xff]  ;;  %v1811_v4 = vld [vmem:[%s1805_s25] sm:$0xff]  ;;  %v1819_v6 = vld [vmem:[%s1805_s25 + $0x18] sm:$0xff]  ;;  %s1743_s11 = smov 127   ;;  %s1744_s12 = smov 126  }
  0x11   : > { %243 = vrot.lane.b32.xlu1 %v1808_v3, %s1733_s26  ;;  %237 = vrot.lane.b32.xlu0 %v1811_v4, %s1733_s26  ;;  %v1822_v7 = vld [vmem:[%s1805_s25 + $0x8] sm:$0xff]  ;;  %s1745_s13 = smov 125   ;;  %s224_s15 = scalar_lea.vmem %s2475_s5, %s1559_s22 }
  0x15   : > { %1615 = vset.pattern.permute.xlu2 %v1734_v5 }
  0x16   : > { %360 = vperm.xlu2 %1615, %v1792_v0  }
  0x19   : > { %246 = vrot.lane.b32.xlu1 %v1819_v6, %s1733_s26  ;;  %240 = vrot.lane.b32.xlu0 %v1822_v7, %s1733_s26 }
  0x1e   : > { %1617 = vset.pattern.permute.xlu2 %v1732_v2 }
  0x1f   : > { %278 = vperm.xlu2 %1617, %v1831_v8  }
  0x21   : > { %268 = vperm.xlu1 %1612, %v1838_v9   ;;  %263 = vperm.xlu0 %1611, %v1792_v0  }
  0x27   : > { %1618 = vset.pattern.permute.xlu2 %v1734_v5 }
  0x28   : > { %368 = vperm.xlu2 %1618, %v1845_v10  }
  0x29   : > { %1614 = vset.pattern.permute.xlu1 %v1731_v1  ;;  %273 = vperm.xlu0 %1611, %v1845_v10  }
  0x2a   : > { %317 = vperm.xlu1 %1614, %v1838_v9  }
  0x30   : > { %1620 = vset.pattern.permute.xlu2 %v1735_v11 }
  0x31   : > { %435 = vperm.xlu2 %1620, %v1838_v9   ;;  %1616 = vset.pattern.permute.xlu0 %v1734_v5 }
  0x32   : > { %321 = vperm.xlu1 %1614, %v1845_v10   ;;  %364 = vperm.xlu0 %1616, %v1838_v9  }
  0x39   : > { %1623 = vset.pattern.permute.xlu2 %v1736_v12 }
  0x3a   : > { %482 = vperm.xlu2 %1623, %v1838_v9   ;;  %325 = vperm.xlu1 %1614, %v1831_v8  }
  0x3b   : > { %372 = vperm.xlu0 %1616, %v1831_v8  }
  0x42   : > { %486 = vperm.xlu2 %1623, %v1845_v10   ;;  %1619 = vset.pattern.permute.xlu1 %v1735_v11 }
  0x43   : > { %1621 = vset.pattern.permute.xlu0 %v1735_v11  ;;  %431 = vperm.xlu1 %1619, %v1792_v0  }
  0x44   : > { %439 = vperm.xlu0 %1621, %v1845_v10  }
  0x4a   : > { %490 = vperm.xlu2 %1623, %v1831_v8  }
  0x4b   : > { %1622 = vset.pattern.permute.xlu1 %v1736_v12 }
  0x4c   : > { %1625 = vset.pattern.permute.xlu0 %v1737_v13  ;;  %478 = vperm.xlu1 %1622, %v1792_v0  }
  0x4d   : > { %525 = vperm.xlu0 %1625, %v1792_v0  }
  0x52   : > { %1627 = vset.pattern.permute.xlu2 %v1737_v13 }
  0x53   : > { %537 = vperm.xlu2 %1627, %v1831_v8  }
  0x54   : > { %1624 = vset.pattern.permute.xlu1 %v1735_v11 }
  0x55   : > { %1629 = vset.pattern.permute.xlu0 %v1738_v14  ;;  %443 = vperm.xlu1 %1624, %v1831_v8  }
  0x56   : > { %411 = vperm.xlu0 %1629, %v1838_v9  }
  0x5b   : > { %1628 = vset.pattern.permute.xlu2 %v1738_v14 }
  0x5c   : > { %407 = vperm.xlu2 %1628, %v1792_v0  }
  0x5d   : > { %1626 = vset.pattern.permute.xlu1 %v1737_v13 }
  0x5e   : > { %419 = vperm.xlu0 %1629, %v1831_v8   ;;  %529 = vperm.xlu1 %1626, %v1838_v9  }
  0x64   : > { %415 = vperm.xlu2 %1628, %v1845_v10  }
  0x66   : > { %533 = vperm.xlu1 %1626, %v1845_v10  }
  0x67   : > { %v314_v15 = vpop.permute.xlu2 %313 }
  0x6c   : > { %1631 = vset.pattern.permute.xlu2 %v1739_v16 }
  0x6d   : > { %576 = vperm.xlu2 %1631, %v1838_v9  }
  0x6e   : > { %1630 = vset.pattern.permute.xlu1 %v1739_v16 }
  0x6f   : > { %572 = vperm.xlu1 %1630, %v1792_v0  }
  0x70   : > { %v361_v17 = vpop.permute.xlu2 %360 }
  0x79   : > { %v1872_v18 = vpop.permute.xlu2 %278 }
  0x82   : > { %v1877_v22 = vpop.permute.xlu2 %368 }
  0x83   : > { %v244_v19 = vpop.permute.xlu1 %243  ;;  %v238_v20 = vpop.permute.xlu0 %237 }
  0x84   : > { %v239_v21 = vsel %vm236_vm0, %v238_v20, %v1811_v4  ;;  %v245_v28 = vsel %vm236_vm0, %v244_v19, %v1808_v3 }
  0x85   : > { %249 = vrot.lane.b32.xlu2 %v239_v21, %s1733_s26 }
  0x8b   : > { %v247_v23 = vpop.permute.xlu1 %246  ;;  %v241_v24 = vpop.permute.xlu0 %240 }
  0x8c   : > { %v248_v25 = vsel %vm236_vm0, %v247_v23, %v1819_v6  ;;  %v242_v26 = vsel %vm236_vm0, %v241_v24, %v1822_v7  ;;  %v436_v27 = vpop.permute.xlu2 %435 }
  0x8d   : > { %255 = vrot.lane.b32.xlu1 %v248_v25, %s1733_s26  ;;  %251 = vrot.lane.b32.xlu2 %v242_v26, %s1733_s26 }
  0x93   : > { %v269_v30 = vpop.permute.xlu1 %268  ;;  %v264_v43 = vpop.permute.xlu0 %263 }
  0x94   : > { %v483_v29 = vpop.permute.xlu2 %482 }
  0x95   : > { %253 = vrot.lane.b32.xlu2 %v245_v28, %s1733_s26 }
  0x9b   : > { %v274_v49 = vpop.permute.xlu0 %273 }
  0x9c   : > { %v1888_v31 = vpop.permute.xlu2 %486  ;;  %v318_v32 = vpop.permute.xlu1 %317 }
  0xa4   : > { %v1890_v33 = vpop.permute.xlu2 %490  ;;  %v322_v34 = vpop.permute.xlu1 %321 }
  0xa5   : > { %v365_v57 = vpop.permute.xlu0 %364 }
  0xac   : > { %v326_v36 = vpop.permute.xlu1 %325 }
  0xad   : > { %v1892_v35 = vpop.permute.xlu2 %537  ;;  %v373_v63 = vpop.permute.xlu0 %372 }
  0xb5   : > { %v432_v38 = vpop.permute.xlu1 %431 }
  0xb6   : > { %v1894_v37 = vpop.permute.xlu2 %407 }
  0xbe   : > { %v1896_v39 = vpop.permute.xlu2 %415  ;;  %v479_v40 = vpop.permute.xlu1 %478 }
  0xc7   : > { %v1898_v41 = vpop.permute.xlu2 %576  ;;  %v1900_v42 = vpop.permute.xlu1 %443 }
  0xd0   : > { %v530_v48 = vpop.permute.xlu1 %529 }
  0xd8   : > { %v534_v55 = vpop.permute.xlu1 %533 }
  0xdf   : > { %v250_v44 = vpop.permute.xlu2 %249 }
  0xe0   : > { %v257_v45 = vsel %vm236_vm0, %v250_v44, %v1811_v4 }
  0xe1   : > { %v328_v46 = vmul.f32 %v314_v15, %v257_v45  ;;  %v281_v47 = vmul.f32 %v264_v43, %v257_v45  ;;  %v375_v60 = vmul.f32 %v361_v17, %v257_v45  ;;  %v1914_v62 = vpop.permute.xlu1 %572  ;;  %v440_v15 = vpop.permute.xlu0 %439  ;;  %v446_v23 = vmul.f32 %v432_v38, %v257_v45 }
  0xe3   : > { %339 = vrot.lane.b32.xlu2 %v328_v46, %s1740_s8  ;;  %292 = vrot.lane.b32.xlu0 %v281_v47, %s1741_s9 }
  0xe7   : > { %v252_v50 = vpop.permute.xlu2 %251 }
  0xe8   : > { %v258_v51 = vsel %vm236_vm0, %v252_v50, %v1822_v7  ;;  %v234_v50 = vlaneseq }
  0xe9   : > { %v282_v52 = vmul.f32 %v269_v30, %v258_v51  ;;  %v329_v53 = vmul.f32 %v318_v32, %v258_v51  ;;  %v541_v54 = vmul.f32 %v530_v48, %v258_v51  ;;  %v376_v1 = vmul.f32 %v365_v57, %v258_v51  ;;  %v526_v20 = vpop.permute.xlu0 %525 }
  0xea   : > { %v447_v16 = vmul.f32 %v436_v27, %v258_v51  ;;  %v494_v17 = vmul.f32 %v483_v29, %v258_v51  ;;  %v540_v21 = vmul.f32 %v526_v20, %v257_v45  ;;  %v1746_v29 = vmov 8  }
  0xeb   : > { %294 = vrot.lane.b32.xlu1 %v282_v52, %s1741_s9  ;;  %341 = vrot.lane.b32.xlu0 %v329_v53, %s1740_s8  ;;  %v1945_v52 = vand.u32 127, %v234_v50 }
  0xec   : > { %1632 = vset.pattern.permute.xlu0 %v1746_v29 }
  0xed   : > { %vm285_vm1 = vcmp.ge.s32.totalorder %v1945_v52, 3  ;;  %vm332_vm2 = vcmp.ge.s32.totalorder %v1945_v52, 2  ;;  %vm379_vm3 = vcmp.ge.s32.totalorder %v1945_v52, 1  ;;  %vm450_vm4 = vcmp.lt.s32.totalorder %v1945_v52, 15 }
  0xee   : > { %vm497_vm5 = vcmp.lt.s32.totalorder %v1945_v52, 14  ;;  %vm544_vm6 = vcmp.lt.s32.totalorder %v1945_v52, 13 }
  0xef   : > { %v254_v56 = vpop.permute.xlu2 %253 }
  0xf0   : > { %v259_v58 = vsel %vm236_vm0, %v254_v56, %v1808_v3 }
  0xf1   : > { %v330_v59 = vmul.f32 %v322_v34, %v259_v58  ;;  %v283_v61 = vmul.f32 %v274_v49, %v259_v58  ;;  %v377_v19 = vmul.f32 %v1877_v22, %v259_v58  ;;  %v495_v24 = vmul.f32 %v1888_v31, %v259_v58  ;;  %v1934_v30 = vpop.permute.xlu0 %411 }
  0xf2   : > { %v542_v25 = vmul.f32 %v534_v55, %v259_v58  ;;  %v448_v26 = vmul.f32 %v440_v15, %v259_v58  ;;  %v1747_v31 = vmov 9   ;;  %v422_v15 = vmul.f32 %v1894_v37, %v1811_v4 }
  0xf3   : > { %343 = vrot.lane.b32.xlu2 %v330_v59, %s1740_s8  ;;  %386 = vrot.lane.b32.xlu0 %v375_v60, %s1742_s10  ;;  %v423_v4 = vmul.f32 %v1934_v30, %v1822_v7 }
  0xf4   : > { %296 = vrot.lane.b32.xlu1 %v283_v61, %s1741_s9 }
  0xf9   : > { %v420_v32 = vpop.permute.xlu0 %419 }
  0xfc   : > { %388 = vrot.lane.b32.xlu1 %v376_v1, %s1742_s10 }
  0xff   : > { %v256_v5 = vpop.permute.xlu1 %255 }
 0x100   : > { %v260_v11 = vsel %vm236_vm0, %v256_v5, %v1819_v6 }
 0x101   : > { %v331_v12 = vmul.f32 %v326_v36, %v260_v11  ;;  %v284_v13 = vmul.f32 %v1872_v18, %v260_v11  ;;  %v378_v14 = vmul.f32 %v373_v63, %v260_v11  ;;  %v493_v18 = vmul.f32 %v479_v40, %v257_v45 }
 0x102   : > { %v496_v22 = vmul.f32 %v1890_v33, %v260_v11  ;;  %v543_v27 = vmul.f32 %v1892_v35, %v260_v11  ;;  %v449_v28 = vmul.f32 %v1900_v42, %v260_v11 }
 0x103   : > { %345 = vrot.lane.b32.xlu2 %v331_v12, %s1740_s8  ;;  %392 = vrot.lane.b32.xlu0 %v378_v14, %s1742_s10 }
 0x104   : > { %298 = vrot.lane.b32.xlu1 %v284_v13, %s1741_s9 }
 0x10b   : > { %459 = vrot.lane.b32.xlu2 %v447_v16, %s1743_s11  ;;  %506 = vrot.lane.b32.xlu0 %v494_v17, %s1744_s12 }
 0x10c   : > { %390 = vrot.lane.b32.xlu1 %v377_v19, %s1742_s10 }
 0x113   : > { %504 = vrot.lane.b32.xlu2 %v493_v18, %s1744_s12  ;;  %551 = vrot.lane.b32.xlu0 %v540_v21, %s1745_s13 }
 0x114   : > { %457 = vrot.lane.b32.xlu1 %v446_v23, %s1743_s11 }
 0x11b   : > { %508 = vrot.lane.b32.xlu2 %v495_v24, %s1744_s12  ;;  %555 = vrot.lane.b32.xlu0 %v542_v25, %s1745_s13 }
 0x11c   : > { %461 = vrot.lane.b32.xlu1 %v448_v26, %s1743_s11  ;;  %v425_v26 = vmul.f32 %v420_v32, %v1819_v6 }
 0x123   : > { %510 = vrot.lane.b32.xlu2 %v496_v22, %s1744_s12  ;;  %557 = vrot.lane.b32.xlu0 %v543_v27, %s1745_s13 }
 0x124   : > { %463 = vrot.lane.b32.xlu1 %v449_v28, %s1743_s11 }
 0x12b   : > { %584 = vperm.xlu2 %1631, %v1831_v8   ;;  %659 = vperm.xlu0 %1632, %v1845_v10  }
 0x12c   : > { %553 = vrot.lane.b32.xlu1 %v541_v54, %s1745_s13 }
 0x133   : > { %1634 = vset.pattern.permute.xlu2 %v1747_v31  ;;  %655 = vperm.xlu0 %1632, %v1838_v9  }
 0x134   : > { %580 = vperm.xlu1 %1630, %v1845_v10   ;;  %679 = vperm.xlu2 %1634, %v1845_v10  }
 0x13b   : > { %1638 = vset.pattern.permute.xlu0 %v1732_v2 }
 0x13c   : > { %1633 = vset.pattern.permute.xlu1 %v1746_v29  ;;  %1636 = vset.pattern.permute.xlu2 %v1746_v29 }
 0x13d   : > { %663 = vperm.xlu1 %1633, %v1831_v8   ;;  %651 = vperm.xlu2 %1636, %v1792_v0   ;;  %v340_v35 = vpop.permute.xlu2 %339 }
 0x13e   : > { %v351_v55 = vsel %vm332_vm2, %v340_v35, 0.0 }
 0x145   : > { %1635 = vset.pattern.permute.xlu1 %v1747_v31  ;;  %1637 = vset.pattern.permute.xlu2 %v1747_v31  ;;  %v424_v31 = vmul.f32 %v1896_v39, %v1808_v3 }
 0x146   : > { %683 = vperm.xlu1 %1635, %v1831_v8   ;;  %675 = vperm.xlu2 %1637, %v1838_v9  }
 0x14d   : > { %v344_v40 = vpop.permute.xlu2 %343 }
 0x14e   : > { %671 = vperm.xlu1 %1635, %v1792_v0   ;;  %1640 = vset.pattern.permute.xlu2 %v1732_v2  ;;  %v353_v16 = vsel %vm332_vm2, %v344_v40, 0.0 }
 0x155   : > { %v293_v33 = vpop.permute.xlu0 %292 }
 0x156   : > { %1639 = vset.pattern.permute.xlu1 %v1732_v2  ;;  %v304_v54 = vsel %vm285_vm1, %v293_v33, 0.0 }
 0x157   : > { %v355_v59 = vadd.f32 %v351_v55, %v304_v54 }
 0x15d   : > { %v295_v34 = vpop.permute.xlu1 %294  ;;  %v342_v36 = vpop.permute.xlu0 %341 }
 0x15e   : > { %v346_v44 = vpop.permute.xlu2 %345  ;;  %v305_v60 = vsel %vm285_vm1, %v295_v34, 0.0  ;;  %v352_v61 = vsel %vm332_vm2, %v342_v36, 0.0 }
 0x15f   : > { %v354_v63 = vsel %vm332_vm2, %v346_v44, 0.0  ;;  %v356_v13 = vadd.f32 %v352_v61, %v305_v60 }
 0x165   : > { %v387_v43 = vpop.permute.xlu0 %386 }
 0x166   : > { %v297_v38 = vpop.permute.xlu1 %296  ;;  %v460_v47 = vpop.permute.xlu2 %459  ;;  %v398_v56 = vsel %vm379_vm3, %v387_v43, 0.0 }
 0x167   : > { %v402_v1 = vadd.f32 %v398_v56, %v355_v59  ;;  %v306_v14 = vsel %vm285_vm1, %v297_v38, 0.0  ;;  %v470_v33 = vsel %vm450_vm4, %v460_v47, 0.0 }
 0x168   : > { %v357_v18 = vadd.f32 %v353_v16, %v306_v14 }
 0x169   : > { %v426_v24 = vadd.f32 %v422_v15, %v402_v1 }
 0x16e   : > { %v389_v42 = vpop.permute.xlu1 %388  ;;  %v505_v53 = vpop.permute.xlu2 %504 }
 0x16f   : > { %v399_v5 = vsel %vm379_vm3, %v389_v42, 0.0  ;;  %v516_v7 = vsel %vm497_vm5, %v505_v53, 0.0 }
 0x170   : > { %v403_v17 = vadd.f32 %v399_v5, %v356_v13 }
 0x172   : > { %v427_v28 = vadd.f32 %v423_v4, %v403_v17 }
 0x174   : > { %v474_v3 = vadd.f32 %v470_v33, %v427_v28 }
 0x175   : > { %v393_v46 = vpop.permute.xlu0 %392 }
 0x176   : > { %v299_v45 = vpop.permute.xlu1 %298  ;;  %v509_v11 = vpop.permute.xlu2 %508  ;;  %v401_v19 = vsel %vm379_vm3, %v393_v46, 0.0 }
 0x177   : > { %v307_v57 = vsel %vm285_vm1, %v299_v45, 0.0  ;;  %v1748_v45 = vmov 32.0   ;;  %v518_v50 = vsel %vm497_vm5, %v509_v11, 0.0 }
 0x178   : > { %v358_v12 = vadd.f32 %v354_v63, %v307_v57  ;;  %1647 = vrcp.f32 %v1748_v45 }
 0x17a   : > { %v405_v23 = vadd.f32 %v401_v19, %v358_v12 }
 0x17c   : > { %v429_v34 = vadd.f32 %v425_v26, %v405_v23 }
 0x17d   : > { %v507_v49 = vpop.permute.xlu0 %506 }
 0x17e   : > { %v391_v48 = vpop.permute.xlu1 %390  ;;  %v517_v6 = vsel %vm497_vm5, %v507_v49, 0.0  ;;  %v511_v32 = vpop.permute.xlu2 %510 }
 0x17f   : > { %v400_v20 = vsel %vm379_vm3, %v391_v48, 0.0  ;;  %v519_v40 = vsel %vm497_vm5, %v511_v32, 0.0  ;;  %v521_v42 = vadd.f32 %v517_v6, %v474_v3  ;;  %v1648_v57 = vpop.eup %1647  ;;  %v725_v32 = vld [vmem:[%s2472_s2 + $0x78] sm:$0xff] }
 0x180   : > { %v404_v22 = vadd.f32 %v400_v20, %v357_v18  ;;  %v606_v11 = vmul.f32 32.0, %v1648_v57  ;;  %vm610_vm8 = vweird.f32 %v1648_v57  ;;  %803 = vperm.xlu1 %1639, %v725_v32   ;;  %v1563_v32 = vld [vmem:[%s2473_s3 + $0x10] sm:$0xff] }
 0x182   : > { %v428_v36 = vadd.f32 %v424_v31, %v404_v22  ;;  %v607_v15 = vsub.f32 1.0, %v606_v11 }
 0x184   : > { %v608_v17 = vmul.f32 %v1648_v57, %v607_v15 }
 0x185   : > { %v552_v2 = vpop.permute.xlu0 %551 }
 0x186   : > { %v458_v51 = vpop.permute.xlu1 %457  ;;  %v563_v43 = vsel %vm544_vm6, %v552_v2, 0.0  ;;  %v585_v61 = vpop.permute.xlu2 %584 }
 0x187   : > { %v469_v21 = vsel %vm450_vm4, %v458_v51, 0.0 }
 0x188   : > { %v473_v27 = vadd.f32 %v469_v21, %v426_v24  ;;  %v609_v21 = vadd.f32 %v1648_v57, %v608_v17 }
 0x18a   : > { %v520_v35 = vadd.f32 %v516_v7, %v473_v27  ;;  %v611_v24 = vsel %vm610_vm8, %v1648_v57, %v609_v21 }
 0x18c   : > { %v567_v46 = vadd.f32 %v563_v43, %v520_v35  ;;  %v724_v35 = vld [vmem:[%s2472_s2 + $0x70] sm:$0xff]  ;;  %v721_v43 = vld [vmem:[%s2472_s2 + $0x58] sm:$0xff] }
 0x18d   : > { %v556_v25 = vpop.permute.xlu0 %555  ;;  %798 = vperm.xlu0 %1638, %v724_v35   ;;  %v1566_v35 = vld [vmem:[%s2473_s3 + $0x28] sm:$0xff] }
 0x18e   : > { %v462_v58 = vpop.permute.xlu1 %461  ;;  %v587_v2 = vadd.f32 %v1914_v62, %v567_v46 }
 0x18f   : > { %v471_v30 = vsel %vm450_vm4, %v462_v58, 0.0  ;;  %v565_v58 = vsel %vm544_vm6, %v556_v25, 0.0 }
 0x190   : > { %v475_v39 = vadd.f32 %v471_v30, %v428_v36  ;;  %v592_v1 = vsel %vm591_vm7, %v587_v2, 0.0 }
 0x192   : > { %v522_v53 = vadd.f32 %v518_v50, %v475_v39 }
 0x194   : > { %v569_v59 = vadd.f32 %v565_v58, %v522_v53  ;;  %v680_v53 = vpop.permute.xlu2 %679 }
 0x195   : > { %v558_v48 = vpop.permute.xlu0 %557  ;;  %783 = vperm.xlu0 %1638, %v721_v43  }
 0x196   : > { %v464_v37 = vpop.permute.xlu1 %463  ;;  %v566_v54 = vsel %vm544_vm6, %v558_v48, 0.0  ;;  %v718_v48 = vld [vmem:[%s2472_s2 + $0x40] sm:$0xff] }
 0x197   : > { %v472_v29 = vsel %vm450_vm4, %v464_v37, 0.0 }
 0x198   : > { %v476_v38 = vadd.f32 %v472_v29, %v429_v34 }
 0x19a   : > { %v523_v47 = vadd.f32 %v519_v40, %v476_v38 }
 0x19c   : > { %v570_v56 = vadd.f32 %v566_v54, %v523_v47 }
 0x19e   : > { %v554_v44 = vpop.permute.xlu1 %553  ;;  %v590_v5 = vadd.f32 %v585_v61, %v570_v56  ;;  %v712_v61 = vld [vmem:[%s2472_s2 + $0x10] sm:$0xff] }
 0x19f   : > { %v564_v49 = vsel %vm544_vm6, %v554_v44, 0.0 }
 0x1a0   : > { %v568_v51 = vadd.f32 %v564_v49, %v521_v42  ;;  %v597_v14 = vsel %vm591_vm7, %v590_v5, 0.0  ;;  %v723_v42 = vld [vmem:[%s2472_s2 + $0x68] sm:$0xff]  ;;  %v716_v49 = vld [vmem:[%s2472_s2 + $0x30] sm:$0xff] }
 0x1a1   : > { %793 = vperm.xlu1 %1639, %v723_v42   ;;  %758 = vperm.xlu0 %1638, %v716_v49  }
 0x1a2   : > { %v588_v55 = vadd.f32 %v1898_v41, %v568_v51 }
 0x1a4   : > { %v593_v60 = vsel %vm591_vm7, %v588_v55, 0.0 }
 0x1a5   : > { %v594_v13 = vadd.f32 %v593_v60, %v592_v1  ;;  %v652_v60 = vpop.permute.xlu2 %651 }
 0x1a6   : > { %v581_v63 = vpop.permute.xlu1 %580 }
 0x1a7   : > { %v589_v12 = vadd.f32 %v581_v63, %v569_v59  ;;  %v660_v59 = vpop.permute.xlu0 %659  ;;  %v710_v63 = vld [vmem:[%s2472_s2] sm:$0xff] }
 0x1a9   : > { %v595_v41 = vsel %vm591_vm7, %v589_v12, 0.0  ;;  %768 = vperm.xlu1 %1639, %v718_v48  }
 0x1aa   : > { %v596_v62 = vadd.f32 %v595_v41, %v594_v13 }
 0x1ac   : > { %v598_v16 = vadd.f32 %v597_v14, %v596_v62 }
 0x1ae   : > { %v599_v52 = vrot.slane %v598_v16, 4 }
 0x1af   : > { %v664_v54 = vpop.permute.xlu1 %663  ;;  %v656_v17 = vpop.permute.xlu0 %655 }
 0x1b0   : > { %v600_v19 = vadd.f32 %v599_v52, %v598_v16  ;;  %v711_v16 = vld [vmem:[%s2472_s2 + $0x8] sm:$0xff]  ;;  %v722_v52 = vld [vmem:[%s2472_s2 + $0x60] sm:$0xff] }
 0x1b1   : > { %788 = vperm.xlu2 %1640, %v722_v52  }
 0x1b2   : > { %v601_v20 = vrot.slane %v600_v19, 2 }
 0x1b4   : > { %v602_v18 = vadd.f32 %v601_v20, %v600_v19  ;;  %v676_v19 = vpop.permute.xlu2 %675 }
 0x1b6   : > { %v603_v23 = vrot.slane %v602_v18, 1 }
 0x1b8   : > { %v604_v25 = vadd.f32 %v603_v23, %v602_v18 }
 0x1ba   : > { %v612_v4 = vmul.f32 %v611_v24, %v604_v25 }
 0x1bc   : > { %v613_v37 = vsub.f32 %v587_v2, %v612_v4  ;;  %v614_v26 = vsub.f32 %v588_v55, %v612_v4  ;;  %v615_v22 = vsub.f32 %v589_v12, %v612_v4  ;;  %v616_v27 = vsub.f32 %v590_v5, %v612_v4  ;;  %v717_v55 = vld [vmem:[%s2472_s2 + $0x38] sm:$0xff]  ;;  %v715_v2 = vld [vmem:[%s2472_s2 + $0x28] sm:$0xff]  ;;  %v684_v5 = vpop.permute.xlu1 %683 }
 0x1bd   : > { %763 = vperm.xlu1 %1639, %v717_v55   ;;  %753 = vperm.xlu0 %1638, %v715_v2  }
 0x1be   : > { %v617_v28 = vmul.f32 %v613_v37, %v613_v37  ;;  %v618_v29 = vmul.f32 %v614_v26, %v614_v26  ;;  %v619_v31 = vmul.f32 %v615_v22, %v615_v22  ;;  %v620_v7 = vmul.f32 %v616_v27, %v616_v27 }
 0x1c0   : > { %v621_v33 = vsel %vm591_vm7, %v617_v28, 0.0  ;;  %v622_v34 = vsel %vm591_vm7, %v618_v29, 0.0  ;;  %v624_v30 = vsel %vm591_vm7, %v619_v31, 0.0  ;;  %v626_v38 = vsel %vm591_vm7, %v620_v7, 0.0  ;;  %v1561_v28 = vld [vmem:[%s2473_s3] sm:$0xff]  ;;  %v1567_v29 = vld [vmem:[%s2473_s3 + $0x30] sm:$0xff] }
 0x1c1   : > { %v623_v6 = vadd.f32 %v622_v34, %v621_v33  ;;  %v719_v31 = vld [vmem:[%s2472_s2 + $0x48] sm:$0xff]  ;;  %v1565_v34 = vld [vmem:[%s2473_s3 + $0x20] sm:$0xff]  ;;  %v1568_v7 = vld [vmem:[%s2473_s3 + $0x38] sm:$0xff] }
 0x1c2   : > { %v1562_v33 = vld [vmem:[%s2473_s3 + $0x8] sm:$0xff] }
 0x1c3   : > { %v625_v36 = vadd.f32 %v624_v30, %v623_v6  ;;  %v714_v6 = vld [vmem:[%s2472_s2 + $0x20] sm:$0xff]  ;;  %v713_v30 = vld [vmem:[%s2472_s2 + $0x18] sm:$0xff] }
 0x1c5   : > { %v627_v3 = vadd.f32 %v626_v38, %v625_v36  ;;  %738 = vperm.xlu1 %1639, %v712_v61   ;;  %728 = vperm.xlu0 %1638, %v710_v63  }
 0x1c7   : > { %v628_v39 = vrot.slane %v627_v3, 4 }
 0x1c9   : > { %v629_v40 = vadd.f32 %v628_v39, %v627_v3 }
 0x1cb   : > { %v630_v44 = vrot.slane %v629_v40, 2 }
 0x1cd   : > { %v631_v45 = vadd.f32 %v630_v44, %v629_v40  ;;  %733 = vperm.xlu1 %1639, %v711_v16   ;;  %824 = vrot.lane.b32.xlu0 %v1838_v9, %s1743_s11  ;;  %v1564_v9 = vld [vmem:[%s2473_s3 + $0x18] sm:$0xff] }
 0x1cf   : > { %v632_v46 = vrot.slane %v631_v45, 1 }
 0x1d1   : > { %v633_v47 = vadd.f32 %v632_v46, %v631_v45 }
 0x1d3   : > { %v634_v50 = vmul.f32 %v633_v47, %v611_v24  ;;  %v672_v24 = vpop.permute.xlu1 %671 }
 0x1d5   : > { %v635_v51 = vadd.f32 1e-06, %v634_v50  ;;  %826 = vrot.lane.b32.xlu1 %v1845_v10, %s1743_s11  ;;  %v720_v10 = vld [vmem:[%s2472_s2 + $0x50] sm:$0xff] }
 0x1d6   : > { %778 = vperm.xlu2 %1640, %v720_v10  }
 0x1d7   : > { %1649 = vrsqrt.f32 %v635_v51  ;;  %vm642_vm10 = vweird.f32 %v635_v51 }
 0x1dd   : > { %v1650_v56 = vpop.eup %1649 }
 0x1de   : > { %v637_v57 = vmul.f32 %v1650_v56, %v635_v51  ;;  %vm643_vm9 = vweird.f32 %v1650_v56  ;;  %773 = vperm.xlu2 %1640, %v719_v31  }
 0x1df   : > { %vm644_vm11 = vmor %vm642_vm10, %vm643_vm9 }
 0x1e0   : > { %v638_v58 = vmul.f32 %v1650_v56, %v637_v57 }
 0x1e2   : > { %v639_v1 = vmul.f32 0.5, %v638_v58 }
 0x1e4   : > { %v640_v11 = vsub.f32 1.5, %v639_v1 }
 0x1e6   : > { %v641_v12 = vmul.f32 %v1650_v56, %v640_v11  ;;  %748 = vperm.xlu2 %1640, %v714_v6  }
 0x1e8   : > { %v645_v13 = vsel %vm644_vm11, %v1650_v56, %v641_v12 }
 0x1e9   : > { %v649_v41 = vmul.f32 %v645_v13, %v616_v27  ;;  %v648_v62 = vmul.f32 %v645_v13, %v615_v22  ;;  %v646_v14 = vmul.f32 %v645_v13, %v613_v37  ;;  %v647_v15 = vmul.f32 %v645_v13, %v614_v26 }
 0x1eb   : > { %v669_v20 = vmul.f32 %v664_v54, %v649_v41  ;;  %v668_v21 = vmul.f32 %v660_v59, %v648_v62  ;;  %v666_v18 = vmul.f32 %v652_v60, %v646_v14  ;;  %v667_v23 = vmul.f32 %v656_v17, %v647_v15 }
 0x1ed   : > { %v688_v25 = vadd.f32 %v680_v53, %v668_v21  ;;  %v689_v4 = vadd.f32 %v684_v5, %v669_v20  ;;  %v686_v37 = vadd.f32 %v672_v24, %v666_v18  ;;  %v687_v26 = vadd.f32 %v676_v19, %v667_v23 }
 0x1ee   : > { %743 = vperm.xlu2 %1640, %v713_v30  }
 0x1ef   : > { %v859_v22 = vpack.c.bf16 %v689_v4, %v688_v25  ;;  %v858_v27 = vpack.c.bf16 %v687_v26, %v686_v37 }
 0x1f1   : > { %931 = vmatpush.bf16.msra.mxu0 %v859_v22  ;;  %1571 = vmatpush.bf16.msra.mxu2 %v859_v22 }
 0x1f2   : > { %1572 = vmatpush.bf16.msra.mxu3 %v859_v22  ;;  %v2106_v36 = vpop.permute.xlu1 %803 }
 0x1f5   : > { %932 = vmatpush.bf16.msra.mxu0 %v858_v27  ;;  %1573 = vmatpush.bf16.msra.mxu2 %v858_v27 }
 0x1f6   : > { %1574 = vmatpush.bf16.msra.mxu3 %v858_v27  ;;  %822 = vrot.lane.b32.xlu2 %v1792_v0, %s1743_s11 }
 0x1f8   : > { %1541 = vmatmul.msk.bf16.vlgmr.msra.gmra.mxu0 %vm900_vm12, %v1561_v28  ;;  %1544 = vmatmul.msk.bf16.vlgmr.msra.gmra.mxu2 %vm900_vm12, %v1564_v9 }
 0x1f9   : > { %1547 = vmatmul.msk.bf16.vlgmr.msra.gmra.mxu3 %vm900_vm12, %v1567_v29 }
 0x1fe   : > { %828 = vrot.lane.b32.xlu2 %v1831_v8, %s1743_s11 }
 0x1ff   : > { %v2108_v38 = vpop.permute.xlu0 %798 }
 0x207   : > { %v2110_v39 = vpop.permute.xlu0 %783 }
 0x208   : > { %1542 = vmatmul.msk.bf16.gmra.mxu0 %vm900_vm12, %v1562_v33  ;;  %1545 = vmatmul.msk.bf16.gmra.mxu2 %vm900_vm12, %v1565_v34 }
 0x209   : > { %1548 = vmatmul.msk.bf16.gmra.mxu3 %vm900_vm12, %v1568_v7 }
 0x20b   : > { %v789_v43 = vpop.permute.xlu2 %788 }
 0x213   : > { %v794_v3 = vpop.permute.xlu1 %793  ;;  %v759_v42 = vpop.permute.xlu0 %758 }
 0x218   : > { %1543 = vmatmul.msk.bf16.gmra.mxu0 %vm900_vm12, %v1563_v32  ;;  %1546 = vmatmul.msk.bf16.gmra.mxu2 %vm900_vm12, %v1566_v35 }
 0x21b   : > { %v769_v40 = vpop.permute.xlu1 %768 }
 0x22f   : > { %v764_v44 = vpop.permute.xlu1 %763  ;;  %v2112_v45 = vpop.permute.xlu0 %753 }
 0x230   : > { %v2114_v46 = vpop.permute.xlu2 %778 }
 0x237   : > { %v739_v47 = vpop.permute.xlu1 %738  ;;  %v729_v0 = vpop.permute.xlu0 %728 }
 0x238   : > { %v2121_v51 = vpop.permute.xlu2 %773 }
 0x23f   : > { %v734_v55 = vpop.permute.xlu1 %733 }
 0x240   : > { %v2138_v18 = vpop.permute.xlu2 %748 }
 0x275   : > { %v934_v48 = vpop.f32.mrf.mxu0 }
 0x276   : > { %v2116_v49 = vadd.f32 %v934_v48, %v729_v0 }
 0x278   : > { %2492 = vst [vmem:[#allocation2_spill] sm:$0xff] %v2116_v49  ;;  %v2119_v8 = vmul.f32 0.70710677, %v2116_v49 }
 0x27a   : > { %2493 = vst [vmem:[#allocation3_spill] sm:$0xff] %v2119_v8  ;;  %v1006_v2 = vand.u32 2147483647, %v2119_v8 }
 0x27b   : > { %v949_v50 = vpop.f32.mrf.mxu2 }
 0x27c   : > { %v950_v53 = vadd.f32 %v949_v50, %v759_v42  ;;  %v964_v54 = vpop.f32.mrf.mxu3  ;;  %v1214_v61 = vsub.f32 0.0, %v1006_v2  ;;  %v1022_v63 = vmul.f32 0.3275911, %v1006_v2 }
 0x27d   : > { %v965_v56 = vadd.f32 %v964_v54, %v789_v43  ;;  %v936_v57 = vpop.f32.mrf.mxu0 }
 0x27e   : > { %v2124_v58 = vmul.f32 0.70710677, %v950_v53  ;;  %v2128_v60 = vadd.f32 %v936_v57, %v734_v55  ;;  %v1230_v13 = vmul.f32 %v1214_v61, %v1006_v2  ;;  %v1038_v14 = vadd.f32 1.0, %v1022_v63  ;;  %v744_v61 = vpop.permute.xlu2 %743 }
 0x27f   : > { %v2126_v59 = vmul.f32 0.70710677, %v965_v56  ;;  %v2148_v7 = vmul.f32 0.5, %v950_v53  ;;  %v2158_v63 = vmul.f32 0.5, %v965_v56 }
 0x280   : > { %2494 = vst [vmem:[#allocation4_spill] sm:$0xff] %v2128_v60  ;;  %v1012_v1 = vand.u32 2147483647, %v2124_v58  ;;  %v2132_v5 = vmul.f32 0.70710677, %v2128_v60  ;;  %1651 = vrcp.f32 %v1038_v14  ;;  %vm1316_vm5 = vcmp.ge.f32.partialorder %v2124_v58, 0.0 }
 0x281   : > { %v1018_v11 = vand.u32 2147483647, %v2126_v59  ;;  %v1246_v24 = vmul.f32 1.442695, %v1230_v13  ;;  %2499 = vst [vmem:[#allocation9_spill] sm:$0xff] %v2148_v7  ;;  %vm1322_vm15 = vcmp.ge.f32.partialorder %v2126_v59, 0.0 }
 0x282   : > { %2495 = vst [vmem:[#allocation5_spill] sm:$0xff] %v2132_v5  ;;  %v1028_v15 = vmul.f32 0.3275911, %v1012_v1  ;;  %v1220_v16 = vsub.f32 0.0, %v1012_v1  ;;  %v1007_v52 = vand.u32 2147483647, %v2132_v5 }
 0x283   : > { %v951_v12 = vpop.f32.mrf.mxu2  ;;  %v1034_v19 = vmul.f32 0.3275911, %v1018_v11  ;;  %v1226_v20 = vsub.f32 0.0, %v1018_v11  ;;  %1653 = vpow2.f32 %v1246_v24 }
 0x284   : > { %v952_v41 = vadd.f32 %v951_v12, %v764_v44  ;;  %v966_v62 = vpop.f32.mrf.mxu3  ;;  %v1215_v23 = vsub.f32 0.0, %v1007_v52  ;;  %v1236_v37 = vmul.f32 %v1220_v16, %v1012_v1  ;;  %v1044_v22 = vadd.f32 1.0, %v1028_v15 }
 0x285   : > { %v939_v17 = vpop.f32.mrf.mxu0  ;;  %v967_v4 = vadd.f32 %v966_v62, %v794_v3  ;;  %v1050_v27 = vadd.f32 1.0, %v1034_v19  ;;  %v1242_v28 = vmul.f32 %v1226_v20, %v1018_v11  ;;  %v1023_v29 = vmul.f32 0.3275911, %v1007_v52 }
 0x286   : > { %v2136_v21 = vmul.f32 0.70710677, %v952_v41  ;;  %v2141_v26 = vadd.f32 %v939_v17, %v739_v47  ;;  %v1231_v10 = vmul.f32 %v1215_v23, %v1007_v52  ;;  %v1258_v32 = vmul.f32 1.442695, %v1236_v37  ;;  %v2154_v48 = vpop.eup %1651 }
 0x287   : > { %v2143_v31 = vmul.f32 0.70710677, %v967_v4  ;;  %1655 = vrcp.f32 %v1044_v22  ;;  %v1270_v44 = vmul.f32 1.442695, %v1242_v28  ;;  %v1039_v50 = vadd.f32 1.0, %v1023_v29 }
 0x288   : > { %2496 = vst [vmem:[#allocation6_spill] sm:$0xff] %v2136_v21  ;;  %v1013_v25 = vand.u32 2147483647, %v2136_v21  ;;  %v2146_v33 = vmul.f32 0.70710677, %v2141_v26  ;;  %1657 = vrcp.f32 %v1050_v27  ;;  %v2164_v15 = vmul.f32 0.5, %v952_v41 }
 0x289   : > { %2497 = vst [vmem:[#allocation7_spill] sm:$0xff] %v2141_v26  ;;  %v1019_v42 = vand.u32 2147483647, %v2143_v31  ;;  %v1248_v53 = vmul.f32 1.442695, %v1231_v10  ;;  %1659 = vpow2.f32 %v1258_v32  ;;  %v2160_v12 = vpop.eup %1653  ;;  %v2173_v24 = vmul.f32 0.5, %v967_v4 }
 0x28a   : > { %v1221_v9 = vsub.f32 0.0, %v1013_v25  ;;  %2498 = vst [vmem:[#allocation8_spill] sm:$0xff] %v2146_v33  ;;  %v1029_v35 = vmul.f32 0.3275911, %v1013_v25  ;;  %v1008_v47 = vand.u32 2147483647, %v2146_v33  ;;  %1661 = vpow2.f32 %v1270_v44 }
 0x28b   : > { %v954_v34 = vpop.f32.mrf.mxu2  ;;  %v1227_v54 = vsub.f32 0.0, %v1019_v42  ;;  %2500 = vst [vmem:[#allocation10_spill] sm:$0xff] %v2160_v12  ;;  %1663 = vrcp.f32 %v1039_v50  ;;  %vm1323_vm0 = vcmp.ge.f32.partialorder %v2143_v31, 0.0 }
 0x28c   : > { %v955_v6 = vadd.f32 %v954_v34, %v769_v40  ;;  %v969_v30 = vpop.f32.mrf.mxu3  ;;  %v1237_v3 = vmul.f32 %v1221_v9, %v1013_v25  ;;  %v1035_v40 = vmul.f32 0.3275911, %v1019_v42  ;;  %v1216_v55 = vsub.f32 0.0, %v1008_v47  ;;  %2501 = vst [vmem:[#allocation11_spill] sm:$0xff] %v2164_v15 }
 0x28d   : > { %v941_v43 = vpop.f32.mrf.mxu0  ;;  %v970_v57 = vadd.f32 %v969_v30, %v2108_v38  ;;  %v1045_v1 = vadd.f32 1.0, %v1029_v35  ;;  %v1024_v13 = vmul.f32 0.3275911, %v1008_v47  ;;  %v1243_v16 = vmul.f32 %v1227_v54, %v1019_v42  ;;  %v2168_v17 = vpop.eup %1655 }
 0x28e   : > { %v2152_v0 = vmul.f32 0.70710677, %v955_v6  ;;  %v1260_v11 = vmul.f32 1.442695, %v1237_v3  ;;  %v2166_v52 = vadd.f32 %v941_v43, %v744_v61  ;;  %1665 = vpow2.f32 %v1248_v53  ;;  %v2171_v23 = vpop.eup %1657 }
 0x28f   : > { %v2162_v14 = vmul.f32 0.70710677, %v970_v57  ;;  %v1051_v56 = vadd.f32 1.0, %v1035_v40  ;;  %v1232_v19 = vmul.f32 %v1216_v55, %v1008_v47  ;;  %1667 = vrcp.f32 %v1045_v1  ;;  %v2178_v29 = vpop.eup %1659 }
 0x290   : > { %v1014_v2 = vand.u32 2147483647, %v2152_v0  ;;  %2502 = vst [vmem:[#allocation12_spill] sm:$0xff] %v2166_v52  ;;  %v2176_v41 = vmul.f32 0.70710677, %v2166_v52  ;;  %1669 = vpow2.f32 %v1260_v11  ;;  %v1040_v22 = vadd.f32 1.0, %v1024_v13  ;;  %v2182_v4 = vpop.eup %1661 }
 0x291   : > { %v1020_v20 = vand.u32 2147483647, %v2162_v14  ;;  %2504 = vst [vmem:[#allocation14_spill] sm:$0xff] %v2178_v29  ;;  %v1272_v10 = vmul.f32 1.442695, %v1243_v16  ;;  %1671 = vrcp.f32 %v1051_v56  ;;  %v2184_v3 = vmul.f32 0.5, %v955_v6  ;;  %v2187_v43 = vpop.eup %1663 }
 0x292   : > { %v1222_v62 = vsub.f32 0.0, %v1014_v2  ;;  %v1030_v25 = vmul.f32 0.3275911, %v1014_v2  ;;  %2503 = vst [vmem:[#allocation13_spill] sm:$0xff] %v2176_v41  ;;  %v1009_v30 = vand.u32 2147483647, %v2176_v41  ;;  %1673 = vrcp.f32 %v1040_v22 }
 0x293   : > { %v956_v38 = vpop.f32.mrf.mxu2  ;;  %v1228_v28 = vsub.f32 0.0, %v1020_v20  ;;  %v1036_v34 = vmul.f32 0.3275911, %v1020_v20  ;;  %v1250_v35 = vmul.f32 1.442695, %v1232_v19  ;;  %1675 = vpow2.f32 %v1272_v10 }
 0x294   : > { %v971_v37 = vpop.f32.mrf.mxu3  ;;  %v1238_v27 = vmul.f32 %v1222_v62, %v1014_v2  ;;  %v957_v32 = vadd.f32 %v956_v38, %v2121_v51  ;;  %v1046_v44 = vadd.f32 1.0, %v1030_v25  ;;  %v1217_v50 = vsub.f32 0.0, %v1009_v30  ;;  %v2191_v54 = vpop.eup %1665 }
 0x295   : > { %v944_v9 = vpop.f32.mrf.mxu0  ;;  %v972_v42 = vadd.f32 %v971_v37, %v2106_v36  ;;  %v1244_v47 = vmul.f32 %v1228_v28, %v1020_v20  ;;  %2505 = vst [vmem:[#allocation15_spill] sm:$0xff] %v2191_v54  ;;  %v2193_v51 = vmul.f32 0.5, %v970_v57  ;;  %v2197_v2 = vpop.eup %1667  ;;  %v1052_v6 = vadd.f32 1.0, %v1036_v34 }
 0x296   : > { %v2189_v53 = vmul.f32 0.70710677, %v957_v32  ;;  %v1262_v40 = vmul.f32 1.442695, %v1238_v27  ;;  %v1025_v36 = vmul.f32 0.3275911, %v1009_v30  ;;  %v2200_v11 = vpop.eup %1669  ;;  %1677 = vpow2.f32 %v1250_v35 }
 0x297   : > { %v2195_v55 = vmul.f32 0.70710677, %v972_v42  ;;  %2506 = vst [vmem:[#allocation16_spill] sm:$0xff] %v2200_v11  ;;  %v1233_v13 = vmul.f32 %v1217_v50, %v1009_v30  ;;  %v945_v16 = vadd.f32 %v944_v9, %v2138_v18  ;;  %1679 = vrcp.f32 %v1046_v44  ;;  %v2204_v19 = vpop.eup %1671 }
 0x298   : > { %v1015_v61 = vand.u32 2147483647, %v2189_v53  ;;  %v1274_v57 = vmul.f32 1.442695, %v1244_v47  ;;  %1681 = vpow2.f32 %v1262_v40  ;;  %v1041_v22 = vadd.f32 1.0, %v1025_v36  ;;  %v2209_v10 = vpop.eup %1673 }
 0x299   : > { %v1021_v62 = vand.u32 2147483647, %v2195_v55  ;;  %v2206_v37 = vmul.f32 0.70710677, %v945_v16  ;;  %1683 = vrcp.f32 %v1052_v6  ;;  %v1252_v34 = vmul.f32 1.442695, %v1233_v13  ;;  %v2212_v44 = vpop.eup %1675 }
 0x29a   : > { %v1031_v38 = vmul.f32 0.3275911, %v1015_v61  ;;  %v1223_v56 = vsub.f32 0.0, %v1015_v61  ;;  %1685 = vpow2.f32 %v1274_v57  ;;  %v2214_v47 = vmul.f32 0.5, %v957_v32 }
 0x29b   : > { %v959_v1 = vpop.f32.mrf.mxu2  ;;  %v1037_v20 = vmul.f32 0.3275911, %v1021_v62  ;;  %v1229_v25 = vsub.f32 0.0, %v1021_v62  ;;  %2507 = vst [vmem:[#allocation17_spill] sm:$0xff] %v2206_v37  ;;  %v1010_v30 = vand.u32 2147483647, %v2206_v37 }
 0x29c   : > { %v1239_v27 = vmul.f32 %v1223_v56, %v1015_v61  ;;  %v960_v28 = vadd.f32 %v959_v1, %v2114_v46  ;;  %v1047_v50 = vadd.f32 1.0, %v1031_v38  ;;  %v2218_v6 = vpop.eup %1677  ;;  %v2222_v13 = vmul.f32 0.5, %v972_v42 }
 0x29d   : > { %v1053_v18 = vadd.f32 1.0, %v1037_v20  ;;  %v1245_v9 = vmul.f32 %v1229_v25, %v1021_v62  ;;  %v946_v35 = vpop.f32.mrf.mxu0  ;;  %2508 = vst [vmem:[#allocation18_spill] sm:$0xff] %v2218_v6  ;;  %v1026_v46 = vmul.f32 0.3275911, %v1010_v30  ;;  %v1218_v61 = vsub.f32 0.0, %v1010_v30  ;;  %v2220_v1 = vpop.eup %1679 }
 0x29e   : > { %v2216_v40 = vmul.f32 0.70710677, %v960_v28  ;;  %v1264_v36 = vmul.f32 1.442695, %v1239_v27  ;;  %v2226_v57 = vadd.f32 %v946_v35, %v2112_v45  ;;  %v2228_v38 = vpop.eup %1681  ;;  %v2236_v60 = vmul.f32 0.5, %v945_v16 }
 0x29f   : > { %1687 = vrcp.f32 %v1053_v18  ;;  %v1276_v56 = vmul.f32 1.442695, %v1245_v9  ;;  %v1234_v20 = vmul.f32 %v1218_v61, %v1010_v30  ;;  %v2231_v27 = vpop.eup %1683  ;;  %v1042_v45 = vadd.f32 1.0, %v1026_v46 }
 0x2a0   : > { %1689 = vrcp.f32 %v1041_v22  ;;  %v1016_v62 = vand.u32 2147483647, %v2216_v40  ;;  %2509 = vst [vmem:[#allocation19_spill] sm:$0xff] %v2226_v57  ;;  %v2234_v42 = vmul.f32 0.70710677, %v2226_v57  ;;  %v2240_v49 = vpop.eup %1685  ;;  %vm1324_vm13 = vcmp.ge.f32.partialorder %v2162_v14, 0.0 }
 0x2a1   : > { %1691 = vpow2.f32 %v1252_v34  ;;  %2511 = vst [vmem:[#allocation21_spill] sm:$0xff] %v2236_v60  ;;  %v1254_v34 = vmul.f32 1.442695, %v1234_v20  ;;  %v1084_v16 = vmul.f32 1.0614054, %v2231_v27  ;;  %vm1325_vm14 = vcmp.ge.f32.partialorder %v2195_v55, 0.0 }
 0x2a2   : > { %1693 = vrcp.f32 %v1047_v50  ;;  %v1032_v18 = vmul.f32 0.3275911, %v1016_v62  ;;  %v1224_v22 = vsub.f32 0.0, %v1016_v62  ;;  %2510 = vst [vmem:[#allocation20_spill] sm:$0xff] %v2234_v42  ;;  %v2245_v50 = vmul.f32 0.5, %v960_v28 }
 0x2a3   : > { %v961_v32 = vpop.f32.mrf.mxu2  ;;  %1695 = vpow2.f32 %v1264_v36  ;;  %v1100_v54 = vadd.f32 -1.4531521, %v1084_v16  ;;  %v1082_v60 = vmul.f32 1.0614054, %v2171_v23  ;;  %v1083_v57 = vmul.f32 1.0614054, %v2204_v19 }
 0x2a4   : > { %v962_v25 = vadd.f32 %v961_v32, %v2110_v39  ;;  %v1048_v9 = vadd.f32 1.0, %v1032_v18  ;;  %v1240_v30 = vmul.f32 %v1224_v22, %v1016_v62  ;;  %v1011_v39 = vand.u32 2147483647, %v2234_v42  ;;  %v2522_v58 = vld [vmem:[#allocation18_spill] sm:$0xff] }
 0x2a5   : > { %v2243_v61 = vpop.eup %1687  ;;  %1697 = vpow2.f32 %v1276_v56  ;;  %v1099_v16 = vadd.f32 -1.4531521, %v1083_v57  ;;  %vm1320_vm1 = vcmp.ge.f32.partialorder %v2216_v40, 0.0  ;;  %vm1318_vm2 = vcmp.ge.f32.partialorder %v2152_v0, 0.0 }
 0x2a6   : > { %v2238_v35 = vmul.f32 0.70710677, %v962_v25  ;;  %v2249_v36 = vpop.eup %1689  ;;  %1699 = vrcp.f32 %v1048_v9  ;;  %v1266_v46 = vmul.f32 1.442695, %v1240_v30  ;;  %v1027_v5 = vmul.f32 0.3275911, %v1011_v39 }
 0x2a7   : > { %v1219_v8 = vsub.f32 0.0, %v1011_v39  ;;  %v2251_v20 = vpop.eup %1691  ;;  %1701 = vrcp.f32 %v1042_v45  ;;  %v1085_v22 = vmul.f32 1.0614054, %v2243_v61  ;;  %v2259_v41 = vmul.f32 0.5, %v962_v25 }
 0x2a8   : > { %v1017_v32 = vand.u32 2147483647, %v2238_v35  ;;  %2512 = vst [vmem:[#allocation22_spill] sm:$0xff] %v2251_v20  ;;  %v2254_v56 = vpop.eup %1693  ;;  %1703 = vpow2.f32 %v1254_v34  ;;  %v1043_v28 = vadd.f32 1.0, %v1027_v5  ;;  %v1116_v45 = vmul.f32 %v2231_v27, %v1100_v54 }
 0x2a9   : > { %v1235_v26 = vmul.f32 %v1219_v8, %v1011_v39  ;;  %v2256_v12 = vpop.eup %1695  ;;  %v1101_v30 = vadd.f32 -1.4531521, %v1085_v22  ;;  %1705 = vpow2.f32 %v1266_v46  ;;  %v1098_v5 = vadd.f32 -1.4531521, %v1082_v60 }
 0x2aa   : > { %v1033_v62 = vmul.f32 0.3275911, %v1017_v32  ;;  %v1225_v18 = vsub.f32 0.0, %v1017_v32  ;;  %v1078_v25 = vmul.f32 1.0614054, %v2220_v1  ;;  %v1115_v60 = vmul.f32 %v2204_v19, %v1099_v16 }
 0x2ab   : > { %v2263_v15 = vpop.eup %1697  ;;  %v2265_v34 = vmul.f32 1.442695, %v1235_v26  ;;  %v1117_v8 = vmul.f32 %v2243_v61, %v1101_v30  ;;  %vm1319_vm3 = vcmp.ge.f32.partialorder %v2189_v53, 0.0  ;;  %vm1321_vm4 = vcmp.ge.f32.partialorder %v2238_v35, 0.0 }
 0x2ac   : > { %v1049_v52 = vadd.f32 1.0, %v1033_v62  ;;  %v1241_v9 = vmul.f32 %v1225_v18, %v1017_v32  ;;  %v2268_v39 = vpop.eup %1699  ;;  %v1132_v32 = vadd.f32 1.4214138, %v1116_v45  ;;  %v1114_v18 = vmul.f32 %v2171_v23, %v1098_v5 }
 0x2ad   : > { %v2271_v46 = vpop.eup %1701  ;;  %v1133_v62 = vadd.f32 1.4214138, %v1117_v8  ;;  %v1080_v26 = vmul.f32 1.0614054, %v2268_v39  ;;  %v1094_v30 = vadd.f32 -1.4531521, %v1078_v25 }
 0x2ae   : > { %1707 = vrcp.f32 %v1049_v52  ;;  %v1268_v54 = vmul.f32 1.442695, %v1241_v9  ;;  %v2275_v22 = vpop.eup %1703  ;;  %v1148_v52 = vmul.f32 %v2231_v27, %v1132_v32  ;;  %v1130_v45 = vadd.f32 1.4214138, %v1114_v18 }
 0x2af   : > { %1709 = vrcp.f32 %v1043_v28  ;;  %2513 = vst [vmem:[#allocation23_spill] sm:$0xff] %v2275_v22  ;;  %v1079_v28 = vmul.f32 1.0614054, %v2254_v56  ;;  %v1149_v57 = vmul.f32 %v2243_v61, %v1133_v62  ;;  %v1096_v20 = vadd.f32 -1.4531521, %v1080_v26  ;;  %v2284_v8 = vpop.eup %1705 }
 0x2b0   : > { %v2282_v9 = vmul.f32 1.0614054, %v2168_v17  ;;  %v1164_v5 = vadd.f32 -0.28449672, %v1148_v52  ;;  %v1131_v6 = vadd.f32 1.4214138, %v1115_v60  ;;  %v1110_v33 = vmul.f32 %v2220_v1, %v1094_v30 }
 0x2b1   : > { %v1095_v7 = vadd.f32 -1.4531521, %v1079_v28  ;;  %v1165_v16 = vadd.f32 -0.28449672, %v1149_v57  ;;  %v1146_v22 = vmul.f32 %v2171_v23, %v1130_v45  ;;  %v1112_v25 = vmul.f32 %v2268_v39, %v1096_v20 }
 0x2b2   : > { %v2292_v62 = vmul.f32 1.0614054, %v2197_v2  ;;  %v1180_v26 = vmul.f32 %v2231_v27, %v1164_v5  ;;  %v1147_v52 = vmul.f32 %v2204_v19, %v1131_v6  ;;  %v1126_v45 = vadd.f32 1.4214138, %v1110_v33 }
 0x2b3   : > { %v1111_v28 = vmul.f32 %v2254_v56, %v1095_v7  ;;  %v1181_v30 = vmul.f32 %v2243_v61, %v1165_v16  ;;  %v1162_v57 = vadd.f32 -0.28449672, %v1146_v22  ;;  %v1128_v42 = vadd.f32 1.4214138, %v1112_v25 }
 0x2b4   : > { %v2287_v32 = vpop.eup %1707  ;;  %1711 = vpow2.f32 %v1268_v54  ;;  %v1196_v20 = vadd.f32 0.2548296, %v1180_v26  ;;  %v1163_v11 = vadd.f32 -0.28449672, %v1147_v52  ;;  %v1142_v54 = vmul.f32 %v2220_v1, %v1126_v45 }
 0x2b5   : > { %v2294_v18 = vpop.eup %1709  ;;  %v1081_v60 = vmul.f32 1.0614054, %v2287_v32  ;;  %v1197_v29 = vadd.f32 0.2548296, %v1181_v30  ;;  %v1178_v5 = vmul.f32 %v2171_v23, %v1162_v57  ;;  %v1144_v6 = vmul.f32 %v2268_v39, %v1128_v42 }
 0x2b6   : > { %v1127_v21 = vadd.f32 1.4214138, %v1111_v28  ;;  %v1212_v7 = vmul.f32 %v2231_v27, %v1196_v20  ;;  %v1179_v22 = vmul.f32 %v2204_v19, %v1163_v11  ;;  %v1158_v30 = vadd.f32 -0.28449672, %v1142_v54 }
 0x2b7   : > { %v1097_v37 = vadd.f32 -1.4531521, %v1081_v60  ;;  %v1213_v16 = vmul.f32 %v2243_v61, %v1197_v29  ;;  %v1194_v25 = vadd.f32 0.2548296, %v1178_v5  ;;  %v1160_v26 = vadd.f32 -0.28449672, %v1144_v6 }
 0x2b8   : > { %v1143_v52 = vmul.f32 %v2254_v56, %v1127_v21  ;;  %v1292_v42 = vmul.f32 %v2240_v49, %v1212_v7  ;;  %v1195_v60 = vadd.f32 0.2548296, %v1179_v22  ;;  %v1174_v49 = vmul.f32 %v2220_v1, %v1158_v30 }
 0x2b9   : > { %v1113_v33 = vmul.f32 %v2287_v32, %v1097_v37  ;;  %v1293_v11 = vmul.f32 %v2263_v15, %v1213_v16  ;;  %v1210_v37 = vmul.f32 %v2171_v23, %v1194_v25  ;;  %v1176_v27 = vmul.f32 %v2268_v39, %v1160_v26 }
 0x2ba   : > { %v1159_v29 = vadd.f32 -0.28449672, %v1143_v52  ;;  %v1712_v61 = vpop.eup %1711  ;;  %v1308_v57 = vsub.f32 1.0, %v1292_v42  ;;  %v1211_v21 = vmul.f32 %v2204_v19, %v1195_v60  ;;  %1713 = vpow2.f32 %v2265_v34 }
 0x2bb   : > { %v1129_v28 = vadd.f32 1.4214138, %v1113_v33  ;;  %v1309_v20 = vsub.f32 1.0, %v1293_v11  ;;  %v1290_v5 = vmul.f32 %v2182_v4, %v1210_v37  ;;  %v1192_v6 = vadd.f32 0.2548296, %v1176_v27 }
 0x2bc   : > { %v1175_v7 = vmul.f32 %v2254_v56, %v1159_v29  ;;  %v1340_v15 = vsub.f32 0.0, %v1308_v57  ;;  %v1291_v23 = vmul.f32 %v2212_v44, %v1211_v21  ;;  %v1190_v33 = vadd.f32 0.2548296, %v1174_v49 }
 0x2bd   : > { %v1145_v45 = vmul.f32 %v2287_v32, %v1129_v28  ;;  %v1341_v54 = vsub.f32 0.0, %v1309_v20  ;;  %v1306_v16 = vsub.f32 1.0, %v1290_v5  ;;  %v1208_v19 = vmul.f32 %v2268_v39, %v1192_v6 }
 0x2be   : > { %v1191_v25 = vadd.f32 0.2548296, %v1175_v7  ;;  %v1356_v4 = vsel %vm1324_vm13, %v1308_v57, %v1340_v15  ;;  %v1307_v26 = vsub.f32 1.0, %v1291_v23  ;;  %v1206_v42 = vmul.f32 %v2220_v1, %v1190_v33 }
 0x2bf   : > { %v1161_v22 = vadd.f32 -0.28449672, %v1145_v45  ;;  %v1357_v44 = vsel %vm1325_vm14, %v1309_v20, %v1341_v54  ;;  %v1372_v60 = vadd.f32 1.0, %v1356_v4  ;;  %v1338_v28 = vsub.f32 0.0, %v1306_v16 }
 0x2c0   : > { %v1288_v30 = vmul.f32 %v2284_v8, %v1208_v19  ;;  %v1373_v39 = vadd.f32 1.0, %v1357_v44  ;;  %v1339_v11 = vsub.f32 0.0, %v1307_v26  ;;  %v1207_v14 = vmul.f32 %v2254_v56, %v1191_v25  ;;  %v2369_v35 = vpop.eup %1713 }
 0x2c1   : > { %v1177_v52 = vmul.f32 %v2287_v32, %v1161_v22  ;;  %v1388_v27 = vmul.f32 %v1372_v60, %v2193_v51  ;;  %v1354_v1 = vsel %vm1322_vm15, %v1306_v16, %v1338_v28  ;;  %v1286_v29 = vmul.f32 %v2228_v38, %v1206_v42 }
 0x2c2   : > { %v1304_v55 = vsub.f32 1.0, %v1288_v30  ;;  %v1389_v57 = vmul.f32 %v1373_v39, %v2222_v13  ;;  %v1355_v8 = vsel %vm1323_vm0, %v1307_v26, %v1339_v11  ;;  %v1370_v21 = vadd.f32 1.0, %v1354_v1 }
 0x2c3   : > { %v1193_v37 = vadd.f32 0.2548296, %v1177_v52  ;;  %v1371_v49 = vadd.f32 1.0, %v1355_v8  ;;  %v1287_v20 = vmul.f32 %v2256_v12, %v1207_v14  ;;  %v1302_v5 = vsub.f32 1.0, %v1286_v29 }
 0x2c4   : > { %v1336_v56 = vsub.f32 0.0, %v1304_v55  ;;  %v1397_v51 = vpack.c.bf16 %v1389_v57, %v1388_v27  ;;  %v1386_v59 = vmul.f32 %v1370_v21, %v2158_v63  ;;  %v1092_v7 = vadd.f32 -1.4531521, %v2282_v9 }
 0x2c5   : > { %v1209_v45 = vmul.f32 %v2287_v32, %v1193_v37  ;;  %v1387_v38 = vmul.f32 %v1371_v49, %v2173_v24  ;;  %v1303_v13 = vsub.f32 1.0, %v1287_v20  ;;  %v1334_v15 = vsub.f32 0.0, %v1302_v5 }
 0x2c6   : > { %v1352_v31 = vsel %vm1320_vm1, %v1304_v55, %v1336_v56  ;;  %1410 = vmatpush.bf16.msra.mxu1 %v1397_v51  ;;  %1575 = vmatpush.bf16.msrb.mxu3 %v1397_v51  ;;  %v1093_v12 = vadd.f32 -1.4531521, %v2292_v62  ;;  %v1108_v22 = vmul.f32 %v2168_v17, %v1092_v7  ;;  %v1074_v24 = vmul.f32 1.0614054, %v2271_v46 }
 0x2c7   : > { %v1289_v6 = vmul.f32 %v1712_v61, %v1209_v45  ;;  %v1368_v23 = vadd.f32 1.0, %v1352_v31  ;;  %v1335_v63 = vsub.f32 0.0, %v1303_v13  ;;  %v1350_v9 = vsel %vm1318_vm2, %v1302_v5, %v1334_v15  ;;  %v2514_v31 = vld [vmem:[#allocation6_spill] sm:$0xff] }
 0x2c8   : > { %v1396_v40 = vpack.c.bf16 %v1387_v38, %v1386_v59  ;;  %v1366_v33 = vadd.f32 1.0, %v1350_v9  ;;  %v1109_v54 = vmul.f32 %v2197_v2, %v1093_v12  ;;  %v1124_v19 = vadd.f32 1.4214138, %v1108_v22 }
 0x2c9   : > { %v1305_v32 = vsub.f32 1.0, %v1289_v6  ;;  %v1351_v16 = vsel %vm1319_vm3, %v1303_v13, %v1335_v63  ;;  %v1075_v62 = vmul.f32 1.0614054, %v2294_v18  ;;  %v1090_v25 = vadd.f32 -1.4531521, %v1074_v24  ;;  %v2515_v24 = vld [vmem:[#allocation14_spill] sm:$0xff] }
 0x2ca   : > { %1411 = vmatpush.bf16.msra.mxu1 %v1396_v40  ;;  %1576 = vmatpush.bf16.msrb.mxu3 %v1396_v40  ;;  %v1384_v34 = vmul.f32 %v1368_v23, %v2245_v50  ;;  %v1367_v4 = vadd.f32 1.0, %v1351_v16  ;;  %v1125_v26 = vadd.f32 1.4214138, %v1109_v54  ;;  %v1140_v42 = vmul.f32 %v2168_v17, %v1124_v19  ;;  %v2516_v54 = vld [vmem:[#allocation17_spill] sm:$0xff]  ;;  %v2517_v16 = vld [vmem:[#allocation16_spill] sm:$0xff] }
 0x2cb   : > { %v1337_v61 = vsub.f32 0.0, %v1305_v32  ;;  %v1091_v44 = vadd.f32 -1.4531521, %v1075_v62  ;;  %v1106_v53 = vmul.f32 %v2271_v46, %v1090_v25  ;;  %v1382_v60 = vmul.f32 %v1366_v33, %v2184_v3 }
 0x2cc   : > { %v1141_v28 = vmul.f32 %v2197_v2, %v1125_v26  ;;  %v1072_v30 = vmul.f32 1.0614054, %v2209_v10  ;;  %v1073_v39 = vmul.f32 1.0614054, %v2249_v36  ;;  %v1156_v11 = vadd.f32 -0.28449672, %v1140_v42 }
 0x2cd   : > { %v1353_v0 = vsel %vm1321_vm4, %v1305_v32, %v1337_v61  ;;  %v1107_v37 = vmul.f32 %v2294_v18, %v1091_v44  ;;  %v1122_v14 = vadd.f32 1.4214138, %v1106_v53  ;;  %v1383_v27 = vmul.f32 %v1367_v4, %v2214_v47 }
 0x2ce   : > { %v1369_v52 = vadd.f32 1.0, %v1353_v0  ;;  %v1157_v1 = vadd.f32 -0.28449672, %v1141_v28  ;;  %v1088_v55 = vadd.f32 -1.4531521, %v1072_v30  ;;  %v1172_v57 = vmul.f32 %v2168_v17, %v1156_v11 }
 0x2cf   : > { %v1089_v29 = vadd.f32 -1.4531521, %v1073_v39  ;;  %v1123_v8 = vadd.f32 1.4214138, %v1107_v37  ;;  %v1138_v21 = vmul.f32 %v2271_v46, %v1122_v14  ;;  %v1070_v56 = vmul.f32 1.0614054, %v2154_v48 }
 0x2d0   : > { %v1385_v50 = vmul.f32 %v1369_v52, %v2259_v41  ;;  %v1173_v45 = vmul.f32 %v2197_v2, %v1157_v1  ;;  %v1104_v49 = vmul.f32 %v2209_v10, %v1088_v55  ;;  %v1188_v47 = vadd.f32 0.2548296, %v1172_v57  ;;  %v2518_v52 = vld [vmem:[#allocation20_spill] sm:$0xff]  ;;  %v2519_v39 = vld [vmem:[#allocation23_spill] sm:$0xff] }
 0x2d1   : > { %v1105_v41 = vmul.f32 %v2249_v36, %v1089_v29  ;;  %v1139_v20 = vmul.f32 %v2294_v18, %v1123_v8  ;;  %v1154_v5 = vadd.f32 -0.28449672, %v1138_v21  ;;  %v1071_v51 = vmul.f32 1.0614054, %v2187_v43  ;;  %v2520_v1 = vld [vmem:[#allocation8_spill] sm:$0xff] }
 0x2d2   : > { %v1395_v3 = vpack.c.bf16 %v1385_v50, %v1384_v34  ;;  %v1394_v59 = vpack.c.bf16 %v1383_v27, %v1382_v60  ;;  %v1189_v6 = vadd.f32 0.2548296, %v1173_v45  ;;  %v1120_v7 = vadd.f32 1.4214138, %v1104_v49 }
 0x2d3   : > { %v1121_v38 = vadd.f32 1.4214138, %v1105_v41  ;;  %vm1317_vm6 = vcmp.ge.f32.partialorder %v2514_v31, 0.0  ;;  %v1204_v13 = vmul.f32 %v2168_v17, %v1188_v47  ;;  %v1155_v15 = vadd.f32 -0.28449672, %v1139_v20  ;;  %v2521_v20 = vld [vmem:[#allocation9_spill] sm:$0xff] }
 0x2d4   : > { %1412 = vmatpush.bf16.msra.mxu1 %v1395_v3  ;;  %1577 = vmatpush.bf16.msrb.mxu3 %v1395_v3  ;;  %v1170_v32 = vmul.f32 %v2271_v46, %v1154_v5  ;;  %v1086_v23 = vadd.f32 -1.4531521, %v1070_v56  ;;  %v1205_v12 = vmul.f32 %v2197_v2, %v1189_v6  ;;  %v1136_v22 = vmul.f32 %v2209_v10, %v1120_v7  ;;  %v2524_v7 = vld [vmem:[#allocation11_spill] sm:$0xff] }
 0x2d5   : > { %v1137_v63 = vmul.f32 %v2249_v36, %v1121_v38  ;;  %v1087_v9 = vadd.f32 -1.4531521, %v1071_v51  ;;  %v1284_v40 = vmul.f32 %v2515_v24, %v1204_v13  ;;  %v1171_v61 = vmul.f32 %v2294_v18, %v1155_v15 }
 0x2d6   : > { %v1186_v33 = vadd.f32 0.2548296, %v1170_v32  ;;  %v1102_v17 = vmul.f32 %v2154_v48, %v1086_v23  ;;  %vm1314_vm8 = vcmp.ge.f32.partialorder %v2516_v54, 0.0  ;;  %v1285_v19 = vmul.f32 %v2517_v16, %v1205_v12  ;;  %v2526_v54 = vld [vmem:[#allocation13_spill] sm:$0xff] }
 0x2d7   : > { %v1152_v62 = vadd.f32 -0.28449672, %v1136_v22  ;;  %v1153_v2 = vadd.f32 -0.28449672, %v1137_v63  ;;  %v1103_v25 = vmul.f32 %v2187_v43, %v1087_v9  ;;  %v1300_v0 = vsub.f32 1.0, %v1284_v40  ;;  %v2525_v9 = vld [vmem:[#allocation19_spill] sm:$0xff] }
 0x2d8   : > { %1413 = vmatpush.bf16.msra.mxu1 %v1394_v59  ;;  %1578 = vmatpush.bf16.msrb.mxu3 %v1394_v59  ;;  %v1187_v34 = vadd.f32 0.2548296, %v1171_v61  ;;  %v1202_v4 = vmul.f32 %v2271_v46, %v1186_v33  ;;  %v1118_v26 = vadd.f32 1.4214138, %v1102_v17  ;;  %vm1315_vm9 = vcmp.ge.f32.partialorder %v2518_v52, 0.0  ;;  %v2523_v59 = vld [vmem:[#allocation22_spill] sm:$0xff] }
 0x2d9   : > { %v1301_v42 = vsub.f32 1.0, %v1285_v19  ;;  %v1168_v44 = vmul.f32 %v2209_v10, %v1152_v62  ;;  %v1169_v53 = vmul.f32 %v2249_v36, %v1153_v2  ;;  %v1119_v60 = vadd.f32 1.4214138, %v1103_v25  ;;  %v2527_v16 = vld [vmem:[#allocation21_spill] sm:$0xff]  ;;  %v2528_v25 = vld [vmem:[#allocation12_spill] sm:$0xff]  ;;  %v1715_v52 = vld [vmem:[%s2471_s1 + $0x8] sm:$0xff] }
 0x2da   : > { %v1332_v28 = vsub.f32 0.0, %v1300_v0  ;;  %v1203_v30 = vmul.f32 %v2294_v18, %v1187_v34  ;;  %v1282_v50 = vmul.f32 %v2519_v39, %v1202_v4  ;;  %v1134_v11 = vmul.f32 %v2154_v48, %v1118_v26 }
 0x2db   : > { %v1333_v37 = vsub.f32 0.0, %v1301_v42  ;;  %v1184_v14 = vadd.f32 0.2548296, %v1168_v44  ;;  %v1185_v27 = vadd.f32 0.2548296, %v1169_v53  ;;  %v1135_v46 = vmul.f32 %v2187_v43, %v1119_v60  ;;  %v2530_v60 = vld [vmem:[#allocation15_spill] sm:$0xff] }
 0x2dc   : > { %vm1312_vm10 = vcmp.ge.f32.partialorder %v2520_v1, 0.0  ;;  %v1348_v55 = vsel %vm1316_vm5, %v1300_v0, %v1332_v28  ;;  %v1283_v29 = vmul.f32 %v2369_v35, %v1203_v30  ;;  %v1298_v3 = vsub.f32 1.0, %v1282_v50  ;;  %v2531_v30 = vld [vmem:[#allocation7_spill] sm:$0xff]  ;;  %v825_v1 = vpop.permute.xlu0 %824 }
 0x2dd   : > { %v1150_v57 = vadd.f32 -0.28449672, %v1134_v11  ;;  %v1349_v18 = vsel %vm1317_vm6, %v1301_v42, %v1333_v37  ;;  %v1364_v8 = vadd.f32 1.0, %v1348_v55  ;;  %v1200_v21 = vmul.f32 %v2209_v10, %v1184_v14  ;;  %v1716_v42 = vld [vmem:[%s2471_s1] sm:$0xff]  ;;  %v1717_v11 = vld [vmem:[%s2471_s1 + $0x10] sm:$0xff]  ;;  %v823_v37 = vpop.permute.xlu2 %822 }
 0x2de   : > { %v1201_v45 = vmul.f32 %v2249_v36, %v1185_v27  ;;  %v1365_v49 = vadd.f32 1.0, %v1349_v18  ;;  %v1299_v41 = vsub.f32 1.0, %v1283_v29  ;;  %v1330_v56 = vsub.f32 0.0, %v1298_v3  ;;  %v2533_v18 = vld [vmem:[#allocation5_spill] sm:$0xff] }
 0x2df   : > { %v1151_v47 = vadd.f32 -0.28449672, %v1135_v46  ;;  %v1380_v5 = vmul.f32 %v1364_v8, %v2521_v20  ;;  %v1280_v51 = vmul.f32 %v2522_v58, %v1200_v21  ;;  %v1166_v6 = vmul.f32 %v2154_v48, %v1150_v57  ;;  %v2532_v57 = vld [vmem:[#allocation3_spill] sm:$0xff]  ;;  %v2535_v20 = vld [vmem:[#allocation4_spill] sm:$0xff] }
 0x2e0   : > { %v1281_v35 = vmul.f32 %v2523_v59, %v1201_v45  ;;  %v1381_v38 = vmul.f32 %v1365_v49, %v2524_v7  ;;  %v1331_v31 = vsub.f32 0.0, %v1299_v41  ;;  %v1346_v10 = vsel %vm1314_vm8, %v1298_v3, %v1330_v56  ;;  %v2534_v45 = vld [vmem:[#allocation2_spill] sm:$0xff]  ;;  %v1718_v59 = vld [vmem:[%s2471_s1 + $0x18] sm:$0xff] }
 0x2e1   : > { %v1167_v36 = vmul.f32 %v2187_v43, %v1151_v47  ;;  %v1362_v13 = vadd.f32 1.0, %v1346_v10  ;;  %v1296_v15 = vsub.f32 1.0, %v1280_v51  ;;  %v1182_v23 = vadd.f32 0.2548296, %v1166_v6 }
 0x2e2   : > { %v1297_v32 = vsub.f32 1.0, %v1281_v35  ;;  %v1393_v12 = vpack.c.bf16 %v1381_v38, %v1380_v5  ;;  %v1347_v22 = vsel %vm1315_vm9, %v1299_v41, %v1331_v31  ;;  %v979_v24 = vmul.f32 0.5, %v2525_v9  ;;  %v827_v31 = vpop.permute.xlu1 %826 }
 0x2e3   : > { %v1183_v63 = vadd.f32 0.2548296, %v1167_v36  ;;  %v1363_v40 = vadd.f32 1.0, %v1347_v22  ;;  %v1328_v61 = vsub.f32 0.0, %v1296_v15  ;;  %v1749_v17 = vmov 11   ;;  %v1569_v36 = vld [vmem:[%s2474_s4] sm:$0xff] }
 0x2e4   : > { %v1329_v33 = vsub.f32 0.0, %v1297_v32  ;;  %1642 = vset.pattern.permute.xlu1 %v1749_v17  ;;  %1641 = vset.pattern.permute.xlu0 %v1749_v17  ;;  %vm1313_vm11 = vcmp.ge.f32.partialorder %v2526_v54, 0.0  ;;  %v1378_v19 = vmul.f32 %v1362_v13, %v2527_v16  ;;  %v1198_v62 = vmul.f32 %v2154_v48, %v1182_v23  ;;  %v1570_v13 = vld [vmem:[%s2474_s4 + $0x8] sm:$0xff] }
 0x2e5   : > { %1414 = vmatpush.bf16.msra.mxu1 %v1393_v12  ;;  %1579 = vmatpush.bf16.msrb.mxu3 %v1393_v12  ;;  %v1199_v2 = vmul.f32 %v2187_v43, %v1183_v63  ;;  %v977_v0 = vmul.f32 0.5, %v2528_v25  ;;  %v1379_v34 = vmul.f32 %v1363_v40, %v979_v24  ;;  %v1344_v4 = vsel %vm1312_vm10, %v1296_v15, %v1328_v61  ;;  %v2529_v43 = vld [vmem:[#allocation10_spill] sm:$0xff]  ;;  %v829_v10 = vpop.permute.xlu2 %828 }
 0x2e6   : > { %v1345_v26 = vsel %vm1313_vm11, %v1297_v32, %v1329_v33  ;;  %811 = vperm.xlu1 %1642, %v1715_v52   ;;  %807 = vperm.xlu0 %1641, %v1716_v42   ;;  %v1360_v48 = vadd.f32 1.0, %v1344_v4  ;;  %v1278_v53 = vmul.f32 %v2529_v43, %v1198_v62  ;;  %v976_v39 = vmul.f32 0.5, %v2531_v30  ;;  %v1719_v33 = vld [vmem:[%s1805_s25] sm:$0xff] }
 0x2e7   : > { %v1361_v44 = vadd.f32 1.0, %v1345_v26  ;;  %v1279_v28 = vmul.f32 %v2530_v60, %v1199_v2  ;;  %1643 = vset.pattern.permute.xlu2 %v1749_v17  ;;  %v1392_v50 = vpack.c.bf16 %v1379_v34, %v1378_v19  ;;  %vm1310_vm12 = vcmp.ge.f32.partialorder %v2532_v57, 0.0  ;;  %v1720_v34 = vld [vmem:[%s1805_s25 + $0x10] sm:$0xff]  ;;  %v1722_v60 = vld [vmem:[%s1805_s25 + $0x18] sm:$0xff] }
 0x2e8   : > { %815 = vperm.xlu2 %1643, %v1717_v11   ;;  %v1294_v27 = vsub.f32 1.0, %v1278_v53  ;;  %v1376_v55 = vmul.f32 %v1360_v48, %v976_v39  ;;  %vm1311_vm13 = vcmp.ge.f32.partialorder %v2533_v18, 0.0  ;;  %v835_v21 = vmul.f32 %v1715_v52, %v825_v1  ;;  %v1721_v52 = vld [vmem:[%s1805_s25 + $0x8] sm:$0xff] }
 0x2e9   : > { %v1377_v14 = vmul.f32 %v1361_v44, %v977_v0  ;;  %v1295_v46 = vsub.f32 1.0, %v1279_v28  ;;  %1415 = vmatpush.bf16.msra.mxu1 %v1392_v50  ;;  %1580 = vmatpush.bf16.msrb.mxu3 %v1392_v50  ;;  %v974_v49 = vmul.f32 0.5, %v2534_v45  ;;  %v834_v47 = vmul.f32 %v1716_v42, %v823_v37 }
 0x2ea   : > { %v1326_v29 = vsub.f32 0.0, %v1294_v27  ;;  %v975_v5 = vmul.f32 0.5, %v2535_v20  ;;  %v1750_v35 = vmov 10   ;;  %v836_v15 = vmul.f32 %v1717_v11, %v827_v31 }
 0x2eb   : > { %v1327_v3 = vsub.f32 0.0, %v1295_v46  ;;  %v1391_v8 = vpack.c.bf16 %v1377_v14, %v1376_v55  ;;  %v837_v32 = vmul.f32 %v1718_v59, %v829_v10 }
 0x2ec   : > { %v1342_v41 = vsel %vm1310_vm12, %v1294_v27, %v1326_v29 }
 0x2ed   : > { %v1343_v56 = vsel %vm1311_vm13, %v1295_v46, %v1327_v3  ;;  %1416 = vmatpush.bf16.msra.mxu1 %v1391_v8  ;;  %1581 = vmatpush.bf16.msrb.mxu3 %v1391_v8  ;;  %v1358_v58 = vadd.f32 1.0, %v1342_v41 }
 0x2ee   : > { %v1359_v51 = vadd.f32 1.0, %v1343_v56  ;;  %819 = vperm.xlu1 %1642, %v1718_v59   ;;  %1645 = vset.pattern.permute.xlu0 %v1750_v35 }
 0x2ef   : > { %v1374_v6 = vmul.f32 %v1358_v58, %v974_v49  ;;  %845 = vperm.xlu0 %1645, %v835_v21  }
 0x2f0   : > { %v1375_v7 = vmul.f32 %v1359_v51, %v975_v5  ;;  %1644 = vset.pattern.permute.xlu2 %v1750_v35 }
 0x2f1   : > { %840 = vperm.xlu2 %1644, %v834_v47  }
 0x2f2   : > { %v1390_v38 = vpack.c.bf16 %v1375_v7, %v1374_v6 }
 0x2f4   : > { %1417 = vmatpush.bf16.msra.mxu1 %v1390_v38  ;;  %1582 = vmatpush.bf16.msrb.mxu3 %v1390_v38 }
 0x2f6   : > { %1646 = vset.pattern.permute.xlu1 %v1750_v35 }
 0x2f7   : > { %1418 = vmatmul.bf16.vlgmr.msra.gmra.mxu1 %v1569_v36  ;;  %1423 = vmatmul.bf16.vlgmr.msrb.gmra.mxu3 %v1570_v13 }
 0x2f8   : > { %850 = vperm.xlu1 %1646, %v836_v15  }
 0x2f9   : > { %855 = vperm.xlu2 %1644, %v837_v32  }
 0x342   : > { %v816_v12 = vpop.permute.xlu2 %815 }
 0x34b   : > { %v841_v40 = vpop.permute.xlu2 %840 }
 0x353   : > { %v856_v43 = vpop.permute.xlu2 %855 }
 0x358   : > { %v812_v23 = vpop.permute.xlu1 %811  ;;  %v808_v63 = vpop.permute.xlu0 %807 }
 0x360   : > { %v820_v22 = vpop.permute.xlu1 %819 }
 0x361   : > { %v846_v2 = vpop.permute.xlu0 %845 }
 0x36a   : > { %v851_v16 = vpop.permute.xlu1 %850 }
 0x374   : > { %v1419_v9 = vpop.f32.mrf.mxu1 }
 0x375   : > { %v1429_v24 = vmul.f32 %v1419_v9, %v808_v63 }
 0x377   : > { %v1433_v61 = vadd.f32 %v1429_v24, %v841_v40 }
 0x379   : > { %v1437_v17 = vadd.f32 %v1719_v33, %v1433_v61 }
 0x37a   : > { %v1424_v54 = vpop.f32.mrf.mxu3 }
 0x37b   : > { %1441 = vst.msk [vmem:[%s224_s15] sm:$0xff] %vm591_vm7, %v1437_v17  ;;  %v1431_v19 = vmul.f32 %v1424_v54, %v816_v12 }
 0x37c   : > { %v1421_v62 = vpop.f32.mrf.mxu1 }
 0x37d   : > { %v1435_v25 = vadd.f32 %v1431_v19, %v851_v16  ;;  %v1430_v0 = vmul.f32 %v1421_v62, %v812_v23 }
 0x37f   : > { %v1439_v4 = vadd.f32 %v1720_v34, %v1435_v25  ;;  %v1434_v26 = vadd.f32 %v1430_v0, %v846_v2 }
 0x381   : > { %1443 = vst.msk [vmem:[%s224_s15 + $0x10] sm:$0xff] %vm591_vm7, %v1439_v4  ;;  %v1438_v42 = vadd.f32 %v1721_v52, %v1434_v26 }
 0x382   : > { %v1426_v48 = vpop.f32.mrf.mxu3 }
 0x383   : > { %1442 = vst.msk [vmem:[%s224_s15 + $0x8] sm:$0xff] %vm591_vm7, %v1438_v42  ;;  %v1432_v44 = vmul.f32 %v1426_v48, %v820_v22 }
 0x385   : > { %v1436_v53 = vadd.f32 %v1432_v44, %v856_v43 }
 0x387   : > { %v1440_v28 = vadd.f32 %v1722_v60, %v1436_v53 }
 0x389   : > { %1444 = vst.msk [vmem:[%s224_s15 + $0x18] sm:$0xff] %vm591_vm7, %v1440_v28 }
 0x38a PF: > { %s15_s18 = sadd.s32 1, %s1729_s18  }
 0x38b   : > { %p12_p4 = scmp.ge.s32.totalorder %s15_s18, 4  }
 0x38d   :  { %14 = sbr.rel (!%p12_p4) target bundleno = 1 (0x1), region = 70 }

// kernel: tpu_custom_call.1
= control target key start
LH: loop header
LB: loop body
LE: loop exit
PB: predicated region body
PF: predicated region fallthrough
CT: control target
= control target key end

     0   :  { %s1781_s18 = smov 0   ;;  %s2470_s0 = inlined_call_operand.vmem [shape: f32[2,32,16], index: 0, kind: input, shape index: {}]   ;;  %s2471_s1 = inlined_call_operand.vmem [shape: f32[32,12], index: 1, kind: input, shape index: {}]   ;;  %s2472_s2 = inlined_call_operand.vmem [shape: f32[128,1], index: 2, kind: input, shape index: {}]   ;;  %s2473_s3 = inlined_call_operand.vmem [shape: bf16[128,32], index: 3, kind: input, shape index: {}]   ;;  %s2474_s4 = inlined_call_operand.vmem [shape: bf16[32,128], index: 4, kind: input, shape index: {}]   ;;  %s2475_s5 = inlined_call_operand.vmem [shape: f32[2,32,16], index: 5, kind: output, shape index: {}]  }
   0x1 LB: > { %s1500_s19 = sadd.s32 4294967295, %s1729_s18   ;;  %p1504_p0 = scmp.ge.s32.totalorder %s1729_s18, 1  ;;  %s1729_s18 = sphi %s1781_s18, %s15_s18  }
   0x2   : > { %p187_p1 = scmp.lt.s32.totalorder %s1729_s18, 3 }
   0x4   : > { %p188_p2 = pnand %p1504_p0, %p187_p1 }
   0x6   : > { %191 = sbr.rel (%p188_p2) target bundleno = 906 (0x38a), region = 40 }
   0xb   : > { %v1792_v0 = vld [vmem:[%s2471_s1] sm:$0xff]  ;;  %p215_p3 = scmp.lt.s32.totalorder %s1500_s19, 1  ;;  %v1731_v1 = vmov 1   ;;  %v1732_v2 = vmov 0   ;;  %s1733_s26 = smov 16   ;;  %v1734_v5 = vmov 2  }
   0xc   : > { %1613 = vset.pattern.permute.xlu2 %v1731_v1  ;;  %1612 = vset.pattern.permute.xlu1 %v1732_v2  ;;  %v1831_v8 = vld [vmem:[%s2471_s1 + $0x18] sm:$0xff]  ;;  %v1838_v9 = vld [vmem:[%s2471_s1 + $0x8] sm:$0xff]  ;;  %v1845_v10 = vld [vmem:[%s2471_s1 + $0x10] sm:$0xff]  ;;  %v1735_v11 = vmov 4   ;;  %v1736_v12 = vmov 5   ;;  %v1737_v13 = vmov 6  }
   0xd   : > { %313 = vperm.xlu2 %1613, %v1792_v0   ;;  %s2537_s19 = smov (!%p215_p3, %s1500_s19), 1  ;;  %1611 = vset.pattern.permute.xlu0 %v1732_v2  ;;  %v1738_v14 = vmov 3   ;;  %v1739_v16 = vmov 7   ;;  %vm236_vm0 = vcmask 1047680   ;;  %s1740_s8 = smov 114   ;;  %vm591_vm7 = vcmask 130048  }
   0xe   : > { %s1559_s22 = sshll.u32 %s2537_s19, 5  ;;  %s1741_s9 = smov 115   ;;  %vm900_vm12 = vcmask 261120  }
   0xf   : > { %s1805_s25 = scalar_lea.vmem %s2470_s0, %s1559_s22  ;;  %s1742_s10 = smov 113  }
  0x10   : > { %v1808_v3 = vld [vmem:[%s1805_s25 + $0x10] sm:$0xff]  ;;  %v1811_v4 = vld [vmem:[%s1805_s25] sm:$0xff]  ;;  %v1819_v6 = vld [vmem:[%s1805_s25 + $0x18] sm:$0xff]  ;;  %s1743_s11 = smov 127   ;;  %s1744_s12 = smov 126  }
  0x11   : > { %243 = vrot.lane.b32.xlu1 %v1808_v3, %s1733_s26  ;;  %237 = vrot.lane.b32.xlu0 %v1811_v4, %s1733_s26  ;;  %v1822_v7 = vld [vmem:[%s1805_s25 + $0x8] sm:$0xff]  ;;  %s1745_s13 = smov 125   ;;  %s224_s15 = scalar_lea.vmem %s2475_s5, %s1559_s22 }
  0x15   : > { %1615 = vset.pattern.permute.xlu2 %v1734_v5 }
  0x16   : > { %360 = vperm.xlu2 %1615, %v1792_v0  }
  0x19   : > { %246 = vrot.lane.b32.xlu1 %v1819_v6, %s1733_s26  ;;  %240 = vrot.lane.b32.xlu0 %v1822_v7, %s1733_s26 }
  0x1e   : > { %1617 = vset.pattern.permute.xlu2 %v1732_v2 }
  0x1f   : > { %278 = vperm.xlu2 %1617, %v1831_v8  }
  0x21   : > { %268 = vperm.xlu1 %1612, %v1838_v9   ;;  %263 = vperm.xlu0 %1611, %v1792_v0  }
  0x27   : > { %1618 = vset.pattern.permute.xlu2 %v1734_v5 }
  0x28   : > { %368 = vperm.xlu2 %1618, %v1845_v10  }
  0x29   : > { %1614 = vset.pattern.permute.xlu1 %v1731_v1  ;;  %273 = vperm.xlu0 %1611, %v1845_v10  }
  0x2a   : > { %317 = vperm.xlu1 %1614, %v1838_v9  }
  0x30   : > { %1620 = vset.pattern.permute.xlu2 %v1735_v11 }
  0x31   : > { %435 = vperm.xlu2 %1620, %v1838_v9   ;;  %1616 = vset.pattern.permute.xlu0 %v1734_v5 }
  0x32   : > { %321 = vperm.xlu1 %1614, %v1845_v10   ;;  %364 = vperm.xlu0 %1616, %v1838_v9  }
  0x39   : > { %1623 = vset.pattern.permute.xlu2 %v1736_v12 }
  0x3a   : > { %482 = vperm.xlu2 %1623, %v1838_v9   ;;  %325 = vperm.xlu1 %1614, %v1831_v8  }
  0x3b   : > { %372 = vperm.xlu0 %1616, %v1831_v8  }
  0x42   : > { %486 = vperm.xlu2 %1623, %v1845_v10   ;;  %1619 = vset.pattern.permute.xlu1 %v1735_v11 }
  0x43   : > { %1621 = vset.pattern.permute.xlu0 %v1735_v11  ;;  %431 = vperm.xlu1 %1619, %v1792_v0  }
  0x44   : > { %439 = vperm.xlu0 %1621, %v1845_v10  }
  0x4a   : > { %490 = vperm.xlu2 %1623, %v1831_v8  }
  0x4b   : > { %1622 = vset.pattern.permute.xlu1 %v1736_v12 }
  0x4c   : > { %1625 = vset.pattern.permute.xlu0 %v1737_v13  ;;  %478 = vperm.xlu1 %1622, %v1792_v0  }
  0x4d   : > { %525 = vperm.xlu0 %1625, %v1792_v0  }
  0x52   : > { %1627 = vset.pattern.permute.xlu2 %v1737_v13 }
  0x53   : > { %537 = vperm.xlu2 %1627, %v1831_v8  }
  0x54   : > { %1624 = vset.pattern.permute.xlu1 %v1735_v11 }
  0x55   : > { %1629 = vset.pattern.permute.xlu0 %v1738_v14  ;;  %443 = vperm.xlu1 %1624, %v1831_v8  }
  0x56   : > { %411 = vperm.xlu0 %1629, %v1838_v9  }
  0x5b   : > { %1628 = vset.pattern.permute.xlu2 %v1738_v14 }
  0x5c   : > { %407 = vperm.xlu2 %1628, %v1792_v0  }
  0x5d   : > { %1626 = vset.pattern.permute.xlu1 %v1737_v13 }
  0x5e   : > { %419 = vperm.xlu0 %1629, %v1831_v8   ;;  %529 = vperm.xlu1 %1626, %v1838_v9  }
  0x64   : > { %415 = vperm.xlu2 %1628, %v1845_v10  }
  0x66   : > { %533 = vperm.xlu1 %1626, %v1845_v10  }
  0x67   : > { %v314_v15 = vpop.permute.xlu2 %313 }
  0x6c   : > { %1631 = vset.pattern.permute.xlu2 %v1739_v16 }
  0x6d   : > { %576 = vperm.xlu2 %1631, %v1838_v9  }
  0x6e   : > { %1630 = vset.pattern.permute.xlu1 %v1739_v16 }
  0x6f   : > { %572 = vperm.xlu1 %1630, %v1792_v0  }
  0x70   : > { %v361_v17 = vpop.permute.xlu2 %360 }
  0x79   : > { %v1872_v18 = vpop.permute.xlu2 %278 }
  0x82   : > { %v1877_v22 = vpop.permute.xlu2 %368 }
  0x83   : > { %v244_v19 = vpop.permute.xlu1 %243  ;;  %v238_v20 = vpop.permute.xlu0 %237 }
  0x84   : > { %v239_v21 = vsel %vm236_vm0, %v238_v20, %v1811_v4  ;;  %v245_v28 = vsel %vm236_vm0, %v244_v19, %v1808_v3 }
  0x85   : > { %249 = vrot.lane.b32.xlu2 %v239_v21, %s1733_s26 }
  0x8b   : > { %v247_v23 = vpop.permute.xlu1 %246  ;;  %v241_v24 = vpop.permute.xlu0 %240 }
  0x8c   : > { %v248_v25 = vsel %vm236_vm0, %v247_v23, %v1819_v6  ;;  %v242_v26 = vsel %vm236_vm0, %v241_v24, %v1822_v7  ;;  %v436_v27 = vpop.permute.xlu2 %435 }
  0x8d   : > { %255 = vrot.lane.b32.xlu1 %v248_v25, %s1733_s26  ;;  %251 = vrot.lane.b32.xlu2 %v242_v26, %s1733_s26 }
  0x93   : > { %v269_v30 = vpop.permute.xlu1 %268  ;;  %v264_v43 = vpop.permute.xlu0 %263 }
  0x94   : > { %v483_v29 = vpop.permute.xlu2 %482 }
  0x95   : > { %253 = vrot.lane.b32.xlu2 %v245_v28, %s1733_s26 }
  0x9b   : > { %v274_v49 = vpop.permute.xlu0 %273 }
  0x9c   : > { %v1888_v31 = vpop.permute.xlu2 %486  ;;  %v318_v32 = vpop.permute.xlu1 %317 }
  0xa4   : > { %v1890_v33 = vpop.permute.xlu2 %490  ;;  %v322_v34 = vpop.permute.xlu1 %321 }
  0xa5   : > { %v365_v57 = vpop.permute.xlu0 %364 }
  0xac   : > { %v326_v36 = vpop.permute.xlu1 %325 }
  0xad   : > { %v1892_v35 = vpop.permute.xlu2 %537  ;;  %v373_v63 = vpop.permute.xlu0 %372 }
  0xb5   : > { %v432_v38 = vpop.permute.xlu1 %431 }
  0xb6   : > { %v1894_v37 = vpop.permute.xlu2 %407 }
  0xbe   : > { %v1896_v39 = vpop.permute.xlu2 %415  ;;  %v479_v40 = vpop.permute.xlu1 %478 }
  0xc7   : > { %v1898_v41 = vpop.permute.xlu2 %576  ;;  %v1900_v42 = vpop.permute.xlu1 %443 }
  0xd0   : > { %v530_v48 = vpop.permute.xlu1 %529 }
  0xd8   : > { %v534_v55 = vpop.permute.xlu1 %533 }
  0xdf   : > { %v250_v44 = vpop.permute.xlu2 %249 }
  0xe0   : > { %v257_v45 = vsel %vm236_vm0, %v250_v44, %v1811_v4 }
  0xe1   : > { %v328_v46 = vmul.f32 %v314_v15, %v257_v45  ;;  %v281_v47 = vmul.f32 %v264_v43, %v257_v45  ;;  %v375_v60 = vmul.f32 %v361_v17, %v257_v45  ;;  %v1914_v62 = vpop.permute.xlu1 %572  ;;  %v440_v15 = vpop.permute.xlu0 %439  ;;  %v446_v23 = vmul.f32 %v432_v38, %v257_v45 }
  0xe3   : > { %339 = vrot.lane.b32.xlu2 %v328_v46, %s1740_s8  ;;  %292 = vrot.lane.b32.xlu0 %v281_v47, %s1741_s9 }
  0xe7   : > { %v252_v50 = vpop.permute.xlu2 %251 }
  0xe8   : > { %v258_v51 = vsel %vm236_vm0, %v252_v50, %v1822_v7  ;;  %v234_v50 = vlaneseq }
  0xe9   : > { %v282_v52 = vmul.f32 %v269_v30, %v258_v51  ;;  %v329_v53 = vmul.f32 %v318_v32, %v258_v51  ;;  %v541_v54 = vmul.f32 %v530_v48, %v258_v51  ;;  %v376_v1 = vmul.f32 %v365_v57, %v258_v51  ;;  %v526_v20 = vpop.permute.xlu0 %525 }
  0xea   : > { %v447_v16 = vmul.f32 %v436_v27, %v258_v51  ;;  %v494_v17 = vmul.f32 %v483_v29, %v258_v51  ;;  %v540_v21 = vmul.f32 %v526_v20, %v257_v45  ;;  %v1746_v29 = vmov 8  }
  0xeb   : > { %294 = vrot.lane.b32.xlu1 %v282_v52, %s1741_s9  ;;  %341 = vrot.lane.b32.xlu0 %v329_v53, %s1740_s8  ;;  %v1945_v52 = vand.u32 127, %v234_v50 }
  0xec   : > { %1632 = vset.pattern.permute.xlu0 %v1746_v29 }
  0xed   : > { %vm285_vm1 = vcmp.ge.s32.totalorder %v1945_v52, 3  ;;  %vm332_vm2 = vcmp.ge.s32.totalorder %v1945_v52, 2  ;;  %vm379_vm3 = vcmp.ge.s32.totalorder %v1945_v52, 1  ;;  %vm450_vm4 = vcmp.lt.s32.totalorder %v1945_v52, 15 }
  0xee   : > { %vm497_vm5 = vcmp.lt.s32.totalorder %v1945_v52, 14  ;;  %vm544_vm6 = vcmp.lt.s32.totalorder %v1945_v52, 13 }
  0xef   : > { %v254_v56 = vpop.permute.xlu2 %253 }
  0xf0   : > { %v259_v58 = vsel %vm236_vm0, %v254_v56, %v1808_v3 }
  0xf1   : > { %v330_v59 = vmul.f32 %v322_v34, %v259_v58  ;;  %v283_v61 = vmul.f32 %v274_v49, %v259_v58  ;;  %v377_v19 = vmul.f32 %v1877_v22, %v259_v58  ;;  %v495_v24 = vmul.f32 %v1888_v31, %v259_v58  ;;  %v1934_v30 = vpop.permute.xlu0 %411 }
  0xf2   : > { %v542_v25 = vmul.f32 %v534_v55, %v259_v58  ;;  %v448_v26 = vmul.f32 %v440_v15, %v259_v58  ;;  %v1747_v31 = vmov 9   ;;  %v422_v15 = vmul.f32 %v1894_v37, %v1811_v4 }
  0xf3   : > { %343 = vrot.lane.b32.xlu2 %v330_v59, %s1740_s8  ;;  %386 = vrot.lane.b32.xlu0 %v375_v60, %s1742_s10  ;;  %v423_v4 = vmul.f32 %v1934_v30, %v1822_v7 }
  0xf4   : > { %296 = vrot.lane.b32.xlu1 %v283_v61, %s1741_s9 }
  0xf9   : > { %v420_v32 = vpop.permute.xlu0 %419 }
  0xfc   : > { %388 = vrot.lane.b32.xlu1 %v376_v1, %s1742_s10 }
  0xff   : > { %v256_v5 = vpop.permute.xlu1 %255 }
 0x100   : > { %v260_v11 = vsel %vm236_vm0, %v256_v5, %v1819_v6 }
 0x101   : > { %v331_v12 = vmul.f32 %v326_v36, %v260_v11  ;;  %v284_v13 = vmul.f32 %v1872_v18, %v260_v11  ;;  %v378_v14 = vmul.f32 %v373_v63, %v260_v11  ;;  %v493_v18 = vmul.f32 %v479_v40, %v257_v45 }
 0x102   : > { %v496_v22 = vmul.f32 %v1890_v33, %v260_v11  ;;  %v543_v27 = vmul.f32 %v1892_v35, %v260_v11  ;;  %v449_v28 = vmul.f32 %v1900_v42, %v260_v11 }
 0x103   : > { %345 = vrot.lane.b32.xlu2 %v331_v12, %s1740_s8  ;;  %392 = vrot.lane.b32.xlu0 %v378_v14, %s1742_s10 }
 0x104   : > { %298 = vrot.lane.b32.xlu1 %v284_v13, %s1741_s9 }
 0x10b   : > { %459 = vrot.lane.b32.xlu2 %v447_v16, %s1743_s11  ;;  %506 = vrot.lane.b32.xlu0 %v494_v17, %s1744_s12 }
 0x10c   : > { %390 = vrot.lane.b32.xlu1 %v377_v19, %s1742_s10 }
 0x113   : > { %504 = vrot.lane.b32.xlu2 %v493_v18, %s1744_s12  ;;  %551 = vrot.lane.b32.xlu0 %v540_v21, %s1745_s13 }
 0x114   : > { %457 = vrot.lane.b32.xlu1 %v446_v23, %s1743_s11 }
 0x11b   : > { %508 = vrot.lane.b32.xlu2 %v495_v24, %s1744_s12  ;;  %555 = vrot.lane.b32.xlu0 %v542_v25, %s1745_s13 }
 0x11c   : > { %461 = vrot.lane.b32.xlu1 %v448_v26, %s1743_s11  ;;  %v425_v26 = vmul.f32 %v420_v32, %v1819_v6 }
 0x123   : > { %510 = vrot.lane.b32.xlu2 %v496_v22, %s1744_s12  ;;  %557 = vrot.lane.b32.xlu0 %v543_v27, %s1745_s13 }
 0x124   : > { %463 = vrot.lane.b32.xlu1 %v449_v28, %s1743_s11 }
 0x12b   : > { %584 = vperm.xlu2 %1631, %v1831_v8   ;;  %659 = vperm.xlu0 %1632, %v1845_v10  }
 0x12c   : > { %553 = vrot.lane.b32.xlu1 %v541_v54, %s1745_s13 }
 0x133   : > { %1634 = vset.pattern.permute.xlu2 %v1747_v31  ;;  %655 = vperm.xlu0 %1632, %v1838_v9  }
 0x134   : > { %580 = vperm.xlu1 %1630, %v1845_v10   ;;  %679 = vperm.xlu2 %1634, %v1845_v10  }
 0x13b   : > { %1638 = vset.pattern.permute.xlu0 %v1732_v2 }
 0x13c   : > { %1633 = vset.pattern.permute.xlu1 %v1746_v29  ;;  %1636 = vset.pattern.permute.xlu2 %v1746_v29 }
 0x13d   : > { %663 = vperm.xlu1 %1633, %v1831_v8   ;;  %651 = vperm.xlu2 %1636, %v1792_v0   ;;  %v340_v35 = vpop.permute.xlu2 %339 }
 0x13e   : > { %v351_v55 = vsel %vm332_vm2, %v340_v35, 0.0 }
 0x145   : > { %1635 = vset.pattern.permute.xlu1 %v1747_v31  ;;  %1637 = vset.pattern.permute.xlu2 %v1747_v31  ;;  %v424_v31 = vmul.f32 %v1896_v39, %v1808_v3 }
 0x146   : > { %683 = vperm.xlu1 %1635, %v1831_v8   ;;  %675 = vperm.xlu2 %1637, %v1838_v9  }
 0x14d   : > { %v344_v40 = vpop.permute.xlu2 %343 }
 0x14e   : > { %671 = vperm.xlu1 %1635, %v1792_v0   ;;  %1640 = vset.pattern.permute.xlu2 %v1732_v2  ;;  %v353_v16 = vsel %vm332_vm2, %v344_v40, 0.0 }
 0x155   : > { %v293_v33 = vpop.permute.xlu0 %292 }
 0x156   : > { %1639 = vset.pattern.permute.xlu1 %v1732_v2  ;;  %v304_v54 = vsel %vm285_vm1, %v293_v33, 0.0 }
 0x157   : > { %v355_v59 = vadd.f32 %v351_v55, %v304_v54 }
 0x15d   : > { %v295_v34 = vpop.permute.xlu1 %294  ;;  %v342_v36 = vpop.permute.xlu0 %341 }
 0x15e   : > { %v346_v44 = vpop.permute.xlu2 %345  ;;  %v305_v60 = vsel %vm285_vm1, %v295_v34, 0.0  ;;  %v352_v61 = vsel %vm332_vm2, %v342_v36, 0.0 }
 0x15f   : > { %v354_v63 = vsel %vm332_vm2, %v346_v44, 0.0  ;;  %v356_v13 = vadd.f32 %v352_v61, %v305_v60 }
 0x165   : > { %v387_v43 = vpop.permute.xlu0 %386 }
 0x166   : > { %v297_v38 = vpop.permute.xlu1 %296  ;;  %v460_v47 = vpop.permute.xlu2 %459  ;;  %v398_v56 = vsel %vm379_vm3, %v387_v43, 0.0 }
 0x167   : > { %v402_v1 = vadd.f32 %v398_v56, %v355_v59  ;;  %v306_v14 = vsel %vm285_vm1, %v297_v38, 0.0  ;;  %v470_v33 = vsel %vm450_vm4, %v460_v47, 0.0 }
 0x168   : > { %v357_v18 = vadd.f32 %v353_v16, %v306_v14 }
 0x169   : > { %v426_v24 = vadd.f32 %v422_v15, %v402_v1 }
 0x16e   : > { %v389_v42 = vpop.permute.xlu1 %388  ;;  %v505_v53 = vpop.permute.xlu2 %504 }
 0x16f   : > { %v399_v5 = vsel %vm379_vm3, %v389_v42, 0.0  ;;  %v516_v7 = vsel %vm497_vm5, %v505_v53, 0.0 }
 0x170   : > { %v403_v17 = vadd.f32 %v399_v5, %v356_v13 }
 0x172   : > { %v427_v28 = vadd.f32 %v423_v4, %v403_v17 }
 0x174   : > { %v474_v3 = vadd.f32 %v470_v33, %v427_v28 }
 0x175   : > { %v393_v46 = vpop.permute.xlu0 %392 }
 0x176   : > { %v299_v45 = vpop.permute.xlu1 %298  ;;  %v509_v11 = vpop.permute.xlu2 %508  ;;  %v401_v19 = vsel %vm379_vm3, %v393_v46, 0.0 }
 0x177   : > { %v307_v57 = vsel %vm285_vm1, %v299_v45, 0.0  ;;  %v1748_v45 = vmov 32.0   ;;  %v518_v50 = vsel %vm497_vm5, %v509_v11, 0.0 }
 0x178   : > { %v358_v12 = vadd.f32 %v354_v63, %v307_v57  ;;  %1647 = vrcp.f32 %v1748_v45 }
 0x17a   : > { %v405_v23 = vadd.f32 %v401_v19, %v358_v12 }
 0x17c   : > { %v429_v34 = vadd.f32 %v425_v26, %v405_v23 }
 0x17d   : > { %v507_v49 = vpop.permute.xlu0 %506 }
 0x17e   : > { %v391_v48 = vpop.permute.xlu1 %390  ;;  %v517_v6 = vsel %vm497_vm5, %v507_v49, 0.0  ;;  %v511_v32 = vpop.permute.xlu2 %510 }
 0x17f   : > { %v400_v20 = vsel %vm379_vm3, %v391_v48, 0.0  ;;  %v519_v40 = vsel %vm497_vm5, %v511_v32, 0.0  ;;  %v521_v42 = vadd.f32 %v517_v6, %v474_v3  ;;  %v1648_v57 = vpop.eup %1647  ;;  %v725_v32 = vld [vmem:[%s2472_s2 + $0x78] sm:$0xff] }
 0x180   : > { %v404_v22 = vadd.f32 %v400_v20, %v357_v18  ;;  %v606_v11 = vmul.f32 32.0, %v1648_v57  ;;  %vm610_vm8 = vweird.f32 %v1648_v57  ;;  %803 = vperm.xlu1 %1639, %v725_v32   ;;  %v1563_v32 = vld [vmem:[%s2473_s3 + $0x10] sm:$0xff] }
 0x182   : > { %v428_v36 = vadd.f32 %v424_v31, %v404_v22  ;;  %v607_v15 = vsub.f32 1.0, %v606_v11 }
 0x184   : > { %v608_v17 = vmul.f32 %v1648_v57, %v607_v15 }
 0x185   : > { %v552_v2 = vpop.permute.xlu0 %551 }
 0x186   : > { %v458_v51 = vpop.permute.xlu1 %457  ;;  %v563_v43 = vsel %vm544_vm6, %v552_v2, 0.0  ;;  %v585_v61 = vpop.permute.xlu2 %584 }
 0x187   : > { %v469_v21 = vsel %vm450_vm4, %v458_v51, 0.0 }
 0x188   : > { %v473_v27 = vadd.f32 %v469_v21, %v426_v24  ;;  %v609_v21 = vadd.f32 %v1648_v57, %v608_v17 }
 0x18a   : > { %v520_v35 = vadd.f32 %v516_v7, %v473_v27  ;;  %v611_v24 = vsel %vm610_vm8, %v1648_v57, %v609_v21 }
 0x18c   : > { %v567_v46 = vadd.f32 %v563_v43, %v520_v35  ;;  %v724_v35 = vld [vmem:[%s2472_s2 + $0x70] sm:$0xff]  ;;  %v721_v43 = vld [vmem:[%s2472_s2 + $0x58] sm:$0xff] }
 0x18d   : > { %v556_v25 = vpop.permute.xlu0 %555  ;;  %798 = vperm.xlu0 %1638, %v724_v35   ;;  %v1566_v35 = vld [vmem:[%s2473_s3 + $0x28] sm:$0xff] }
 0x18e   : > { %v462_v58 = vpop.permute.xlu1 %461  ;;  %v587_v2 = vadd.f32 %v1914_v62, %v567_v46 }
 0x18f   : > { %v471_v30 = vsel %vm450_vm4, %v462_v58, 0.0  ;;  %v565_v58 = vsel %vm544_vm6, %v556_v25, 0.0 }
 0x190   : > { %v475_v39 = vadd.f32 %v471_v30, %v428_v36  ;;  %v592_v1 = vsel %vm591_vm7, %v587_v2, 0.0 }
 0x192   : > { %v522_v53 = vadd.f32 %v518_v50, %v475_v39 }
 0x194   : > { %v569_v59 = vadd.f32 %v565_v58, %v522_v53  ;;  %v680_v53 = vpop.permute.xlu2 %679 }
 0x195   : > { %v558_v48 = vpop.permute.xlu0 %557  ;;  %783 = vperm.xlu0 %1638, %v721_v43  }
 0x196   : > { %v464_v37 = vpop.permute.xlu1 %463  ;;  %v566_v54 = vsel %vm544_vm6, %v558_v48, 0.0  ;;  %v718_v48 = vld [vmem:[%s2472_s2 + $0x40] sm:$0xff] }
 0x197   : > { %v472_v29 = vsel %vm450_vm4, %v464_v37, 0.0 }
 0x198   : > { %v476_v38 = vadd.f32 %v472_v29, %v429_v34 }
 0x19a   : > { %v523_v47 = vadd.f32 %v519_v40, %v476_v38 }
 0x19c   : > { %v570_v56 = vadd.f32 %v566_v54, %v523_v47 }
 0x19e   : > { %v554_v44 = vpop.permute.xlu1 %553  ;;  %v590_v5 = vadd.f32 %v585_v61, %v570_v56  ;;  %v712_v61 = vld [vmem:[%s2472_s2 + $0x10] sm:$0xff] }
 0x19f   : > { %v564_v49 = vsel %vm544_vm6, %v554_v44, 0.0 }
 0x1a0   : > { %v568_v51 = vadd.f32 %v564_v49, %v521_v42  ;;  %v597_v14 = vsel %vm591_vm7, %v590_v5, 0.0  ;;  %v723_v42 = vld [vmem:[%s2472_s2 + $0x68] sm:$0xff]  ;;  %v716_v49 = vld [vmem:[%s2472_s2 + $0x30] sm:$0xff] }
 0x1a1   : > { %793 = vperm.xlu1 %1639, %v723_v42   ;;  %758 = vperm.xlu0 %1638, %v716_v49  }
 0x1a2   : > { %v588_v55 = vadd.f32 %v1898_v41, %v568_v51 }
 0x1a4   : > { %v593_v60 = vsel %vm591_vm7, %v588_v55, 0.0 }
 0x1a5   : > { %v594_v13 = vadd.f32 %v593_v60, %v592_v1  ;;  %v652_v60 = vpop.permute.xlu2 %651 }
 0x1a6   : > { %v581_v63 = vpop.permute.xlu1 %580 }
 0x1a7   : > { %v589_v12 = vadd.f32 %v581_v63, %v569_v59  ;;  %v660_v59 = vpop.permute.xlu0 %659  ;;  %v710_v63 = vld [vmem:[%s2472_s2] sm:$0xff] }
 0x1a9   : > { %v595_v41 = vsel %vm591_vm7, %v589_v12, 0.0  ;;  %768 = vperm.xlu1 %1639, %v718_v48  }
 0x1aa   : > { %v596_v62 = vadd.f32 %v595_v41, %v594_v13 }
 0x1ac   : > { %v598_v16 = vadd.f32 %v597_v14, %v596_v62 }
 0x1ae   : > { %v599_v52 = vrot.slane %v598_v16, 4 }
 0x1af   : > { %v664_v54 = vpop.permute.xlu1 %663  ;;  %v656_v17 = vpop.permute.xlu0 %655 }
 0x1b0   : > { %v600_v19 = vadd.f32 %v599_v52, %v598_v16  ;;  %v711_v16 = vld [vmem:[%s2472_s2 + $0x8] sm:$0xff]  ;;  %v722_v52 = vld [vmem:[%s2472_s2 + $0x60] sm:$0xff] }
 0x1b1   : > { %788 = vperm.xlu2 %1640, %v722_v52  }
 0x1b2   : > { %v601_v20 = vrot.slane %v600_v19, 2 }
 0x1b4   : > { %v602_v18 = vadd.f32 %v601_v20, %v600_v19  ;;  %v676_v19 = vpop.permute.xlu2 %675 }
 0x1b6   : > { %v603_v23 = vrot.slane %v602_v18, 1 }
 0x1b8   : > { %v604_v25 = vadd.f32 %v603_v23, %v602_v18 }
 0x1ba   : > { %v612_v4 = vmul.f32 %v611_v24, %v604_v25 }
 0x1bc   : > { %v613_v37 = vsub.f32 %v587_v2, %v612_v4  ;;  %v614_v26 = vsub.f32 %v588_v55, %v612_v4  ;;  %v615_v22 = vsub.f32 %v589_v12, %v612_v4  ;;  %v616_v27 = vsub.f32 %v590_v5, %v612_v4  ;;  %v717_v55 = vld [vmem:[%s2472_s2 + $0x38] sm:$0xff]  ;;  %v715_v2 = vld [vmem:[%s2472_s2 + $0x28] sm:$0xff]  ;;  %v684_v5 = vpop.permute.xlu1 %683 }
 0x1bd   : > { %763 = vperm.xlu1 %1639, %v717_v55   ;;  %753 = vperm.xlu0 %1638, %v715_v2  }
 0x1be   : > { %v617_v28 = vmul.f32 %v613_v37, %v613_v37  ;;  %v618_v29 = vmul.f32 %v614_v26, %v614_v26  ;;  %v619_v31 = vmul.f32 %v615_v22, %v615_v22  ;;  %v620_v7 = vmul.f32 %v616_v27, %v616_v27 }
 0x1c0   : > { %v621_v33 = vsel %vm591_vm7, %v617_v28, 0.0  ;;  %v622_v34 = vsel %vm591_vm7, %v618_v29, 0.0  ;;  %v624_v30 = vsel %vm591_vm7, %v619_v31, 0.0  ;;  %v626_v38 = vsel %vm591_vm7, %v620_v7, 0.0  ;;  %v1561_v28 = vld [vmem:[%s2473_s3] sm:$0xff]  ;;  %v1567_v29 = vld [vmem:[%s2473_s3 + $0x30] sm:$0xff] }
 0x1c1   : > { %v623_v6 = vadd.f32 %v622_v34, %v621_v33  ;;  %v719_v31 = vld [vmem:[%s2472_s2 + $0x48] sm:$0xff]  ;;  %v1565_v34 = vld [vmem:[%s2473_s3 + $0x20] sm:$0xff]  ;;  %v1568_v7 = vld [vmem:[%s2473_s3 + $0x38] sm:$0xff] }
 0x1c2   : > { %v1562_v33 = vld [vmem:[%s2473_s3 + $0x8] sm:$0xff] }
 0x1c3   : > { %v625_v36 = vadd.f32 %v624_v30, %v623_v6  ;;  %v714_v6 = vld [vmem:[%s2472_s2 + $0x20] sm:$0xff]  ;;  %v713_v30 = vld [vmem:[%s2472_s2 + $0x18] sm:$0xff] }
 0x1c5   : > { %v627_v3 = vadd.f32 %v626_v38, %v625_v36  ;;  %738 = vperm.xlu1 %1639, %v712_v61   ;;  %728 = vperm.xlu0 %1638, %v710_v63  }
 0x1c7   : > { %v628_v39 = vrot.slane %v627_v3, 4 }
 0x1c9   : > { %v629_v40 = vadd.f32 %v628_v39, %v627_v3 }
 0x1cb   : > { %v630_v44 = vrot.slane %v629_v40, 2 }
 0x1cd   : > { %v631_v45 = vadd.f32 %v630_v44, %v629_v40  ;;  %733 = vperm.xlu1 %1639, %v711_v16   ;;  %824 = vrot.lane.b32.xlu0 %v1838_v9, %s1743_s11  ;;  %v1564_v9 = vld [vmem:[%s2473_s3 + $0x18] sm:$0xff] }
 0x1cf   : > { %v632_v46 = vrot.slane %v631_v45, 1 }
 0x1d1   : > { %v633_v47 = vadd.f32 %v632_v46, %v631_v45 }
 0x1d3   : > { %v634_v50 = vmul.f32 %v633_v47, %v611_v24  ;;  %v672_v24 = vpop.permute.xlu1 %671 }
 0x1d5   : > { %v635_v51 = vadd.f32 1e-06, %v634_v50  ;;  %826 = vrot.lane.b32.xlu1 %v1845_v10, %s1743_s11  ;;  %v720_v10 = vld [vmem:[%s2472_s2 + $0x50] sm:$0xff] }
 0x1d6   : > { %778 = vperm.xlu2 %1640, %v720_v10  }
 0x1d7   : > { %1649 = vrsqrt.f32 %v635_v51  ;;  %vm642_vm10 = vweird.f32 %v635_v51 }
 0x1dd   : > { %v1650_v56 = vpop.eup %1649 }
 0x1de   : > { %v637_v57 = vmul.f32 %v1650_v56, %v635_v51  ;;  %vm643_vm9 = vweird.f32 %v1650_v56  ;;  %773 = vperm.xlu2 %1640, %v719_v31  }
 0x1df   : > { %vm644_vm11 = vmor %vm642_vm10, %vm643_vm9 }
 0x1e0   : > { %v638_v58 = vmul.f32 %v1650_v56, %v637_v57 }
 0x1e2   : > { %v639_v1 = vmul.f32 0.5, %v638_v58 }
 0x1e4   : > { %v640_v11 = vsub.f32 1.5, %v639_v1 }
 0x1e6   : > { %v641_v12 = vmul.f32 %v1650_v56, %v640_v11  ;;  %748 = vperm.xlu2 %1640, %v714_v6  }
 0x1e8   : > { %v645_v13 = vsel %vm644_vm11, %v1650_v56, %v641_v12 }
 0x1e9   : > { %v649_v41 = vmul.f32 %v645_v13, %v616_v27  ;;  %v648_v62 = vmul.f32 %v645_v13, %v615_v22  ;;  %v646_v14 = vmul.f32 %v645_v13, %v613_v37  ;;  %v647_v15 = vmul.f32 %v645_v13, %v614_v26 }
 0x1eb   : > { %v669_v20 = vmul.f32 %v664_v54, %v649_v41  ;;  %v668_v21 = vmul.f32 %v660_v59, %v648_v62  ;;  %v666_v18 = vmul.f32 %v652_v60, %v646_v14  ;;  %v667_v23 = vmul.f32 %v656_v17, %v647_v15 }
 0x1ed   : > { %v688_v25 = vadd.f32 %v680_v53, %v668_v21  ;;  %v689_v4 = vadd.f32 %v684_v5, %v669_v20  ;;  %v686_v37 = vadd.f32 %v672_v24, %v666_v18  ;;  %v687_v26 = vadd.f32 %v676_v19, %v667_v23 }
 0x1ee   : > { %743 = vperm.xlu2 %1640, %v713_v30  }
 0x1ef   : > { %v859_v22 = vpack.c.bf16 %v689_v4, %v688_v25  ;;  %v858_v27 = vpack.c.bf16 %v687_v26, %v686_v37 }
 0x1f1   : > { %931 = vmatpush.bf16.msra.mxu0 %v859_v22  ;;  %1571 = vmatpush.bf16.msra.mxu2 %v859_v22 }
 0x1f2   : > { %1572 = vmatpush.bf16.msra.mxu3 %v859_v22  ;;  %v2106_v36 = vpop.permute.xlu1 %803 }
 0x1f5   : > { %932 = vmatpush.bf16.msra.mxu0 %v858_v27  ;;  %1573 = vmatpush.bf16.msra.mxu2 %v858_v27 }
 0x1f6   : > { %1574 = vmatpush.bf16.msra.mxu3 %v858_v27  ;;  %822 = vrot.lane.b32.xlu2 %v1792_v0, %s1743_s11 }
 0x1f8   : > { %1541 = vmatmul.msk.bf16.vlgmr.msra.gmra.mxu0 %vm900_vm12, %v1561_v28  ;;  %1544 = vmatmul.msk.bf16.vlgmr.msra.gmra.mxu2 %vm900_vm12, %v1564_v9 }
 0x1f9   : > { %1547 = vmatmul.msk.bf16.vlgmr.msra.gmra.mxu3 %vm900_vm12, %v1567_v29 }
 0x1fe   : > { %828 = vrot.lane.b32.xlu2 %v1831_v8, %s1743_s11 }
 0x1ff   : > { %v2108_v38 = vpop.permute.xlu0 %798 }
 0x207   : > { %v2110_v39 = vpop.permute.xlu0 %783 }
 0x208   : > { %1542 = vmatmul.msk.bf16.gmra.mxu0 %vm900_vm12, %v1562_v33  ;;  %1545 = vmatmul.msk.bf16.gmra.mxu2 %vm900_vm12, %v1565_v34 }
 0x209   : > { %1548 = vmatmul.msk.bf16.gmra.mxu3 %vm900_vm12, %v1568_v7 }
 0x20b   : > { %v789_v43 = vpop.permute.xlu2 %788 }
 0x213   : > { %v794_v3 = vpop.permute.xlu1 %793  ;;  %v759_v42 = vpop.permute.xlu0 %758 }
 0x218   : > { %1543 = vmatmul.msk.bf16.gmra.mxu0 %vm900_vm12, %v1563_v32  ;;  %1546 = vmatmul.msk.bf16.gmra.mxu2 %vm900_vm12, %v1566_v35 }
 0x21b   : > { %v769_v40 = vpop.permute.xlu1 %768 }
 0x22f   : > { %v764_v44 = vpop.permute.xlu1 %763  ;;  %v2112_v45 = vpop.permute.xlu0 %753 }
 0x230   : > { %v2114_v46 = vpop.permute.xlu2 %778 }
 0x237   : > { %v739_v47 = vpop.permute.xlu1 %738  ;;  %v729_v0 = vpop.permute.xlu0 %728 }
 0x238   : > { %v2121_v51 = vpop.permute.xlu2 %773 }
 0x23f   : > { %v734_v55 = vpop.permute.xlu1 %733 }
 0x240   : > { %v2138_v18 = vpop.permute.xlu2 %748 }
 0x275   : > { %v934_v48 = vpop.f32.mrf.mxu0 }
 0x276   : > { %v2116_v49 = vadd.f32 %v934_v48, %v729_v0 }
 0x278   : > { %2492 = vst [vmem:[#allocation2_spill] sm:$0xff] %v2116_v49  ;;  %v2119_v8 = vmul.f32 0.70710677, %v2116_v49 }
 0x27a   : > { %2493 = vst [vmem:[#allocation3_spill] sm:$0xff] %v2119_v8  ;;  %v1006_v2 = vand.u32 2147483647, %v2119_v8 }
 0x27b   : > { %v949_v50 = vpop.f32.mrf.mxu2 }
 0x27c   : > { %v950_v53 = vadd.f32 %v949_v50, %v759_v42  ;;  %v964_v54 = vpop.f32.mrf.mxu3  ;;  %v1214_v61 = vsub.f32 0.0, %v1006_v2  ;;  %v1022_v63 = vmul.f32 0.3275911, %v1006_v2 }
 0x27d   : > { %v965_v56 = vadd.f32 %v964_v54, %v789_v43  ;;  %v936_v57 = vpop.f32.mrf.mxu0 }
 0x27e   : > { %v2124_v58 = vmul.f32 0.70710677, %v950_v53  ;;  %v2128_v60 = vadd.f32 %v936_v57, %v734_v55  ;;  %v1230_v13 = vmul.f32 %v1214_v61, %v1006_v2  ;;  %v1038_v14 = vadd.f32 1.0, %v1022_v63  ;;  %v744_v61 = vpop.permute.xlu2 %743 }
 0x27f   : > { %v2126_v59 = vmul.f32 0.70710677, %v965_v56  ;;  %v2148_v7 = vmul.f32 0.5, %v950_v53  ;;  %v2158_v63 = vmul.f32 0.5, %v965_v56 }
 0x280   : > { %2494 = vst [vmem:[#allocation4_spill] sm:$0xff] %v2128_v60  ;;  %v1012_v1 = vand.u32 2147483647, %v2124_v58  ;;  %v2132_v5 = vmul.f32 0.70710677, %v2128_v60  ;;  %1651 = vrcp.f32 %v1038_v14  ;;  %vm1316_vm5 = vcmp.ge.f32.partialorder %v2124_v58, 0.0 }
 0x281   : > { %v1018_v11 = vand.u32 2147483647, %v2126_v59  ;;  %v1246_v24 = vmul.f32 1.442695, %v1230_v13  ;;  %2499 = vst [vmem:[#allocation9_spill] sm:$0xff] %v2148_v7  ;;  %vm1322_vm15 = vcmp.ge.f32.partialorder %v2126_v59, 0.0 }
 0x282   : > { %2495 = vst [vmem:[#allocation5_spill] sm:$0xff] %v2132_v5  ;;  %v1028_v15 = vmul.f32 0.3275911, %v1012_v1  ;;  %v1220_v16 = vsub.f32 0.0, %v1012_v1  ;;  %v1007_v52 = vand.u32 2147483647, %v2132_v5 }
 0x283   : > { %v951_v12 = vpop.f32.mrf.mxu2  ;;  %v1034_v19 = vmul.f32 0.3275911, %v1018_v11  ;;  %v1226_v20 = vsub.f32 0.0, %v1018_v11  ;;  %1653 = vpow2.f32 %v1246_v24 }
 0x284   : > { %v952_v41 = vadd.f32 %v951_v12, %v764_v44  ;;  %v966_v62 = vpop.f32.mrf.mxu3  ;;  %v1215_v23 = vsub.f32 0.0, %v1007_v52  ;;  %v1236_v37 = vmul.f32 %v1220_v16, %v1012_v1  ;;  %v1044_v22 = vadd.f32 1.0, %v1028_v15 }
 0x285   : > { %v939_v17 = vpop.f32.mrf.mxu0  ;;  %v967_v4 = vadd.f32 %v966_v62, %v794_v3  ;;  %v1050_v27 = vadd.f32 1.0, %v1034_v19  ;;  %v1242_v28 = vmul.f32 %v1226_v20, %v1018_v11  ;;  %v1023_v29 = vmul.f32 0.3275911, %v1007_v52 }
 0x286   : > { %v2136_v21 = vmul.f32 0.70710677, %v952_v41  ;;  %v2141_v26 = vadd.f32 %v939_v17, %v739_v47  ;;  %v1231_v10 = vmul.f32 %v1215_v23, %v1007_v52  ;;  %v1258_v32 = vmul.f32 1.442695, %v1236_v37  ;;  %v2154_v48 = vpop.eup %1651 }
 0x287   : > { %v2143_v31 = vmul.f32 0.70710677, %v967_v4  ;;  %1655 = vrcp.f32 %v1044_v22  ;;  %v1270_v44 = vmul.f32 1.442695, %v1242_v28  ;;  %v1039_v50 = vadd.f32 1.0, %v1023_v29 }
 0x288   : > { %2496 = vst [vmem:[#allocation6_spill] sm:$0xff] %v2136_v21  ;;  %v1013_v25 = vand.u32 2147483647, %v2136_v21  ;;  %v2146_v33 = vmul.f32 0.70710677, %v2141_v26  ;;  %1657 = vrcp.f32 %v1050_v27  ;;  %v2164_v15 = vmul.f32 0.5, %v952_v41 }
 0x289   : > { %2497 = vst [vmem:[#allocation7_spill] sm:$0xff] %v2141_v26  ;;  %v1019_v42 = vand.u32 2147483647, %v2143_v31  ;;  %v1248_v53 = vmul.f32 1.442695, %v1231_v10  ;;  %1659 = vpow2.f32 %v1258_v32  ;;  %v2160_v12 = vpop.eup %1653  ;;  %v2173_v24 = vmul.f32 0.5, %v967_v4 }
 0x28a   : > { %v1221_v9 = vsub.f32 0.0, %v1013_v25  ;;  %2498 = vst [vmem:[#allocation8_spill] sm:$0xff] %v2146_v33  ;;  %v1029_v35 = vmul.f32 0.3275911, %v1013_v25  ;;  %v1008_v47 = vand.u32 2147483647, %v2146_v33  ;;  %1661 = vpow2.f32 %v1270_v44 }
 0x28b   : > { %v954_v34 = vpop.f32.mrf.mxu2  ;;  %v1227_v54 = vsub.f32 0.0, %v1019_v42  ;;  %2500 = vst [vmem:[#allocation10_spill] sm:$0xff] %v2160_v12  ;;  %1663 = vrcp.f32 %v1039_v50  ;;  %vm1323_vm0 = vcmp.ge.f32.partialorder %v2143_v31, 0.0 }
 0x28c   : > { %v955_v6 = vadd.f32 %v954_v34, %v769_v40  ;;  %v969_v30 = vpop.f32.mrf.mxu3  ;;  %v1237_v3 = vmul.f32 %v1221_v9, %v1013_v25  ;;  %v1035_v40 = vmul.f32 0.3275911, %v1019_v42  ;;  %v1216_v55 = vsub.f32 0.0, %v1008_v47  ;;  %2501 = vst [vmem:[#allocation11_spill] sm:$0xff] %v2164_v15 }
 0x28d   : > { %v941_v43 = vpop.f32.mrf.mxu0  ;;  %v970_v57 = vadd.f32 %v969_v30, %v2108_v38  ;;  %v1045_v1 = vadd.f32 1.0, %v1029_v35  ;;  %v1024_v13 = vmul.f32 0.3275911, %v1008_v47  ;;  %v1243_v16 = vmul.f32 %v1227_v54, %v1019_v42  ;;  %v2168_v17 = vpop.eup %1655 }
 0x28e   : > { %v2152_v0 = vmul.f32 0.70710677, %v955_v6  ;;  %v1260_v11 = vmul.f32 1.442695, %v1237_v3  ;;  %v2166_v52 = vadd.f32 %v941_v43, %v744_v61  ;;  %1665 = vpow2.f32 %v1248_v53  ;;  %v2171_v23 = vpop.eup %1657 }
 0x28f   : > { %v2162_v14 = vmul.f32 0.70710677, %v970_v57  ;;  %v1051_v56 = vadd.f32 1.0, %v1035_v40  ;;  %v1232_v19 = vmul.f32 %v1216_v55, %v1008_v47  ;;  %1667 = vrcp.f32 %v1045_v1  ;;  %v2178_v29 = vpop.eup %1659 }
 0x290   : > { %v1014_v2 = vand.u32 2147483647, %v2152_v0  ;;  %2502 = vst [vmem:[#allocation12_spill] sm:$0xff] %v2166_v52  ;;  %v2176_v41 = vmul.f32 0.70710677, %v2166_v52  ;;  %1669 = vpow2.f32 %v1260_v11  ;;  %v1040_v22 = vadd.f32 1.0, %v1024_v13  ;;  %v2182_v4 = vpop.eup %1661 }
 0x291   : > { %v1020_v20 = vand.u32 2147483647, %v2162_v14  ;;  %2504 = vst [vmem:[#allocation14_spill] sm:$0xff] %v2178_v29  ;;  %v1272_v10 = vmul.f32 1.442695, %v1243_v16  ;;  %1671 = vrcp.f32 %v1051_v56  ;;  %v2184_v3 = vmul.f32 0.5, %v955_v6  ;;  %v2187_v43 = vpop.eup %1663 }
 0x292   : > { %v1222_v62 = vsub.f32 0.0, %v1014_v2  ;;  %v1030_v25 = vmul.f32 0.3275911, %v1014_v2  ;;  %2503 = vst [vmem:[#allocation13_spill] sm:$0xff] %v2176_v41  ;;  %v1009_v30 = vand.u32 2147483647, %v2176_v41  ;;  %1673 = vrcp.f32 %v1040_v22 }
 0x293   : > { %v956_v38 = vpop.f32.mrf.mxu2  ;;  %v1228_v28 = vsub.f32 0.0, %v1020_v20  ;;  %v1036_v34 = vmul.f32 0.3275911, %v1020_v20  ;;  %v1250_v35 = vmul.f32 1.442695, %v1232_v19  ;;  %1675 = vpow2.f32 %v1272_v10 }
 0x294   : > { %v971_v37 = vpop.f32.mrf.mxu3  ;;  %v1238_v27 = vmul.f32 %v1222_v62, %v1014_v2  ;;  %v957_v32 = vadd.f32 %v956_v38, %v2121_v51  ;;  %v1046_v44 = vadd.f32 1.0, %v1030_v25  ;;  %v1217_v50 = vsub.f32 0.0, %v1009_v30  ;;  %v2191_v54 = vpop.eup %1665 }
 0x295   : > { %v944_v9 = vpop.f32.mrf.mxu0  ;;  %v972_v42 = vadd.f32 %v971_v37, %v2106_v36  ;;  %v1244_v47 = vmul.f32 %v1228_v28, %v1020_v20  ;;  %2505 = vst [vmem:[#allocation15_spill] sm:$0xff] %v2191_v54  ;;  %v2193_v51 = vmul.f32 0.5, %v970_v57  ;;  %v2197_v2 = vpop.eup %1667  ;;  %v1052_v6 = vadd.f32 1.0, %v1036_v34 }
 0x296   : > { %v2189_v53 = vmul.f32 0.70710677, %v957_v32  ;;  %v1262_v40 = vmul.f32 1.442695, %v1238_v27  ;;  %v1025_v36 = vmul.f32 0.3275911, %v1009_v30  ;;  %v2200_v11 = vpop.eup %1669  ;;  %1677 = vpow2.f32 %v1250_v35 }
 0x297   : > { %v2195_v55 = vmul.f32 0.70710677, %v972_v42  ;;  %2506 = vst [vmem:[#allocation16_spill] sm:$0xff] %v2200_v11  ;;  %v1233_v13 = vmul.f32 %v1217_v50, %v1009_v30  ;;  %v945_v16 = vadd.f32 %v944_v9, %v2138_v18  ;;  %1679 = vrcp.f32 %v1046_v44  ;;  %v2204_v19 = vpop.eup %1671 }
 0x298   : > { %v1015_v61 = vand.u32 2147483647, %v2189_v53  ;;  %v1274_v57 = vmul.f32 1.442695, %v1244_v47  ;;  %1681 = vpow2.f32 %v1262_v40  ;;  %v1041_v22 = vadd.f32 1.0, %v1025_v36  ;;  %v2209_v10 = vpop.eup %1673 }
 0x299   : > { %v1021_v62 = vand.u32 2147483647, %v2195_v55  ;;  %v2206_v37 = vmul.f32 0.70710677, %v945_v16  ;;  %1683 = vrcp.f32 %v1052_v6  ;;  %v1252_v34 = vmul.f32 1.442695, %v1233_v13  ;;  %v2212_v44 = vpop.eup %1675 }
 0x29a   : > { %v1031_v38 = vmul.f32 0.3275911, %v1015_v61  ;;  %v1223_v56 = vsub.f32 0.0, %v1015_v61  ;;  %1685 = vpow2.f32 %v1274_v57  ;;  %v2214_v47 = vmul.f32 0.5, %v957_v32 }
 0x29b   : > { %v959_v1 = vpop.f32.mrf.mxu2  ;;  %v1037_v20 = vmul.f32 0.3275911, %v1021_v62  ;;  %v1229_v25 = vsub.f32 0.0, %v1021_v62  ;;  %2507 = vst [vmem:[#allocation17_spill] sm:$0xff] %v2206_v37  ;;  %v1010_v30 = vand.u32 2147483647, %v2206_v37 }
 0x29c   : > { %v1239_v27 = vmul.f32 %v1223_v56, %v1015_v61  ;;  %v960_v28 = vadd.f32 %v959_v1, %v2114_v46  ;;  %v1047_v50 = vadd.f32 1.0, %v1031_v38  ;;  %v2218_v6 = vpop.eup %1677  ;;  %v2222_v13 = vmul.f32 0.5, %v972_v42 }
 0x29d   : > { %v1053_v18 = vadd.f32 1.0, %v1037_v20  ;;  %v1245_v9 = vmul.f32 %v1229_v25, %v1021_v62  ;;  %v946_v35 = vpop.f32.mrf.mxu0  ;;  %2508 = vst [vmem:[#allocation18_spill] sm:$0xff] %v2218_v6  ;;  %v1026_v46 = vmul.f32 0.3275911, %v1010_v30  ;;  %v1218_v61 = vsub.f32 0.0, %v1010_v30  ;;  %v2220_v1 = vpop.eup %1679 }
 0x29e   : > { %v2216_v40 = vmul.f32 0.70710677, %v960_v28  ;;  %v1264_v36 = vmul.f32 1.442695, %v1239_v27  ;;  %v2226_v57 = vadd.f32 %v946_v35, %v2112_v45  ;;  %v2228_v38 = vpop.eup %1681  ;;  %v2236_v60 = vmul.f32 0.5, %v945_v16 }
 0x29f   : > { %1687 = vrcp.f32 %v1053_v18  ;;  %v1276_v56 = vmul.f32 1.442695, %v1245_v9  ;;  %v1234_v20 = vmul.f32 %v1218_v61, %v1010_v30  ;;  %v2231_v27 = vpop.eup %1683  ;;  %v1042_v45 = vadd.f32 1.0, %v1026_v46 }
 0x2a0   : > { %1689 = vrcp.f32 %v1041_v22  ;;  %v1016_v62 = vand.u32 2147483647, %v2216_v40  ;;  %2509 = vst [vmem:[#allocation19_spill] sm:$0xff] %v2226_v57  ;;  %v2234_v42 = vmul.f32 0.70710677, %v2226_v57  ;;  %v2240_v49 = vpop.eup %1685  ;;  %vm1324_vm13 = vcmp.ge.f32.partialorder %v2162_v14, 0.0 }
 0x2a1   : > { %1691 = vpow2.f32 %v1252_v34  ;;  %2511 = vst [vmem:[#allocation21_spill] sm:$0xff] %v2236_v60  ;;  %v1254_v34 = vmul.f32 1.442695, %v1234_v20  ;;  %v1084_v16 = vmul.f32 1.0614054, %v2231_v27  ;;  %vm1325_vm14 = vcmp.ge.f32.partialorder %v2195_v55, 0.0 }
 0x2a2   : > { %1693 = vrcp.f32 %v1047_v50  ;;  %v1032_v18 = vmul.f32 0.3275911, %v1016_v62  ;;  %v1224_v22 = vsub.f32 0.0, %v1016_v62  ;;  %2510 = vst [vmem:[#allocation20_spill] sm:$0xff] %v2234_v42  ;;  %v2245_v50 = vmul.f32 0.5, %v960_v28 }
 0x2a3   : > { %v961_v32 = vpop.f32.mrf.mxu2  ;;  %1695 = vpow2.f32 %v1264_v36  ;;  %v1100_v54 = vadd.f32 -1.4531521, %v1084_v16  ;;  %v1082_v60 = vmul.f32 1.0614054, %v2171_v23  ;;  %v1083_v57 = vmul.f32 1.0614054, %v2204_v19 }
 0x2a4   : > { %v962_v25 = vadd.f32 %v961_v32, %v2110_v39  ;;  %v1048_v9 = vadd.f32 1.0, %v1032_v18  ;;  %v1240_v30 = vmul.f32 %v1224_v22, %v1016_v62  ;;  %v1011_v39 = vand.u32 2147483647, %v2234_v42  ;;  %v2522_v58 = vld [vmem:[#allocation18_spill] sm:$0xff] }
 0x2a5   : > { %v2243_v61 = vpop.eup %1687  ;;  %1697 = vpow2.f32 %v1276_v56  ;;  %v1099_v16 = vadd.f32 -1.4531521, %v1083_v57  ;;  %vm1320_vm1 = vcmp.ge.f32.partialorder %v2216_v40, 0.0  ;;  %vm1318_vm2 = vcmp.ge.f32.partialorder %v2152_v0, 0.0 }
 0x2a6   : > { %v2238_v35 = vmul.f32 0.70710677, %v962_v25  ;;  %v2249_v36 = vpop.eup %1689  ;;  %1699 = vrcp.f32 %v1048_v9  ;;  %v1266_v46 = vmul.f32 1.442695, %v1240_v30  ;;  %v1027_v5 = vmul.f32 0.3275911, %v1011_v39 }
 0x2a7   : > { %v1219_v8 = vsub.f32 0.0, %v1011_v39  ;;  %v2251_v20 = vpop.eup %1691  ;;  %1701 = vrcp.f32 %v1042_v45  ;;  %v1085_v22 = vmul.f32 1.0614054, %v2243_v61  ;;  %v2259_v41 = vmul.f32 0.5, %v962_v25 }
 0x2a8   : > { %v1017_v32 = vand.u32 2147483647, %v2238_v35  ;;  %2512 = vst [vmem:[#allocation22_spill] sm:$0xff] %v2251_v20  ;;  %v2254_v56 = vpop.eup %1693  ;;  %1703 = vpow2.f32 %v1254_v34  ;;  %v1043_v28 = vadd.f32 1.0, %v1027_v5  ;;  %v1116_v45 = vmul.f32 %v2231_v27, %v1100_v54 }
 0x2a9   : > { %v1235_v26 = vmul.f32 %v1219_v8, %v1011_v39  ;;  %v2256_v12 = vpop.eup %1695  ;;  %v1101_v30 = vadd.f32 -1.4531521, %v1085_v22  ;;  %1705 = vpow2.f32 %v1266_v46  ;;  %v1098_v5 = vadd.f32 -1.4531521, %v1082_v60 }
 0x2aa   : > { %v1033_v62 = vmul.f32 0.3275911, %v1017_v32  ;;  %v1225_v18 = vsub.f32 0.0, %v1017_v32  ;;  %v1078_v25 = vmul.f32 1.0614054, %v2220_v1  ;;  %v1115_v60 = vmul.f32 %v2204_v19, %v1099_v16 }
 0x2ab   : > { %v2263_v15 = vpop.eup %1697  ;;  %v2265_v34 = vmul.f32 1.442695, %v1235_v26  ;;  %v1117_v8 = vmul.f32 %v2243_v61, %v1101_v30  ;;  %vm1319_vm3 = vcmp.ge.f32.partialorder %v2189_v53, 0.0  ;;  %vm1321_vm4 = vcmp.ge.f32.partialorder %v2238_v35, 0.0 }
 0x2ac   : > { %v1049_v52 = vadd.f32 1.0, %v1033_v62  ;;  %v1241_v9 = vmul.f32 %v1225_v18, %v1017_v32  ;;  %v2268_v39 = vpop.eup %1699  ;;  %v1132_v32 = vadd.f32 1.4214138, %v1116_v45  ;;  %v1114_v18 = vmul.f32 %v2171_v23, %v1098_v5 }
 0x2ad   : > { %v2271_v46 = vpop.eup %1701  ;;  %v1133_v62 = vadd.f32 1.4214138, %v1117_v8  ;;  %v1080_v26 = vmul.f32 1.0614054, %v2268_v39  ;;  %v1094_v30 = vadd.f32 -1.4531521, %v1078_v25 }
 0x2ae   : > { %1707 = vrcp.f32 %v1049_v52  ;;  %v1268_v54 = vmul.f32 1.442695, %v1241_v9  ;;  %v2275_v22 = vpop.eup %1703  ;;  %v1148_v52 = vmul.f32 %v2231_v27, %v1132_v32  ;;  %v1130_v45 = vadd.f32 1.4214138, %v1114_v18 }
 0x2af   : > { %1709 = vrcp.f32 %v1043_v28  ;;  %2513 = vst [vmem:[#allocation23_spill] sm:$0xff] %v2275_v22  ;;  %v1079_v28 = vmul.f32 1.0614054, %v2254_v56  ;;  %v1149_v57 = vmul.f32 %v2243_v61, %v1133_v62  ;;  %v1096_v20 = vadd.f32 -1.4531521, %v1080_v26  ;;  %v2284_v8 = vpop.eup %1705 }
 0x2b0   : > { %v2282_v9 = vmul.f32 1.0614054, %v2168_v17  ;;  %v1164_v5 = vadd.f32 -0.28449672, %v1148_v52  ;;  %v1131_v6 = vadd.f32 1.4214138, %v1115_v60  ;;  %v1110_v33 = vmul.f32 %v2220_v1, %v1094_v30 }
 0x2b1   : > { %v1095_v7 = vadd.f32 -1.4531521, %v1079_v28  ;;  %v1165_v16 = vadd.f32 -0.28449672, %v1149_v57  ;;  %v1146_v22 = vmul.f32 %v2171_v23, %v1130_v45  ;;  %v1112_v25 = vmul.f32 %v2268_v39, %v1096_v20 }
 0x2b2   : > { %v2292_v62 = vmul.f32 1.0614054, %v2197_v2  ;;  %v1180_v26 = vmul.f32 %v2231_v27, %v1164_v5  ;;  %v1147_v52 = vmul.f32 %v2204_v19, %v1131_v6  ;;  %v1126_v45 = vadd.f32 1.4214138, %v1110_v33 }
 0x2b3   : > { %v1111_v28 = vmul.f32 %v2254_v56, %v1095_v7  ;;  %v1181_v30 = vmul.f32 %v2243_v61, %v1165_v16  ;;  %v1162_v57 = vadd.f32 -0.28449672, %v1146_v22  ;;  %v1128_v42 = vadd.f32 1.4214138, %v1112_v25 }
 0x2b4   : > { %v2287_v32 = vpop.eup %1707  ;;  %1711 = vpow2.f32 %v1268_v54  ;;  %v1196_v20 = vadd.f32 0.2548296, %v1180_v26  ;;  %v1163_v11 = vadd.f32 -0.28449672, %v1147_v52  ;;  %v1142_v54 = vmul.f32 %v2220_v1, %v1126_v45 }
 0x2b5   : > { %v2294_v18 = vpop.eup %1709  ;;  %v1081_v60 = vmul.f32 1.0614054, %v2287_v32  ;;  %v1197_v29 = vadd.f32 0.2548296, %v1181_v30  ;;  %v1178_v5 = vmul.f32 %v2171_v23, %v1162_v57  ;;  %v1144_v6 = vmul.f32 %v2268_v39, %v1128_v42 }
 0x2b6   : > { %v1127_v21 = vadd.f32 1.4214138, %v1111_v28  ;;  %v1212_v7 = vmul.f32 %v2231_v27, %v1196_v20  ;;  %v1179_v22 = vmul.f32 %v2204_v19, %v1163_v11  ;;  %v1158_v30 = vadd.f32 -0.28449672, %v1142_v54 }
 0x2b7   : > { %v1097_v37 = vadd.f32 -1.4531521, %v1081_v60  ;;  %v1213_v16 = vmul.f32 %v2243_v61, %v1197_v29  ;;  %v1194_v25 = vadd.f32 0.2548296, %v1178_v5  ;;  %v1160_v26 = vadd.f32 -0.28449672, %v1144_v6 }
 0x2b8   : > { %v1143_v52 = vmul.f32 %v2254_v56, %v1127_v21  ;;  %v1292_v42 = vmul.f32 %v2240_v49, %v1212_v7  ;;  %v1195_v60 = vadd.f32 0.2548296, %v1179_v22  ;;  %v1174_v49 = vmul.f32 %v2220_v1, %v1158_v30 }
 0x2b9   : > { %v1113_v33 = vmul.f32 %v2287_v32, %v1097_v37  ;;  %v1293_v11 = vmul.f32 %v2263_v15, %v1213_v16  ;;  %v1210_v37 = vmul.f32 %v2171_v23, %v1194_v25  ;;  %v1176_v27 = vmul.f32 %v2268_v39, %v1160_v26 }
 0x2ba   : > { %v1159_v29 = vadd.f32 -0.28449672, %v1143_v52  ;;  %v1712_v61 = vpop.eup %1711  ;;  %v1308_v57 = vsub.f32 1.0, %v1292_v42  ;;  %v1211_v21 = vmul.f32 %v2204_v19, %v1195_v60  ;;  %1713 = vpow2.f32 %v2265_v34 }
 0x2bb   : > { %v1129_v28 = vadd.f32 1.4214138, %v1113_v33  ;;  %v1309_v20 = vsub.f32 1.0, %v1293_v11  ;;  %v1290_v5 = vmul.f32 %v2182_v4, %v1210_v37  ;;  %v1192_v6 = vadd.f32 0.2548296, %v1176_v27 }
 0x2bc   : > { %v1175_v7 = vmul.f32 %v2254_v56, %v1159_v29  ;;  %v1340_v15 = vsub.f32 0.0, %v1308_v57  ;;  %v1291_v23 = vmul.f32 %v2212_v44, %v1211_v21  ;;  %v1190_v33 = vadd.f32 0.2548296, %v1174_v49 }
 0x2bd   : > { %v1145_v45 = vmul.f32 %v2287_v32, %v1129_v28  ;;  %v1341_v54 = vsub.f32 0.0, %v1309_v20  ;;  %v1306_v16 = vsub.f32 1.0, %v1290_v5  ;;  %v1208_v19 = vmul.f32 %v2268_v39, %v1192_v6 }
 0x2be   : > { %v1191_v25 = vadd.f32 0.2548296, %v1175_v7  ;;  %v1356_v4 = vsel %vm1324_vm13, %v1308_v57, %v1340_v15  ;;  %v1307_v26 = vsub.f32 1.0, %v1291_v23  ;;  %v1206_v42 = vmul.f32 %v2220_v1, %v1190_v33 }
 0x2bf   : > { %v1161_v22 = vadd.f32 -0.28449672, %v1145_v45  ;;  %v1357_v44 = vsel %vm1325_vm14, %v1309_v20, %v1341_v54  ;;  %v1372_v60 = vadd.f32 1.0, %v1356_v4  ;;  %v1338_v28 = vsub.f32 0.0, %v1306_v16 }
 0x2c0   : > { %v1288_v30 = vmul.f32 %v2284_v8, %v1208_v19  ;;  %v1373_v39 = vadd.f32 1.0, %v1357_v44  ;;  %v1339_v11 = vsub.f32 0.0, %v1307_v26  ;;  %v1207_v14 = vmul.f32 %v2254_v56, %v1191_v25  ;;  %v2369_v35 = vpop.eup %1713 }
 0x2c1   : > { %v1177_v52 = vmul.f32 %v2287_v32, %v1161_v22  ;;  %v1388_v27 = vmul.f32 %v1372_v60, %v2193_v51  ;;  %v1354_v1 = vsel %vm1322_vm15, %v1306_v16, %v1338_v28  ;;  %v1286_v29 = vmul.f32 %v2228_v38, %v1206_v42 }
 0x2c2   : > { %v1304_v55 = vsub.f32 1.0, %v1288_v30  ;;  %v1389_v57 = vmul.f32 %v1373_v39, %v2222_v13  ;;  %v1355_v8 = vsel %vm1323_vm0, %v1307_v26, %v1339_v11  ;;  %v1370_v21 = vadd.f32 1.0, %v1354_v1 }
 0x2c3   : > { %v1193_v37 = vadd.f32 0.2548296, %v1177_v52  ;;  %v1371_v49 = vadd.f32 1.0, %v1355_v8  ;;  %v1287_v20 = vmul.f32 %v2256_v12, %v1207_v14  ;;  %v1302_v5 = vsub.f32 1.0, %v1286_v29 }
 0x2c4   : > { %v1336_v56 = vsub.f32 0.0, %v1304_v55  ;;  %v1397_v51 = vpack.c.bf16 %v1389_v57, %v1388_v27  ;;  %v1386_v59 = vmul.f32 %v1370_v21, %v2158_v63  ;;  %v1092_v7 = vadd.f32 -1.4531521, %v2282_v9 }
 0x2c5   : > { %v1209_v45 = vmul.f32 %v2287_v32, %v1193_v37  ;;  %v1387_v38 = vmul.f32 %v1371_v49, %v2173_v24  ;;  %v1303_v13 = vsub.f32 1.0, %v1287_v20  ;;  %v1334_v15 = vsub.f32 0.0, %v1302_v5 }
 0x2c6   : > { %v1352_v31 = vsel %vm1320_vm1, %v1304_v55, %v1336_v56  ;;  %1410 = vmatpush.bf16.msra.mxu1 %v1397_v51  ;;  %1575 = vmatpush.bf16.msrb.mxu3 %v1397_v51  ;;  %v1093_v12 = vadd.f32 -1.4531521, %v2292_v62  ;;  %v1108_v22 = vmul.f32 %v2168_v17, %v1092_v7  ;;  %v1074_v24 = vmul.f32 1.0614054, %v2271_v46 }
 0x2c7   : > { %v1289_v6 = vmul.f32 %v1712_v61, %v1209_v45  ;;  %v1368_v23 = vadd.f32 1.0, %v1352_v31  ;;  %v1335_v63 = vsub.f32 0.0, %v1303_v13  ;;  %v1350_v9 = vsel %vm1318_vm2, %v1302_v5, %v1334_v15  ;;  %v2514_v31 = vld [vmem:[#allocation6_spill] sm:$0xff] }
 0x2c8   : > { %v1396_v40 = vpack.c.bf16 %v1387_v38, %v1386_v59  ;;  %v1366_v33 = vadd.f32 1.0, %v1350_v9  ;;  %v1109_v54 = vmul.f32 %v2197_v2, %v1093_v12  ;;  %v1124_v19 = vadd.f32 1.4214138, %v1108_v22 }
 0x2c9   : > { %v1305_v32 = vsub.f32 1.0, %v1289_v6  ;;  %v1351_v16 = vsel %vm1319_vm3, %v1303_v13, %v1335_v63  ;;  %v1075_v62 = vmul.f32 1.0614054, %v2294_v18  ;;  %v1090_v25 = vadd.f32 -1.4531521, %v1074_v24  ;;  %v2515_v24 = vld [vmem:[#allocation14_spill] sm:$0xff] }
 0x2ca   : > { %1411 = vmatpush.bf16.msra.mxu1 %v1396_v40  ;;  %1576 = vmatpush.bf16.msrb.mxu3 %v1396_v40  ;;  %v1384_v34 = vmul.f32 %v1368_v23, %v2245_v50  ;;  %v1367_v4 = vadd.f32 1.0, %v1351_v16  ;;  %v1125_v26 = vadd.f32 1.4214138, %v1109_v54  ;;  %v1140_v42 = vmul.f32 %v2168_v17, %v1124_v19  ;;  %v2516_v54 = vld [vmem:[#allocation17_spill] sm:$0xff]  ;;  %v2517_v16 = vld [vmem:[#allocation16_spill] sm:$0xff] }
 0x2cb   : > { %v1337_v61 = vsub.f32 0.0, %v1305_v32  ;;  %v1091_v44 = vadd.f32 -1.4531521, %v1075_v62  ;;  %v1106_v53 = vmul.f32 %v2271_v46, %v1090_v25  ;;  %v1382_v60 = vmul.f32 %v1366_v33, %v2184_v3 }
 0x2cc   : > { %v1141_v28 = vmul.f32 %v2197_v2, %v1125_v26  ;;  %v1072_v30 = vmul.f32 1.0614054, %v2209_v10  ;;  %v1073_v39 = vmul.f32 1.0614054, %v2249_v36  ;;  %v1156_v11 = vadd.f32 -0.28449672, %v1140_v42 }
 0x2cd   : > { %v1353_v0 = vsel %vm1321_vm4, %v1305_v32, %v1337_v61  ;;  %v1107_v37 = vmul.f32 %v2294_v18, %v1091_v44  ;;  %v1122_v14 = vadd.f32 1.4214138, %v1106_v53  ;;  %v1383_v27 = vmul.f32 %v1367_v4, %v2214_v47 }
 0x2ce   : > { %v1369_v52 = vadd.f32 1.0, %v1353_v0  ;;  %v1157_v1 = vadd.f32 -0.28449672, %v1141_v28  ;;  %v1088_v55 = vadd.f32 -1.4531521, %v1072_v30  ;;  %v1172_v57 = vmul.f32 %v2168_v17, %v1156_v11 }
 0x2cf   : > { %v1089_v29 = vadd.f32 -1.4531521, %v1073_v39  ;;  %v1123_v8 = vadd.f32 1.4214138, %v1107_v37  ;;  %v1138_v21 = vmul.f32 %v2271_v46, %v1122_v14  ;;  %v1070_v56 = vmul.f32 1.0614054, %v2154_v48 }
 0x2d0   : > { %v1385_v50 = vmul.f32 %v1369_v52, %v2259_v41  ;;  %v1173_v45 = vmul.f32 %v2197_v2, %v1157_v1  ;;  %v1104_v49 = vmul.f32 %v2209_v10, %v1088_v55  ;;  %v1188_v47 = vadd.f32 0.2548296, %v1172_v57  ;;  %v2518_v52 = vld [vmem:[#allocation20_spill] sm:$0xff]  ;;  %v2519_v39 = vld [vmem:[#allocation23_spill] sm:$0xff] }
 0x2d1   : > { %v1105_v41 = vmul.f32 %v2249_v36, %v1089_v29  ;;  %v1139_v20 = vmul.f32 %v2294_v18, %v1123_v8  ;;  %v1154_v5 = vadd.f32 -0.28449672, %v1138_v21  ;;  %v1071_v51 = vmul.f32 1.0614054, %v2187_v43  ;;  %v2520_v1 = vld [vmem:[#allocation8_spill] sm:$0xff] }
 0x2d2   : > { %v1395_v3 = vpack.c.bf16 %v1385_v50, %v1384_v34  ;;  %v1394_v59 = vpack.c.bf16 %v1383_v27, %v1382_v60  ;;  %v1189_v6 = vadd.f32 0.2548296, %v1173_v45  ;;  %v1120_v7 = vadd.f32 1.4214138, %v1104_v49 }
 0x2d3   : > { %v1121_v38 = vadd.f32 1.4214138, %v1105_v41  ;;  %vm1317_vm6 = vcmp.ge.f32.partialorder %v2514_v31, 0.0  ;;  %v1204_v13 = vmul.f32 %v2168_v17, %v1188_v47  ;;  %v1155_v15 = vadd.f32 -0.28449672, %v1139_v20  ;;  %v2521_v20 = vld [vmem:[#allocation9_spill] sm:$0xff] }
 0x2d4   : > { %1412 = vmatpush.bf16.msra.mxu1 %v1395_v3  ;;  %1577 = vmatpush.bf16.msrb.mxu3 %v1395_v3  ;;  %v1170_v32 = vmul.f32 %v2271_v46, %v1154_v5  ;;  %v1086_v23 = vadd.f32 -1.4531521, %v1070_v56  ;;  %v1205_v12 = vmul.f32 %v2197_v2, %v1189_v6  ;;  %v1136_v22 = vmul.f32 %v2209_v10, %v1120_v7  ;;  %v2524_v7 = vld [vmem:[#allocation11_spill] sm:$0xff] }
 0x2d5   : > { %v1137_v63 = vmul.f32 %v2249_v36, %v1121_v38  ;;  %v1087_v9 = vadd.f32 -1.4531521, %v1071_v51  ;;  %v1284_v40 = vmul.f32 %v2515_v24, %v1204_v13  ;;  %v1171_v61 = vmul.f32 %v2294_v18, %v1155_v15 }
 0x2d6   : > { %v1186_v33 = vadd.f32 0.2548296, %v1170_v32  ;;  %v1102_v17 = vmul.f32 %v2154_v48, %v1086_v23  ;;  %vm1314_vm8 = vcmp.ge.f32.partialorder %v2516_v54, 0.0  ;;  %v1285_v19 = vmul.f32 %v2517_v16, %v1205_v12  ;;  %v2526_v54 = vld [vmem:[#allocation13_spill] sm:$0xff] }
 0x2d7   : > { %v1152_v62 = vadd.f32 -0.28449672, %v1136_v22  ;;  %v1153_v2 = vadd.f32 -0.28449672, %v1137_v63  ;;  %v1103_v25 = vmul.f32 %v2187_v43, %v1087_v9  ;;  %v1300_v0 = vsub.f32 1.0, %v1284_v40  ;;  %v2525_v9 = vld [vmem:[#allocation19_spill] sm:$0xff] }
 0x2d8   : > { %1413 = vmatpush.bf16.msra.mxu1 %v1394_v59  ;;  %1578 = vmatpush.bf16.msrb.mxu3 %v1394_v59  ;;  %v1187_v34 = vadd.f32 0.2548296, %v1171_v61  ;;  %v1202_v4 = vmul.f32 %v2271_v46, %v1186_v33  ;;  %v1118_v26 = vadd.f32 1.4214138, %v1102_v17  ;;  %vm1315_vm9 = vcmp.ge.f32.partialorder %v2518_v52, 0.0  ;;  %v2523_v59 = vld [vmem:[#allocation22_spill] sm:$0xff] }
 0x2d9   : > { %v1301_v42 = vsub.f32 1.0, %v1285_v19  ;;  %v1168_v44 = vmul.f32 %v2209_v10, %v1152_v62  ;;  %v1169_v53 = vmul.f32 %v2249_v36, %v1153_v2  ;;  %v1119_v60 = vadd.f32 1.4214138, %v1103_v25  ;;  %v2527_v16 = vld [vmem:[#allocation21_spill] sm:$0xff]  ;;  %v2528_v25 = vld [vmem:[#allocation12_spill] sm:$0xff]  ;;  %v1715_v52 = vld [vmem:[%s2471_s1 + $0x8] sm:$0xff] }
 0x2da   : > { %v1332_v28 = vsub.f32 0.0, %v1300_v0  ;;  %v1203_v30 = vmul.f32 %v2294_v18, %v1187_v34  ;;  %v1282_v50 = vmul.f32 %v2519_v39, %v1202_v4  ;;  %v1134_v11 = vmul.f32 %v2154_v48, %v1118_v26 }
 0x2db   : > { %v1333_v37 = vsub.f32 0.0, %v1301_v42  ;;  %v1184_v14 = vadd.f32 0.2548296, %v1168_v44  ;;  %v1185_v27 = vadd.f32 0.2548296, %v1169_v53  ;;  %v1135_v46 = vmul.f32 %v2187_v43, %v1119_v60  ;;  %v2530_v60 = vld [vmem:[#allocation15_spill] sm:$0xff] }
 0x2dc   : > { %vm1312_vm10 = vcmp.ge.f32.partialorder %v2520_v1, 0.0  ;;  %v1348_v55 = vsel %vm1316_vm5, %v1300_v0, %v1332_v28  ;;  %v1283_v29 = vmul.f32 %v2369_v35, %v1203_v30  ;;  %v1298_v3 = vsub.f32 1.0, %v1282_v50  ;;  %v2531_v30 = vld [vmem:[#allocation7_spill] sm:$0xff]  ;;  %v825_v1 = vpop.permute.xlu0 %824 }
 0x2dd   : > { %v1150_v57 = vadd.f32 -0.28449672, %v1134_v11  ;;  %v1349_v18 = vsel %vm1317_vm6, %v1301_v42, %v1333_v37  ;;  %v1364_v8 = vadd.f32 1.0, %v1348_v55  ;;  %v1200_v21 = vmul.f32 %v2209_v10, %v1184_v14  ;;  %v1716_v42 = vld [vmem:[%s2471_s1] sm:$0xff]  ;;  %v1717_v11 = vld [vmem:[%s2471_s1 + $0x10] sm:$0xff]  ;;  %v823_v37 = vpop.permute.xlu2 %822 }
 0x2de   : > { %v1201_v45 = vmul.f32 %v2249_v36, %v1185_v27  ;;  %v1365_v49 = vadd.f32 1.0, %v1349_v18  ;;  %v1299_v41 = vsub.f32 1.0, %v1283_v29  ;;  %v1330_v56 = vsub.f32 0.0, %v1298_v3  ;;  %v2533_v18 = vld [vmem:[#allocation5_spill] sm:$0xff] }
 0x2df   : > { %v1151_v47 = vadd.f32 -0.28449672, %v1135_v46  ;;  %v1380_v5 = vmul.f32 %v1364_v8, %v2521_v20  ;;  %v1280_v51 = vmul.f32 %v2522_v58, %v1200_v21  ;;  %v1166_v6 = vmul.f32 %v2154_v48, %v1150_v57  ;;  %v2532_v57 = vld [vmem:[#allocation3_spill] sm:$0xff]  ;;  %v2535_v20 = vld [vmem:[#allocation4_spill] sm:$0xff] }
 0x2e0   : > { %v1281_v35 = vmul.f32 %v2523_v59, %v1201_v45  ;;  %v1381_v38 = vmul.f32 %v1365_v49, %v2524_v7  ;;  %v1331_v31 = vsub.f32 0.0, %v1299_v41  ;;  %v1346_v10 = vsel %vm1314_vm8, %v1298_v3, %v1330_v56  ;;  %v2534_v45 = vld [vmem:[#allocation2_spill] sm:$0xff]  ;;  %v1718_v59 = vld [vmem:[%s2471_s1 + $0x18] sm:$0xff] }
 0x2e1   : > { %v1167_v36 = vmul.f32 %v2187_v43, %v1151_v47  ;;  %v1362_v13 = vadd.f32 1.0, %v1346_v10  ;;  %v1296_v15 = vsub.f32 1.0, %v1280_v51  ;;  %v1182_v23 = vadd.f32 0.2548296, %v1166_v6 }
 0x2e2   : > { %v1297_v32 = vsub.f32 1.0, %v1281_v35  ;;  %v1393_v12 = vpack.c.bf16 %v1381_v38, %v1380_v5  ;;  %v1347_v22 = vsel %vm1315_vm9, %v1299_v41, %v1331_v31  ;;  %v979_v24 = vmul.f32 0.5, %v2525_v9  ;;  %v827_v31 = vpop.permute.xlu1 %826 }
 0x2e3   : > { %v1183_v63 = vadd.f32 0.2548296, %v1167_v36  ;;  %v1363_v40 = vadd.f32 1.0, %v1347_v22  ;;  %v1328_v61 = vsub.f32 0.0, %v1296_v15  ;;  %v1749_v17 = vmov 11   ;;  %v1569_v36 = vld [vmem:[%s2474_s4] sm:$0xff] }
 0x2e4   : > { %v1329_v33 = vsub.f32 0.0, %v1297_v32  ;;  %1642 = vset.pattern.permute.xlu1 %v1749_v17  ;;  %1641 = vset.pattern.permute.xlu0 %v1749_v17  ;;  %vm1313_vm11 = vcmp.ge.f32.partialorder %v2526_v54, 0.0  ;;  %v1378_v19 = vmul.f32 %v1362_v13, %v2527_v16  ;;  %v1198_v62 = vmul.f32 %v2154_v48, %v1182_v23  ;;  %v1570_v13 = vld [vmem:[%s2474_s4 + $0x8] sm:$0xff] }
 0x2e5   : > { %1414 = vmatpush.bf16.msra.mxu1 %v1393_v12  ;;  %1579 = vmatpush.bf16.msrb.mxu3 %v1393_v12  ;;  %v1199_v2 = vmul.f32 %v2187_v43, %v1183_v63  ;;  %v977_v0 = vmul.f32 0.5, %v2528_v25  ;;  %v1379_v34 = vmul.f32 %v1363_v40, %v979_v24  ;;  %v1344_v4 = vsel %vm1312_vm10, %v1296_v15, %v1328_v61  ;;  %v2529_v43 = vld [vmem:[#allocation10_spill] sm:$0xff]  ;;  %v829_v10 = vpop.permute.xlu2 %828 }
 0x2e6   : > { %v1345_v26 = vsel %vm1313_vm11, %v1297_v32, %v1329_v33  ;;  %811 = vperm.xlu1 %1642, %v1715_v52   ;;  %807 = vperm.xlu0 %1641, %v1716_v42   ;;  %v1360_v48 = vadd.f32 1.0, %v1344_v4  ;;  %v1278_v53 = vmul.f32 %v2529_v43, %v1198_v62  ;;  %v976_v39 = vmul.f32 0.5, %v2531_v30  ;;  %v1719_v33 = vld [vmem:[%s1805_s25] sm:$0xff] }
 0x2e7   : > { %v1361_v44 = vadd.f32 1.0, %v1345_v26  ;;  %v1279_v28 = vmul.f32 %v2530_v60, %v1199_v2  ;;  %1643 = vset.pattern.permute.xlu2 %v1749_v17  ;;  %v1392_v50 = vpack.c.bf16 %v1379_v34, %v1378_v19  ;;  %vm1310_vm12 = vcmp.ge.f32.partialorder %v2532_v57, 0.0  ;;  %v1720_v34 = vld [vmem:[%s1805_s25 + $0x10] sm:$0xff]  ;;  %v1722_v60 = vld [vmem:[%s1805_s25 + $0x18] sm:$0xff] }
 0x2e8   : > { %815 = vperm.xlu2 %1643, %v1717_v11   ;;  %v1294_v27 = vsub.f32 1.0, %v1278_v53  ;;  %v1376_v55 = vmul.f32 %v1360_v48, %v976_v39  ;;  %vm1311_vm13 = vcmp.ge.f32.partialorder %v2533_v18, 0.0  ;;  %v835_v21 = vmul.f32 %v1715_v52, %v825_v1  ;;  %v1721_v52 = vld [vmem:[%s1805_s25 + $0x8] sm:$0xff] }
 0x2e9   : > { %v1377_v14 = vmul.f32 %v1361_v44, %v977_v0  ;;  %v1295_v46 = vsub.f32 1.0, %v1279_v28  ;;  %1415 = vmatpush.bf16.msra.mxu1 %v1392_v50  ;;  %1580 = vmatpush.bf16.msrb.mxu3 %v1392_v50  ;;  %v974_v49 = vmul.f32 0.5, %v2534_v45  ;;  %v834_v47 = vmul.f32 %v1716_v42, %v823_v37 }
 0x2ea   : > { %v1326_v29 = vsub.f32 0.0, %v1294_v27  ;;  %v975_v5 = vmul.f32 0.5, %v2535_v20  ;;  %v1750_v35 = vmov 10   ;;  %v836_v15 = vmul.f32 %v1717_v11, %v827_v31 }
 0x2eb   : > { %v1327_v3 = vsub.f32 0.0, %v1295_v46  ;;  %v1391_v8 = vpack.c.bf16 %v1377_v14, %v1376_v55  ;;  %v837_v32 = vmul.f32 %v1718_v59, %v829_v10 }
 0x2ec   : > { %v1342_v41 = vsel %vm1310_vm12, %v1294_v27, %v1326_v29 }
 0x2ed   : > { %v1343_v56 = vsel %vm1311_vm13, %v1295_v46, %v1327_v3  ;;  %1416 = vmatpush.bf16.msra.mxu1 %v1391_v8  ;;  %1581 = vmatpush.bf16.msrb.mxu3 %v1391_v8  ;;  %v1358_v58 = vadd.f32 1.0, %v1342_v41 }
 0x2ee   : > { %v1359_v51 = vadd.f32 1.0, %v1343_v56  ;;  %819 = vperm.xlu1 %1642, %v1718_v59   ;;  %1645 = vset.pattern.permute.xlu0 %v1750_v35 }
 0x2ef   : > { %v1374_v6 = vmul.f32 %v1358_v58, %v974_v49  ;;  %845 = vperm.xlu0 %1645, %v835_v21  }
 0x2f0   : > { %v1375_v7 = vmul.f32 %v1359_v51, %v975_v5  ;;  %1644 = vset.pattern.permute.xlu2 %v1750_v35 }
 0x2f1   : > { %840 = vperm.xlu2 %1644, %v834_v47  }
 0x2f2   : > { %v1390_v38 = vpack.c.bf16 %v1375_v7, %v1374_v6 }
 0x2f4   : > { %1417 = vmatpush.bf16.msra.mxu1 %v1390_v38  ;;  %1582 = vmatpush.bf16.msrb.mxu3 %v1390_v38 }
 0x2f6   : > { %1646 = vset.pattern.permute.xlu1 %v1750_v35 }
 0x2f7   : > { %1418 = vmatmul.bf16.vlgmr.msra.gmra.mxu1 %v1569_v36  ;;  %1423 = vmatmul.bf16.vlgmr.msrb.gmra.mxu3 %v1570_v13 }
 0x2f8   : > { %850 = vperm.xlu1 %1646, %v836_v15  }
 0x2f9   : > { %855 = vperm.xlu2 %1644, %v837_v32  }
 0x342   : > { %v816_v12 = vpop.permute.xlu2 %815 }
 0x34b   : > { %v841_v40 = vpop.permute.xlu2 %840 }
 0x353   : > { %v856_v43 = vpop.permute.xlu2 %855 }
 0x358   : > { %v812_v23 = vpop.permute.xlu1 %811  ;;  %v808_v63 = vpop.permute.xlu0 %807 }
 0x360   : > { %v820_v22 = vpop.permute.xlu1 %819 }
 0x361   : > { %v846_v2 = vpop.permute.xlu0 %845 }
 0x36a   : > { %v851_v16 = vpop.permute.xlu1 %850 }
 0x374   : > { %v1419_v9 = vpop.f32.mrf.mxu1 }
 0x375   : > { %v1429_v24 = vmul.f32 %v1419_v9, %v808_v63 }
 0x377   : > { %v1433_v61 = vadd.f32 %v1429_v24, %v841_v40 }
 0x379   : > { %v1437_v17 = vadd.f32 %v1719_v33, %v1433_v61 }
 0x37a   : > { %v1424_v54 = vpop.f32.mrf.mxu3 }
 0x37b   : > { %1441 = vst.msk [vmem:[%s224_s15] sm:$0xff] %vm591_vm7, %v1437_v17  ;;  %v1431_v19 = vmul.f32 %v1424_v54, %v816_v12 }
 0x37c   : > { %v1421_v62 = vpop.f32.mrf.mxu1 }
 0x37d   : > { %v1435_v25 = vadd.f32 %v1431_v19, %v851_v16  ;;  %v1430_v0 = vmul.f32 %v1421_v62, %v812_v23 }
 0x37f   : > { %v1439_v4 = vadd.f32 %v1720_v34, %v1435_v25  ;;  %v1434_v26 = vadd.f32 %v1430_v0, %v846_v2 }
 0x381   : > { %1443 = vst.msk [vmem:[%s224_s15 + $0x10] sm:$0xff] %vm591_vm7, %v1439_v4  ;;  %v1438_v42 = vadd.f32 %v1721_v52, %v1434_v26 }
 0x382   : > { %v1426_v48 = vpop.f32.mrf.mxu3 }
 0x383   : > { %1442 = vst.msk [vmem:[%s224_s15 + $0x8] sm:$0xff] %vm591_vm7, %v1438_v42  ;;  %v1432_v44 = vmul.f32 %v1426_v48, %v820_v22 }
 0x385   : > { %v1436_v53 = vadd.f32 %v1432_v44, %v856_v43 }
 0x387   : > { %v1440_v28 = vadd.f32 %v1722_v60, %v1436_v53 }
 0x389   : > { %1444 = vst.msk [vmem:[%s224_s15 + $0x18] sm:$0xff] %vm591_vm7, %v1440_v28 }
 0x38a PF: > { %s15_s18 = sadd.s32 1, %s1729_s18  }
 0x38b   : > { %p12_p4 = scmp.ge.s32.totalorder %s15_s18, 4  }
 0x38d   :  { %14 = sbr.rel (!%p12_p4) target bundleno = 1 (0x1), region = 70 }

</bundles_post_ra>
